<compile_context>
chip_gen: v7x
topology: tpu7x:2x2x1
jax: 0.10.0
libtpu: 0.0.40
codegen_flags: <defaults>
</compile_context>

<pallas_src>
import jax
import jax.numpy as jnp
from jax import lax
from jax.experimental import pallas as pl
from jax.experimental.pallas import tpu as pltpu


# ----------------------------------------------------------------------------
# Pallas kernels
# ----------------------------------------------------------------------------
def nla_fused_kernel(x_ref, w1_ref, w2_ref, w3_ref, b1_ref, b2_ref, b3_ref,
                     a_ref, o_ref):
    """Fused NonLocalAttention for one batch image.

    x_ref: (1, HW, C) bf16.  Computes the three 1x1-conv projections
    (+bias+PReLU), the HW x HW score matrix, softmax and the re-assembly
    matmul entirely in VMEM.  Alphas (3 PReLU slopes) come from SMEM.
    """
    x = x_ref[0]                                            # (HW, C) bf16

    def proj(w_ref, b_ref, alpha):
        y = jnp.dot(x, w_ref[...], preferred_element_type=jnp.float32)
        y = y + b_ref[...]                                  # (1, Nc) broadcast
        return jnp.maximum(y, 0.0) + alpha * jnp.minimum(y, 0.0)

    e1 = proj(w1_ref, b1_ref, a_ref[0])                     # (HW, Cr) f32
    e2 = proj(w2_ref, b2_ref, a_ref[1])                     # (HW, Cr) f32
    g = proj(w3_ref, b3_ref, a_ref[2])                      # (HW, C)  f32

    # scores = e1 @ e2^T  (bf16 MXU operands, f32 accumulate)
    s = lax.dot_general(e1.astype(jnp.bfloat16), e2.astype(jnp.bfloat16),
                        dimension_numbers=(((1,), (1,)), ((), ())),
                        preferred_element_type=jnp.float32)  # (HW, HW)
    s = s - jnp.max(s, axis=-1, keepdims=True)
    p = jnp.exp(s)
    inv = pl.reciprocal(jnp.sum(p, axis=-1, keepdims=True), approx=True)
    p = (p * inv).astype(jnp.bfloat16)
    o_ref[0] = jnp.dot(p, g.astype(jnp.bfloat16),
                       preferred_element_type=jnp.float32).astype(o_ref.dtype)


def matmul_bias_prelu_kernel(x_ref, w_ref, b_ref, a_ref, o_ref):
    """o = PReLU(x @ w + b).  x / w are bf16 (MXU); epilogue f32; alpha in SMEM."""
    y = jnp.dot(x_ref[...], w_ref[...], preferred_element_type=jnp.float32)
    y = y + b_ref[...]
    a = a_ref[0]
    o_ref[...] = (jnp.maximum(y, 0.0) + a * jnp.minimum(y, 0.0)).astype(o_ref.dtype)


def matmul_bias_add2res_kernel(x_ref, w_ref, b_ref, r_ref, o_ref):
    """o = 2*r + x @ w + b   (2nd ResBlock conv fused with both residual adds)."""
    y = jnp.dot(x_ref[...], w_ref[...], preferred_element_type=jnp.float32)
    o_ref[...] = (y + b_ref[...] + 2.0 * r_ref[...]).astype(o_ref.dtype)


# ----------------------------------------------------------------------------
# Pallas wrappers
# ----------------------------------------------------------------------------
def _tile_m(M, cap=512):
    """M-tile (multiple of 16 for bf16 sublane packing) and padded M.
    Prefers >= 2 grid steps so both v7x TensorCores get work."""
    r = 16
    Mp = ((M + r - 1) // r) * r
    tm = min(cap, Mp)
    if Mp >= 2 * r and Mp // tm < 2:
        tm = ((Mp // 2 + r - 1) // r) * r
    Mp = ((M + tm - 1) // tm) * tm
    return tm, Mp


def matmul_bias_prelu(x2d, w_mat, bias, alpha, tm_cap=512):
    """x2d: (M, K) bf16, w_mat: (K, Nc) bf16, bias: (Nc,) f32, alpha: scalar."""
    M, K = x2d.shape
    Nc = w_mat.shape[1]
    tm, Mp = _tile_m(M, tm_cap)
    if Mp != M:
        x2d = jnp.pad(x2d, ((0, Mp - M), (0, 0)))
    b2 = bias.reshape(1, Nc).astype(jnp.float32)
    a1 = jnp.asarray(alpha, jnp.float32).reshape(1)
    out = pl.pallas_call(
        matmul_bias_prelu_kernel,
        out_shape=jax.ShapeDtypeStruct((Mp, Nc), jnp.float32),
        grid=(Mp // tm,),
        in_specs=[
            pl.BlockSpec((tm, K), lambda i: (i, 0)),
            pl.BlockSpec((K, Nc), lambda i: (0, 0)),
            pl.BlockSpec((1, Nc), lambda i: (0, 0)),
            pl.BlockSpec(memory_space=pltpu.MemorySpace.SMEM),   # PReLU alpha
        ],
        out_specs=pl.BlockSpec((tm, Nc), lambda i: (i, 0)),
        compiler_params=pltpu.CompilerParams(dimension_semantics=("parallel",)),
    )(x2d, w_mat, b2, a1)
    return out[:M]


def matmul_bias_add2res(x2d, w_mat, bias, res2d, tm_cap=512):
    """o = 2*res + x @ w + b.  x2d/w bf16; res2d (M, Nc) f32 residual."""
    M, K = x2d.shape
    Nc = w_mat.shape[1]
    tm, Mp = _tile_m(M, tm_cap)
    if Mp != M:
        x2d = jnp.pad(x2d, ((0, Mp - M), (0, 0)))
        res2d = jnp.pad(res2d, ((0, Mp - M), (0, 0)))
    b2 = bias.reshape(1, Nc).astype(jnp.float32)
    out = pl.pallas_call(
        matmul_bias_add2res_kernel,
        out_shape=jax.ShapeDtypeStruct((Mp, Nc), jnp.float32),
        grid=(Mp // tm,),
        in_specs=[
            pl.BlockSpec((tm, K), lambda i: (i, 0)),
            pl.BlockSpec((K, Nc), lambda i: (0, 0)),
            pl.BlockSpec((1, Nc), lambda i: (0, 0)),
            pl.BlockSpec((tm, Nc), lambda i: (i, 0)),
        ],
        out_specs=pl.BlockSpec((tm, Nc), lambda i: (i, 0)),
        compiler_params=pltpu.CompilerParams(dimension_semantics=("parallel",)),
    )(x2d, w_mat, b2, res2d)
    return out[:M]


def nonlocal_attention_fused(x_seq, p):
    """x_seq: (N, HW, C) bf16 -> (N, HW, C) f32 attention output."""
    N, HW, C = x_seq.shape
    Cr = p["m1_w"].shape[1]
    return pl.pallas_call(
        nla_fused_kernel,
        out_shape=jax.ShapeDtypeStruct((N, HW, C), jnp.float32),
        grid=(N,),
        in_specs=[
            pl.BlockSpec((1, HW, C), lambda b: (b, 0, 0)),
            pl.BlockSpec((C, Cr), lambda b: (0, 0)),
            pl.BlockSpec((C, Cr), lambda b: (0, 0)),
            pl.BlockSpec((C, C), lambda b: (0, 0)),
            pl.BlockSpec((1, Cr), lambda b: (0, 0)),
            pl.BlockSpec((1, Cr), lambda b: (0, 0)),
            pl.BlockSpec((1, C), lambda b: (0, 0)),
            pl.BlockSpec(memory_space=pltpu.MemorySpace.SMEM),   # 3 PReLU alphas
        ],
        out_specs=pl.BlockSpec((1, HW, C), lambda b: (b, 0, 0)),
        compiler_params=pltpu.CompilerParams(dimension_semantics=("parallel",)),
    )(x_seq, p["m1_w"], p["m2_w"], p["as_w"], p["m1_b"], p["m2_b"], p["as_b"],
      p["nla_a"])


# ----------------------------------------------------------------------------
# Plain-JAX glue: im2col / weight-layout conversion
# ----------------------------------------------------------------------------
def im2col(x_nhwc, kh, kw):
    """x already padded. Returns (N, Ho, Wo, kh*kw*C), patch order (i, j, c)."""
    N, H, W, C = x_nhwc.shape
    Ho, Wo = H - kh + 1, W - kw + 1
    cols = []
    for i in range(kh):
        for j in range(kw):
            cols.append(x_nhwc[:, i:i + Ho, j:j + Wo, :])
    return jnp.concatenate(cols, axis=-1)


def conv_w_to_mat(w):
    """PyTorch Conv2d weight (C_out, C_in, kh, kw) -> im2col weight (kh*kw*C_in, C_out)."""
    co, ci, kh, kw = w.shape
    return jnp.transpose(w, (2, 3, 1, 0)).reshape(kh * kw * ci, co)


def deconv_phase_weight(w_t, stride):
    """ConvTranspose2d weight (C_in, C_out, 3s, 3s), stride=s, padding=s ->
    phase-decomposed matmul weight (9*C_in, s*s*C_out).

    y[2-D phase p=dh*s+dw] is a 3x3 correlation of the 1-padded input with
    taps  W_t[ci, co, dh + s*(2-a), dw + s*(2-b)]  at patch position (a, b).
    """
    ci, co, k, _ = w_t.shape
    assert k == 3 * stride, (k, stride)
    a = jnp.arange(3)
    d = jnp.arange(stride)
    sel = d[:, None] + stride * (2 - a)[None, :]             # (s, 3): k-index per (d, a)
    tmp = w_t[:, :, sel, :]                                  # (ci, co, dh, a, k)
    tmp = tmp[:, :, :, :, sel]                               # (ci, co, dh, a, dw, b)
    wph = jnp.transpose(tmp, (3, 5, 0, 2, 4, 1))             # (a, b, ci, dh, dw, co)
    return wph.reshape(9 * ci, stride * stride * co)


# ----------------------------------------------------------------------------
# Parameters (deterministic synthetic init; shapes from the module's __init__)
# ----------------------------------------------------------------------------
def init_params(key, C, scale=2):
    """Raw PyTorch-layout parameters."""
    Cr = C // 2                                   # NonLocalAttention reduction=2
    k = {2: 6, 3: 9, 4: 6}[scale]
    keys = jax.random.split(key, 12)
    w = lambda kk, shp: 0.1 * jax.random.normal(kk, shp, jnp.float32)
    return dict(
        m1_w=w(keys[0], (Cr, C, 1, 1)), m1_b=w(keys[1], (Cr,)), m1_a=0.25,
        m2_w=w(keys[2], (Cr, C, 1, 1)), m2_b=w(keys[3], (Cr,)), m2_a=0.25,
        as_w=w(keys[4], (C, C, 1, 1)),  as_b=w(keys[5], (C,)),  as_a=0.25,
        up_w=w(keys[6], (C, C, k, k)),  up_b=w(keys[7], (C,)),  up_a=0.25,
        e1_w=w(keys[8], (C, C, 3, 3)),  e1_b=w(keys[9], (C,)),  e1_a=0.25,
        e2_w=w(keys[10], (C, C, 3, 3)), e2_b=w(keys[11], (C,)),
    )


def prepare_params(raw, scale=2):
    """Convert raw PyTorch-layout weights into kernel-ready (bf16) matrices."""
    stride = {2: 2, 3: 3, 4: 2}[scale]
    bf = jnp.bfloat16
    p = {"stride": stride}
    # fused NonLocalAttention
    p["m1_w"] = conv_w_to_mat(raw["m1_w"]).astype(bf)
    p["m2_w"] = conv_w_to_mat(raw["m2_w"]).astype(bf)
    p["as_w"] = conv_w_to_mat(raw["as_w"]).astype(bf)
    Cr = p["m1_w"].shape[1]
    C = p["as_w"].shape[1]
    p["m1_b"] = raw["m1_b"].reshape(1, Cr).astype(jnp.float32)
    p["m2_b"] = raw["m2_b"].reshape(1, Cr).astype(jnp.float32)
    p["as_b"] = raw["as_b"].reshape(1, C).astype(jnp.float32)
    p["nla_a"] = jnp.asarray([raw["m1_a"], raw["m2_a"], raw["as_a"]], jnp.float32)
    # ConvTranspose2d via stride-phase decomposition
    p["up_wph"] = deconv_phase_weight(raw["up_w"], stride).astype(bf)
    p["up_bph"] = jnp.tile(raw["up_b"], stride * stride).astype(jnp.float32)
    p["up_a"] = raw["up_a"]
    # encoder ResBlock convs
    p["e1_w"] = conv_w_to_mat(raw["e1_w"]).astype(bf)
    p["e1_b"] = raw["e1_b"].astype(jnp.float32)
    p["e1_a"] = raw["e1_a"]
    p["e2_w"] = conv_w_to_mat(raw["e2_w"]).astype(bf)
    p["e2_b"] = raw["e2_b"].astype(jnp.float32)
    return p


# ----------------------------------------------------------------------------
# Forward pass
# ----------------------------------------------------------------------------
def multisource_projection_forward(x_nchw, p):
    s = p["stride"]
    x = jnp.transpose(x_nchw, (0, 2, 3, 1)).astype(jnp.float32)   # NCHW -> NHWC
    N, H, W, C = x.shape
    HW = H * W

    # --- NonLocalAttention: one fused Pallas kernel per batch image ---
    attn = nonlocal_attention_fused(x.reshape(N, HW, C).astype(jnp.bfloat16), p)
    attn = attn.reshape(N, H, W, C)

    # --- upsample: ConvTranspose2d(3s, stride=s, pad=s) + PReLU, phase-decomposed ---
    cols = im2col(jnp.pad(attn.astype(jnp.bfloat16),
                          ((0, 0), (1, 1), (1, 1), (0, 0))), 3, 3)    # (N, H, W, 9C)
    y = matmul_bias_prelu(cols.reshape(N * HW, 9 * C),
                          p["up_wph"], p["up_bph"], p["up_a"])        # (N*HW, s*s*C)
    y = y.reshape(N, H, W, s, s, C)
    down_map = jnp.transpose(y, (0, 1, 3, 2, 4, 5)).reshape(N, s * H, s * W, C)
    Ho, Wo = s * H, s * W

    # --- encoder ResBlock + outer residual, fused: final = 2*down_map + conv2(PReLU(conv1(down_map))) ---
    c1 = im2col(jnp.pad(down_map.astype(jnp.bfloat16),
                        ((0, 0), (1, 1), (1, 1), (0, 0))), 3, 3)
    t1 = matmul_bias_prelu(c1.reshape(N * Ho * Wo, 9 * C),
                           p["e1_w"], p["e1_b"], p["e1_a"]).reshape(N, Ho, Wo, C)
    c2 = im2col(jnp.pad(t1.astype(jnp.bfloat16),
                        ((0, 0), (1, 1), (1, 1), (0, 0))), 3, 3)
    final = matmul_bias_add2res(c2.reshape(N * Ho * Wo, 9 * C),
                                p["e2_w"], p["e2_b"],
                                down_map.reshape(N * Ho * Wo, C))
    return jnp.transpose(final.reshape(N, Ho, Wo, C), (0, 3, 1, 2))   # NHWC -> NCHW


# ----------------------------------------------------------------------------
if __name__ == "__main__":
    key = jax.random.PRNGKey(0)
    kx, kp = jax.random.split(key)

    N, C, H, W = 2, 8, 16, 16          # in_channel=8, scale=2
    scale = 2
    x = jax.random.normal(kx, (N, C, H, W), jnp.float32)
    raw = init_params(kp, C, scale=scale)
    params = prepare_params(raw, scale=scale)

    fwd = jax.jit(lambda xx: multisource_projection_forward(xx, params))
    out = jax.block_until_ready(fwd(x))

    assert out.shape == (N, C, scale * H, scale * W), out.shape
    assert bool(jnp.all(jnp.isfinite(out)))
    print("KERNEL_OK")
</pallas_src>

<mosaic_0001>
module attributes {stable_mosaic.version = 11 : i64} {
  func.func @nla_fused_kernel(%arg0: i32, %arg1: memref<1x256x8xbf16, #tpu.memory_space<vmem>>, %arg2: memref<8x4xbf16, #tpu.memory_space<vmem>>, %arg3: memref<8x4xbf16, #tpu.memory_space<vmem>>, %arg4: memref<8x8xbf16, #tpu.memory_space<vmem>>, %arg5: memref<1x4xf32, #tpu.memory_space<vmem>>, %arg6: memref<1x4xf32, #tpu.memory_space<vmem>>, %arg7: memref<1x8xf32, #tpu.memory_space<vmem>>, %arg8: memref<3xf32, #tpu.memory_space<smem>>, %arg9: memref<1x256x8xf32, #tpu.memory_space<vmem>>) attributes {dimension_semantics = [#tpu.dimension_semantics<parallel>], iteration_bounds = array<i64: 2>, scalar_prefetch = 0 : i64, scratch_operands = 0 : i64, tpu.core_type = #tpu.core_type<tc>, window_params = [{transform_indices = @transform_0, window_bounds = array<i64: 1, 256, 8>}, {pipeline_mode = #tpu.pipeline_mode<synchronous>, transform_indices = @transform_1, window_bounds = array<i64: 8, 4>}, {pipeline_mode = #tpu.pipeline_mode<synchronous>, transform_indices = @transform_2, window_bounds = array<i64: 8, 4>}, {pipeline_mode = #tpu.pipeline_mode<synchronous>, transform_indices = @transform_3, window_bounds = array<i64: 8, 8>}, {pipeline_mode = #tpu.pipeline_mode<synchronous>, transform_indices = @transform_4, window_bounds = array<i64: 1, 4>}, {pipeline_mode = #tpu.pipeline_mode<synchronous>, transform_indices = @transform_5, window_bounds = array<i64: 1, 4>}, {pipeline_mode = #tpu.pipeline_mode<synchronous>, transform_indices = @transform_6, window_bounds = array<i64: 1, 8>}, {transform_indices = @transform_7, window_bounds = array<i64: 3>}, {transform_indices = @transform_8, window_bounds = array<i64: 1, 256, 8>}]} {
    %c0 = arith.constant 0 : index
    %c0_0 = arith.constant 0 : index
    %c0_1 = arith.constant 0 : index
    %0 = vector.load %arg1[%c0, %c0_0, %c0_1] : memref<1x256x8xbf16, #tpu.memory_space<vmem>>, vector<1x256x8xbf16>
    %1 = vector.shape_cast %0 : vector<1x256x8xbf16> to vector<256x8xbf16>
    %c0_2 = arith.constant 0 : index
    %2 = memref.load %arg8[%c0_2] : memref<3xf32, #tpu.memory_space<smem>>
    %c0_3 = arith.constant 0 : index
    %c0_4 = arith.constant 0 : index
    %3 = vector.load %arg2[%c0_3, %c0_4] : memref<8x4xbf16, #tpu.memory_space<vmem>>, vector<8x4xbf16>
    %cst = arith.constant dense<0.000000e+00> : vector<256x4xf32>
    %4 = tpu.matmul %1, %3, %cst {dimension_numbers = #tpu.dot_dimension_numbers<[1], [0], [0], [1], [0, 0, 1, 1], [], []>} : vector<256x8xbf16>, vector<8x4xbf16>, vector<256x4xf32> -> vector<256x4xf32>
    %c0_5 = arith.constant 0 : index
    %c0_6 = arith.constant 0 : index
    %5 = vector.load %arg5[%c0_5, %c0_6] : memref<1x4xf32, #tpu.memory_space<vmem>>, vector<1x4xf32>
    %6 = vector.broadcast %5 : vector<1x4xf32> to vector<256x4xf32>
    %7 = arith.addf %4, %6 : vector<256x4xf32>
    %cst_7 = arith.constant 0.000000e+00 : f32
    %8 = vector.broadcast %cst_7 : f32 to vector<256x4xf32>
    %9 = arith.maximumf %7, %8 : vector<256x4xf32>
    %cst_8 = arith.constant 0.000000e+00 : f32
    %10 = vector.broadcast %cst_8 : f32 to vector<256x4xf32>
    %11 = arith.minimumf %7, %10 : vector<256x4xf32>
    %12 = vector.broadcast %2 : f32 to vector<256x4xf32>
    %13 = arith.mulf %12, %11 : vector<256x4xf32>
    %14 = arith.addf %9, %13 : vector<256x4xf32>
    %c1 = arith.constant 1 : index
    %15 = memref.load %arg8[%c1] : memref<3xf32, #tpu.memory_space<smem>>
    %c0_9 = arith.constant 0 : index
    %c0_10 = arith.constant 0 : index
    %16 = vector.load %arg3[%c0_9, %c0_10] : memref<8x4xbf16, #tpu.memory_space<vmem>>, vector<8x4xbf16>
    %cst_11 = arith.constant dense<0.000000e+00> : vector<256x4xf32>
    %17 = tpu.matmul %1, %16, %cst_11 {dimension_numbers = #tpu.dot_dimension_numbers<[1], [0], [0], [1], [0, 0, 1, 1], [], []>} : vector<256x8xbf16>, vector<8x4xbf16>, vector<256x4xf32> -> vector<256x4xf32>
    %c0_12 = arith.constant 0 : index
    %c0_13 = arith.constant 0 : index
    %18 = vector.load %arg6[%c0_12, %c0_13] : memref<1x4xf32, #tpu.memory_space<vmem>>, vector<1x4xf32>
    %19 = vector.broadcast %18 : vector<1x4xf32> to vector<256x4xf32>
    %20 = arith.addf %17, %19 : vector<256x4xf32>
    %cst_14 = arith.constant 0.000000e+00 : f32
    %21 = vector.broadcast %cst_14 : f32 to vector<256x4xf32>
    %22 = arith.maximumf %20, %21 : vector<256x4xf32>
    %cst_15 = arith.constant 0.000000e+00 : f32
    %23 = vector.broadcast %cst_15 : f32 to vector<256x4xf32>
    %24 = arith.minimumf %20, %23 : vector<256x4xf32>
    %25 = vector.broadcast %15 : f32 to vector<256x4xf32>
    %26 = arith.mulf %25, %24 : vector<256x4xf32>
    %27 = arith.addf %22, %26 : vector<256x4xf32>
    %c2 = arith.constant 2 : index
    %28 = memref.load %arg8[%c2] : memref<3xf32, #tpu.memory_space<smem>>
    %c0_16 = arith.constant 0 : index
    %c0_17 = arith.constant 0 : index
    %29 = vector.load %arg4[%c0_16, %c0_17] : memref<8x8xbf16, #tpu.memory_space<vmem>>, vector<8x8xbf16>
    %cst_18 = arith.constant dense<0.000000e+00> : vector<256x8xf32>
    %30 = tpu.matmul %1, %29, %cst_18 {dimension_numbers = #tpu.dot_dimension_numbers<[1], [0], [0], [1], [0, 0, 1, 1], [], []>} : vector<256x8xbf16>, vector<8x8xbf16>, vector<256x8xf32> -> vector<256x8xf32>
    %c0_19 = arith.constant 0 : index
    %c0_20 = arith.constant 0 : index
    %31 = vector.load %arg7[%c0_19, %c0_20] : memref<1x8xf32, #tpu.memory_space<vmem>>, vector<1x8xf32>
    %32 = vector.broadcast %31 : vector<1x8xf32> to vector<256x8xf32>
    %33 = arith.addf %30, %32 : vector<256x8xf32>
    %cst_21 = arith.constant 0.000000e+00 : f32
    %34 = vector.broadcast %cst_21 : f32 to vector<256x8xf32>
    %35 = arith.maximumf %33, %34 : vector<256x8xf32>
    %cst_22 = arith.constant 0.000000e+00 : f32
    %36 = vector.broadcast %cst_22 : f32 to vector<256x8xf32>
    %37 = arith.minimumf %33, %36 : vector<256x8xf32>
    %38 = vector.broadcast %28 : f32 to vector<256x8xf32>
    %39 = arith.mulf %38, %37 : vector<256x8xf32>
    %40 = arith.addf %35, %39 : vector<256x8xf32>
    %41 = arith.truncf %14 : vector<256x4xf32> to vector<256x4xbf16>
    %42 = arith.truncf %27 : vector<256x4xf32> to vector<256x4xbf16>
    %cst_23 = arith.constant dense<0.000000e+00> : vector<256x256xf32>
    %43 = tpu.matmul %41, %42, %cst_23 {dimension_numbers = #tpu.dot_dimension_numbers<[1], [1], [0], [0], [0, 0, 1, 0], [], []>} : vector<256x4xbf16>, vector<256x4xbf16>, vector<256x256xf32> -> vector<256x256xf32>
    %cst_24 = arith.constant dense<0xFF800000> : vector<256xf32>
    %44 = vector.multi_reduction <maximumf>, %43, %cst_24 [1] : vector<256x256xf32> to vector<256xf32>
    %45 = vector.shape_cast %44 : vector<256xf32> to vector<256x1xf32>
    %46 = vector.broadcast %45 : vector<256x1xf32> to vector<256x256xf32>
    %47 = arith.subf %43, %46 : vector<256x256xf32>
    %48 = math.exp %47 : vector<256x256xf32>
    %cst_25 = arith.constant dense<0.000000e+00> : vector<256xf32>
    %49 = vector.multi_reduction <add>, %48, %cst_25 [1] : vector<256x256xf32> to vector<256xf32>
    %50 = vector.shape_cast %49 : vector<256xf32> to vector<256x1xf32>
    %51 = tpu.reciprocal %50 {approx = true} : vector<256x1xf32> -> vector<256x1xf32>
    %52 = vector.broadcast %51 : vector<256x1xf32> to vector<256x256xf32>
    %53 = arith.mulf %48, %52 : vector<256x256xf32>
    %54 = arith.truncf %53 : vector<256x256xf32> to vector<256x256xbf16>
    %55 = arith.truncf %40 : vector<256x8xf32> to vector<256x8xbf16>
    %cst_26 = arith.constant dense<0.000000e+00> : vector<256x8xf32>
    %56 = tpu.matmul %54, %55, %cst_26 {dimension_numbers = #tpu.dot_dimension_numbers<[1], [0], [0], [1], [0, 0, 1, 1], [], []>} : vector<256x256xbf16>, vector<256x8xbf16>, vector<256x8xf32> -> vector<256x8xf32>
    %c0_27 = arith.constant 0 : index
    %c0_28 = arith.constant 0 : index
    %c0_29 = arith.constant 0 : index
    %57 = vector.load %arg9[%c0_27, %c0_28, %c0_29] : memref<1x256x8xf32, #tpu.memory_space<vmem>>, vector<1x256x8xf32>
    %58 = vector.shape_cast %57 : vector<1x256x8xf32> to vector<256x8xf32>
    %59 = vector.shape_cast %56 : vector<256x8xf32> to vector<1x256x8xf32>
    tpu.vector_store %arg9[%c0_27, %c0_28, %c0_29], %59 {strides = array<i32>} : memref<1x256x8xf32, #tpu.memory_space<vmem>>, vector<1x256x8xf32>,
    return
  }
  func.func @transform_0(%arg0: i32) -> (i32, i32, i32) {
    %c0_i32 = arith.constant 0 : i32
    %c0_i32_0 = arith.constant 0 : i32
    %c0_i32_1 = arith.constant 0 : i32
    return %arg0, %c0_i32, %c0_i32_0 : i32, i32, i32
  }
  func.func @transform_1(%arg0: i32) -> (i32, i32) {
    %c0_i32 = arith.constant 0 : i32
    %c0_i32_0 = arith.constant 0 : i32
    %c0_i32_1 = arith.constant 0 : i32
    return %c0_i32, %c0_i32_0 : i32, i32
  }
  func.func @transform_2(%arg0: i32) -> (i32, i32) {
    %c0_i32 = arith.constant 0 : i32
    %c0_i32_0 = arith.constant 0 : i32
    %c0_i32_1 = arith.constant 0 : i32
    return %c0_i32, %c0_i32_0 : i32, i32
  }
  func.func @transform_3(%arg0: i32) -> (i32, i32) {
    %c0_i32 = arith.constant 0 : i32
    %c0_i32_0 = arith.constant 0 : i32
    %c0_i32_1 = arith.constant 0 : i32
    return %c0_i32, %c0_i32_0 : i32, i32
  }
  func.func @transform_4(%arg0: i32) -> (i32, i32) {
    %c0_i32 = arith.constant 0 : i32
    %c0_i32_0 = arith.constant 0 : i32
    %c0_i32_1 = arith.constant 0 : i32
    return %c0_i32, %c0_i32_0 : i32, i32
  }
  func.func @transform_5(%arg0: i32) -> (i32, i32) {
    %c0_i32 = arith.constant 0 : i32
    %c0_i32_0 = arith.constant 0 : i32
    %c0_i32_1 = arith.constant 0 : i32
    return %c0_i32, %c0_i32_0 : i32, i32
  }
  func.func @transform_6(%arg0: i32) -> (i32, i32) {
    %c0_i32 = arith.constant 0 : i32
    %c0_i32_0 = arith.constant 0 : i32
    %c0_i32_1 = arith.constant 0 : i32
    return %c0_i32, %c0_i32_0 : i32, i32
  }
  func.func @transform_7(%arg0: i32) -> i32 {
    %c0_i32 = arith.constant 0 : i32
    %c0_i32_0 = arith.constant 0 : i32
    return %c0_i32 : i32
  }
  func.func @transform_8(%arg0: i32) -> (i32, i32, i32) {
    %c0_i32 = arith.constant 0 : i32
    %c0_i32_0 = arith.constant 0 : i32
    %c0_i32_1 = arith.constant 0 : i32
    return %arg0, %c0_i32, %c0_i32_0 : i32, i32, i32
  }
}

module attributes {stable_mosaic.version = 11 : i64} {
  func.func @matmul_bias_prelu_kernel(%arg0: i32, %arg1: memref<256x72xbf16, #tpu.memory_space<vmem>>, %arg2: memref<72x32xbf16, #tpu.memory_space<vmem>>, %arg3: memref<1x32xf32, #tpu.memory_space<vmem>>, %arg4: memref<1xf32, #tpu.memory_space<smem>>, %arg5: memref<256x32xf32, #tpu.memory_space<vmem>>) attributes {dimension_semantics = [#tpu.dimension_semantics<parallel>], iteration_bounds = array<i64: 2>, scalar_prefetch = 0 : i64, scratch_operands = 0 : i64, tpu.core_type = #tpu.core_type<tc>, window_params = [{transform_indices = @transform_0, window_bounds = array<i64: 256, 72>}, {pipeline_mode = #tpu.pipeline_mode<synchronous>, transform_indices = @transform_1, window_bounds = array<i64: 72, 32>}, {pipeline_mode = #tpu.pipeline_mode<synchronous>, transform_indices = @transform_2, window_bounds = array<i64: 1, 32>}, {transform_indices = @transform_3, window_bounds = array<i64: 1>}, {transform_indices = @transform_4, window_bounds = array<i64: 256, 32>}]} {
    %c0 = arith.constant 0 : index
    %c0_0 = arith.constant 0 : index
    %0 = vector.load %arg1[%c0, %c0_0] : memref<256x72xbf16, #tpu.memory_space<vmem>>, vector<256x72xbf16>
    %c0_1 = arith.constant 0 : index
    %c0_2 = arith.constant 0 : index
    %1 = vector.load %arg2[%c0_1, %c0_2] : memref<72x32xbf16, #tpu.memory_space<vmem>>, vector<72x32xbf16>
    %cst = arith.constant dense<0.000000e+00> : vector<256x32xf32>
    %2 = tpu.matmul %0, %1, %cst {dimension_numbers = #tpu.dot_dimension_numbers<[1], [0], [0], [1], [0, 0, 1, 1], [], []>} : vector<256x72xbf16>, vector<72x32xbf16>, vector<256x32xf32> -> vector<256x32xf32>
    %c0_3 = arith.constant 0 : index
    %c0_4 = arith.constant 0 : index
    %3 = vector.load %arg3[%c0_3, %c0_4] : memref<1x32xf32, #tpu.memory_space<vmem>>, vector<1x32xf32>
    %4 = vector.broadcast %3 : vector<1x32xf32> to vector<256x32xf32>
    %5 = arith.addf %2, %4 : vector<256x32xf32>
    %c0_5 = arith.constant 0 : index
    %6 = memref.load %arg4[%c0_5] : memref<1xf32, #tpu.memory_space<smem>>
    %cst_6 = arith.constant 0.000000e+00 : f32
    %7 = vector.broadcast %cst_6 : f32 to vector<256x32xf32>
    %8 = arith.maximumf %5, %7 : vector<256x32xf32>
    %cst_7 = arith.constant 0.000000e+00 : f32
    %9 = vector.broadcast %cst_7 : f32 to vector<256x32xf32>
    %10 = arith.minimumf %5, %9 : vector<256x32xf32>
    %11 = vector.broadcast %6 : f32 to vector<256x32xf32>
    %12 = arith.mulf %11, %10 : vector<256x32xf32>
    %13 = arith.addf %8, %12 : vector<256x32xf32>
    %c0_8 = arith.constant 0 : index
    %c0_9 = arith.constant 0 : index
    %14 = vector.load %arg5[%c0_8, %c0_9] : memref<256x32xf32, #tpu.memory_space<vmem>>, vector<256x32xf32>
    tpu.vector_store %arg5[%c0_8, %c0_9], %13 {strides = array<i32>} : memref<256x32xf32, #tpu.memory_space<vmem>>, vector<256x32xf32>,
    return
  }
  func.func @transform_0(%arg0: i32) -> (i32, i32) {
    %c0_i32 = arith.constant 0 : i32
    %c0_i32_0 = arith.constant 0 : i32
    return %arg0, %c0_i32 : i32, i32
  }
  func.func @transform_1(%arg0: i32) -> (i32, i32) {
    %c0_i32 = arith.constant 0 : i32
    %c0_i32_0 = arith.constant 0 : i32
    %c0_i32_1 = arith.constant 0 : i32
    return %c0_i32, %c0_i32_0 : i32, i32
  }
  func.func @transform_2(%arg0: i32) -> (i32, i32) {
    %c0_i32 = arith.constant 0 : i32
    %c0_i32_0 = arith.constant 0 : i32
    %c0_i32_1 = arith.constant 0 : i32
    return %c0_i32, %c0_i32_0 : i32, i32
  }
  func.func @transform_3(%arg0: i32) -> i32 {
    %c0_i32 = arith.constant 0 : i32
    %c0_i32_0 = arith.constant 0 : i32
    return %c0_i32 : i32
  }
  func.func @transform_4(%arg0: i32) -> (i32, i32) {
    %c0_i32 = arith.constant 0 : i32
    %c0_i32_0 = arith.constant 0 : i32
    return %arg0, %c0_i32 : i32, i32
  }
}

module attributes {stable_mosaic.version = 11 : i64} {
  func.func @matmul_bias_prelu_kernel(%arg0: i32, %arg1: memref<512x72xbf16, #tpu.memory_space<vmem>>, %arg2: memref<72x8xbf16, #tpu.memory_space<vmem>>, %arg3: memref<1x8xf32, #tpu.memory_space<vmem>>, %arg4: memref<1xf32, #tpu.memory_space<smem>>, %arg5: memref<512x8xf32, #tpu.memory_space<vmem>>) attributes {dimension_semantics = [#tpu.dimension_semantics<parallel>], iteration_bounds = array<i64: 4>, scalar_prefetch = 0 : i64, scratch_operands = 0 : i64, tpu.core_type = #tpu.core_type<tc>, window_params = [{transform_indices = @transform_0, window_bounds = array<i64: 512, 72>}, {pipeline_mode = #tpu.pipeline_mode<synchronous>, transform_indices = @transform_1, window_bounds = array<i64: 72, 8>}, {pipeline_mode = #tpu.pipeline_mode<synchronous>, transform_indices = @transform_2, window_bounds = array<i64: 1, 8>}, {transform_indices = @transform_3, window_bounds = array<i64: 1>}, {transform_indices = @transform_4, window_bounds = array<i64: 512, 8>}]} {
    %c0 = arith.constant 0 : index
    %c0_0 = arith.constant 0 : index
    %0 = vector.load %arg1[%c0, %c0_0] : memref<512x72xbf16, #tpu.memory_space<vmem>>, vector<512x72xbf16>
    %c0_1 = arith.constant 0 : index
    %c0_2 = arith.constant 0 : index
    %1 = vector.load %arg2[%c0_1, %c0_2] : memref<72x8xbf16, #tpu.memory_space<vmem>>, vector<72x8xbf16>
    %cst = arith.constant dense<0.000000e+00> : vector<512x8xf32>
    %2 = tpu.matmul %0, %1, %cst {dimension_numbers = #tpu.dot_dimension_numbers<[1], [0], [0], [1], [0, 0, 1, 1], [], []>} : vector<512x72xbf16>, vector<72x8xbf16>, vector<512x8xf32> -> vector<512x8xf32>
    %c0_3 = arith.constant 0 : index
    %c0_4 = arith.constant 0 : index
    %3 = vector.load %arg3[%c0_3, %c0_4] : memref<1x8xf32, #tpu.memory_space<vmem>>, vector<1x8xf32>
    %4 = vector.broadcast %3 : vector<1x8xf32> to vector<512x8xf32>
    %5 = arith.addf %2, %4 : vector<512x8xf32>
    %c0_5 = arith.constant 0 : index
    %6 = memref.load %arg4[%c0_5] : memref<1xf32, #tpu.memory_space<smem>>
    %cst_6 = arith.constant 0.000000e+00 : f32
    %7 = vector.broadcast %cst_6 : f32 to vector<512x8xf32>
    %8 = arith.maximumf %5, %7 : vector<512x8xf32>
    %cst_7 = arith.constant 0.000000e+00 : f32
    %9 = vector.broadcast %cst_7 : f32 to vector<512x8xf32>
    %10 = arith.minimumf %5, %9 : vector<512x8xf32>
    %11 = vector.broadcast %6 : f32 to vector<512x8xf32>
    %12 = arith.mulf %11, %10 : vector<512x8xf32>
    %13 = arith.addf %8, %12 : vector<512x8xf32>
    %c0_8 = arith.constant 0 : index
    %c0_9 = arith.constant 0 : index
    %14 = vector.load %arg5[%c0_8, %c0_9] : memref<512x8xf32, #tpu.memory_space<vmem>>, vector<512x8xf32>
    tpu.vector_store %arg5[%c0_8, %c0_9], %13 {strides = array<i32>} : memref<512x8xf32, #tpu.memory_space<vmem>>, vector<512x8xf32>,
    return
  }
  func.func @transform_0(%arg0: i32) -> (i32, i32) {
    %c0_i32 = arith.constant 0 : i32
    %c0_i32_0 = arith.constant 0 : i32
    return %arg0, %c0_i32 : i32, i32
  }
  func.func @transform_1(%arg0: i32) -> (i32, i32) {
    %c0_i32 = arith.constant 0 : i32
    %c0_i32_0 = arith.constant 0 : i32
    %c0_i32_1 = arith.constant 0 : i32
    return %c0_i32, %c0_i32_0 : i32, i32
  }
  func.func @transform_2(%arg0: i32) -> (i32, i32) {
    %c0_i32 = arith.constant 0 : i32
    %c0_i32_0 = arith.constant 0 : i32
    %c0_i32_1 = arith.constant 0 : i32
    return %c0_i32, %c0_i32_0 : i32, i32
  }
  func.func @transform_3(%arg0: i32) -> i32 {
    %c0_i32 = arith.constant 0 : i32
    %c0_i32_0 = arith.constant 0 : i32
    return %c0_i32 : i32
  }
  func.func @transform_4(%arg0: i32) -> (i32, i32) {
    %c0_i32 = arith.constant 0 : i32
    %c0_i32_0 = arith.constant 0 : i32
    return %arg0, %c0_i32 : i32, i32
  }
}

module attributes {stable_mosaic.version = 11 : i64} {
  func.func @matmul_bias_add2res_kernel(%arg0: i32, %arg1: memref<512x72xbf16, #tpu.memory_space<vmem>>, %arg2: memref<72x8xbf16, #tpu.memory_space<vmem>>, %arg3: memref<1x8xf32, #tpu.memory_space<vmem>>, %arg4: memref<512x8xf32, #tpu.memory_space<vmem>>, %arg5: memref<512x8xf32, #tpu.memory_space<vmem>>) attributes {dimension_semantics = [#tpu.dimension_semantics<parallel>], iteration_bounds = array<i64: 4>, scalar_prefetch = 0 : i64, scratch_operands = 0 : i64, tpu.core_type = #tpu.core_type<tc>, window_params = [{transform_indices = @transform_0, window_bounds = array<i64: 512, 72>}, {pipeline_mode = #tpu.pipeline_mode<synchronous>, transform_indices = @transform_1, window_bounds = array<i64: 72, 8>}, {pipeline_mode = #tpu.pipeline_mode<synchronous>, transform_indices = @transform_2, window_bounds = array<i64: 1, 8>}, {transform_indices = @transform_3, window_bounds = array<i64: 512, 8>}, {transform_indices = @transform_4, window_bounds = array<i64: 512, 8>}]} {
    %c0 = arith.constant 0 : index
    %c0_0 = arith.constant 0 : index
    %0 = vector.load %arg1[%c0, %c0_0] : memref<512x72xbf16, #tpu.memory_space<vmem>>, vector<512x72xbf16>
    %c0_1 = arith.constant 0 : index
    %c0_2 = arith.constant 0 : index
    %1 = vector.load %arg2[%c0_1, %c0_2] : memref<72x8xbf16, #tpu.memory_space<vmem>>, vector<72x8xbf16>
    %cst = arith.constant dense<0.000000e+00> : vector<512x8xf32>
    %2 = tpu.matmul %0, %1, %cst {dimension_numbers = #tpu.dot_dimension_numbers<[1], [0], [0], [1], [0, 0, 1, 1], [], []>} : vector<512x72xbf16>, vector<72x8xbf16>, vector<512x8xf32> -> vector<512x8xf32>
    %c0_3 = arith.constant 0 : index
    %c0_4 = arith.constant 0 : index
    %3 = vector.load %arg3[%c0_3, %c0_4] : memref<1x8xf32, #tpu.memory_space<vmem>>, vector<1x8xf32>
    %4 = vector.broadcast %3 : vector<1x8xf32> to vector<512x8xf32>
    %5 = arith.addf %2, %4 : vector<512x8xf32>
    %c0_5 = arith.constant 0 : index
    %c0_6 = arith.constant 0 : index
    %6 = vector.load %arg4[%c0_5, %c0_6] : memref<512x8xf32, #tpu.memory_space<vmem>>, vector<512x8xf32>
    %cst_7 = arith.constant 2.000000e+00 : f32
    %7 = vector.broadcast %cst_7 : f32 to vector<512x8xf32>
    %8 = arith.mulf %7, %6 : vector<512x8xf32>
    %9 = arith.addf %5, %8 : vector<512x8xf32>
    %c0_8 = arith.constant 0 : index
    %c0_9 = arith.constant 0 : index
    %10 = vector.load %arg5[%c0_8, %c0_9] : memref<512x8xf32, #tpu.memory_space<vmem>>, vector<512x8xf32>
    tpu.vector_store %arg5[%c0_8, %c0_9], %9 {strides = array<i32>} : memref<512x8xf32, #tpu.memory_space<vmem>>, vector<512x8xf32>,
    return
  }
  func.func @transform_0(%arg0: i32) -> (i32, i32) {
    %c0_i32 = arith.constant 0 : i32
    %c0_i32_0 = arith.constant 0 : i32
    return %arg0, %c0_i32 : i32, i32
  }
  func.func @transform_1(%arg0: i32) -> (i32, i32) {
    %c0_i32 = arith.constant 0 : i32
    %c0_i32_0 = arith.constant 0 : i32
    %c0_i32_1 = arith.constant 0 : i32
    return %c0_i32, %c0_i32_0 : i32, i32
  }
  func.func @transform_2(%arg0: i32) -> (i32, i32) {
    %c0_i32 = arith.constant 0 : i32
    %c0_i32_0 = arith.constant 0 : i32
    %c0_i32_1 = arith.constant 0 : i32
    return %c0_i32, %c0_i32_0 : i32, i32
  }
  func.func @transform_3(%arg0: i32) -> (i32, i32) {
    %c0_i32 = arith.constant 0 : i32
    %c0_i32_0 = arith.constant 0 : i32
    return %arg0, %c0_i32 : i32, i32
  }
  func.func @transform_4(%arg0: i32) -> (i32, i32) {
    %c0_i32 = arith.constant 0 : i32
    %c0_i32_0 = arith.constant 0 : i32
    return %arg0, %c0_i32 : i32, i32
  }
}

</mosaic_0001>

<bundles_post_ra>
// kernel: _lambda_.5
= control target key start
LH: loop header
LB: loop body
LE: loop exit
PB: predicated region body
PF: predicated region fallthrough
CT: control target
= control target key end

     0   :  { %s980_s17 = smov 0   ;;  %s1187_s0 = inlined_call_operand.vmem [shape: bf16[512,72], index: 0, kind: input, shape index: {}]   ;;  %s1188_s1 = inlined_call_operand.vmem [shape: bf16[72,32], index: 1, kind: input, shape index: {}]   ;;  %s1189_s2 = inlined_call_operand.vmem [shape: f32[1,32], index: 2, kind: input, shape index: {}]   ;;  %s1190_s3 = inlined_call_operand.<no memory space> [shape: f32[1], index: 3, kind: input, shape index: {}]   ;;  %s1191_s4 = inlined_call_operand.vmem [shape: f32[512,32], index: 4, kind: output, shape index: {}]  }
   0x1   :  { %9 = sst [smem:[#allocation2]] %s1190_s3 }
   0x2 LB: > { %s791_s18 = sadd.s32 4294967295, %s950_s17   ;;  %p795_p0 = scmp.ge.s32.totalorder %s950_s17, 1  ;;  %s950_s17 = sphi %s980_s17, %s15_s17  }
   0x3   : > { %p164_p1 = scmp.lt.s32.totalorder %s950_s17, 3 }
   0x5   : > { %p165_p2 = pnand %p795_p0, %p164_p1 }
   0x6   : > { %v923_v0 = vld [vmem:[%s1188_s1] sm:$0xff] (!%p165_p2)   ;;  %v924_v1 = vld [vmem:[%s1188_s1 + $0x8] sm:$0xff] (!%p165_p2)   ;;  %s796_s22 = sshll.u32 (!%p165_p2), %s791_s18, 5  ;;  %v925_v2 = vld [vmem:[%s1188_s1 + $0x10] sm:$0xff] (!%p165_p2)   ;;  %vm358_vm0 = vcmask (!%p165_p2), 588800   ;;  %vm407_vm1 = vcmask (!%p165_p2), 1043456  }
   0x7   : > { %168 = sbr.rel (%p165_p2) target bundleno = 284 (0x11c), region = 36  ;;  %861 = vmatprep.subr.bf16.mxu0 (!%p165_p2), %v923_v0  ;;  %903 = vmatprep.subr.bf16.mxu1 (!%p165_p2), %v923_v0  ;;  %p191_p3 = scmp.lt.s32.totalorder (!%p165_p2), %s796_s22, 63  ;;  %v926_v3 = vld [vmem:[%s1188_s1 + $0x18] sm:$0xff] (!%p165_p2)   ;;  %v927_v6 = vld [vmem:[%s1188_s1 + $0x20] ss:$0 sps:$4 sm:$0xff] (!%p165_p2)   ;;  %vm702_vm2 = vcmask (!%p165_p2), 261120  }
   0x8   : > { %862 = vmatpush3.bf16.msra.mxu0 (!%p165_p2), %v923_v0  ;;  %908 = vmatpush3.bf16.msra.mxu1 (!%p165_p2), %v923_v0  ;;  %v409_v7 = vsel (!%p165_p2), %vm407_vm1, %v927_v6, 0  ;;  %s572_s7 = sld [smem:[#allocation2]] (!%p165_p2)  ;;  %v1046_v22 = vld [vmem:[%s1189_s2] ss:$0 sm:$0xff] (!%p165_p2) }
   0x9   : > { %863 = vmatprep.subr.bf16.mxu0 (!%p165_p2), %v924_v1  ;;  %904 = vmatprep.subr.bf16.mxu1 (!%p165_p2), %v924_v1 }
   0xc   : > { %864 = vmatpush3.bf16.msra.mxu0 (!%p165_p2), %v924_v1  ;;  %909 = vmatpush3.bf16.msra.mxu1 (!%p165_p2), %v924_v1 }
   0xd   : > { %865 = vmatprep.subr.bf16.mxu0 (!%p165_p2), %v925_v2  ;;  %905 = vmatprep.subr.bf16.mxu1 (!%p165_p2), %v925_v2 }
   0xe   : > { %s1193_s22 = smov (!%p191_p3, %s796_s22), 63  ;;  %v1051_v29 = vstv %s572_s7 }
   0xf   : > { %s797_s25 = sshll.u32 %s1193_s22, 2  ;;  %s799_s10 = sshll.u32 %s1193_s22, 3 }
  0x10   : > { %s1006_s30 = scalar_lea.vmem %s1187_s0, %s797_s25  ;;  %866 = vmatpush3.bf16.msra.mxu0 %v925_v2  ;;  %910 = vmatpush3.bf16.msra.mxu1 %v925_v2  ;;  %s1062_s13 = scalar_lea.vmem %s1191_s4, %s799_s10 }
  0x11   : > { %v928_v4 = vld [vmem:[%s1006_s30] sm:$0xff]   ;;  %867 = vmatprep.subr.bf16.mxu0 %v926_v3  ;;  %906 = vmatprep.subr.bf16.mxu1 %v926_v3  ;;  %v930_v8 = vld [vmem:[%s1006_s30 + $0x8] sm:$0xff]   ;;  %v932_v10 = vld [vmem:[%s1006_s30 + $0x10] sm:$0xff]  }
  0x12   : > { %v929_v5 = vld [vmem:[%s1006_s30 + $0x40] sm:$0xff]   ;;  %871 = vmatprep.mubr.msk.bf16.mxu0 %vm358_vm0, %v928_v4  ;;  %v931_v9 = vld [vmem:[%s1006_s30 + $0x48] sm:$0xff]   ;;  %v933_v11 = vld [vmem:[%s1006_s30 + $0x50] sm:$0xff]  }
  0x13   : > { %887 = vmatprep.mubr.msk.bf16.mxu1 %vm358_vm0, %v929_v5  ;;  %v934_v12 = vld [vmem:[%s1006_s30 + $0x18] sm:$0xff]   ;;  %v936_v14 = vld [vmem:[%s1006_s30 + $0x20] sm:$0xff]   ;;  %v938_v16 = vld [vmem:[%s1006_s30 + $0x28] sm:$0xff]  }
  0x14   : > { %868 = vmatpush3.bf16.msra.mxu0 %v926_v3  ;;  %911 = vmatpush3.bf16.msra.mxu1 %v926_v3  ;;  %v935_v13 = vld [vmem:[%s1006_s30 + $0x58] sm:$0xff]   ;;  %v937_v15 = vld [vmem:[%s1006_s30 + $0x60] sm:$0xff]   ;;  %v939_v17 = vld [vmem:[%s1006_s30 + $0x68] sm:$0xff]  }
  0x15   : > { %913 = vmatprep.subr.msk.bf16.mxu0 %vm407_vm1, %v927_v6  ;;  %914 = vmatprep.subr.msk.bf16.mxu1 %vm407_vm1, %v927_v6  ;;  %v940_v18 = vld [vmem:[%s1006_s30 + $0x30] sm:$0xff]   ;;  %v942_v20 = vld [vmem:[%s1006_s30 + $0x38] sm:$0xff]  }
  0x16   : > { %v941_v19 = vld [vmem:[%s1006_s30 + $0x70] sm:$0xff]   ;;  %v943_v21 = vld [vmem:[%s1006_s30 + $0x78] sm:$0xff]  }
  0x18   : > { %870 = vmatpush3.bf16.msra.mxu0 %v409_v7  ;;  %912 = vmatpush3.bf16.msra.mxu1 %v409_v7 }
  0x1b   : > { %872 = vmatmul.mubr.msk.bf16.vlgmr.msra.gmra.mrb[0].mxu0 %vm358_vm0, %v930_v8  ;;  %888 = vmatmul.mubr.msk.bf16.vlgmr.msra.gmra.mrb[0].mxu1 %vm358_vm0, %v931_v9 }
  0x1c   : > { %875 = vmatprep.mubr.msk.bf16.mxu0 %vm358_vm0, %v932_v10  ;;  %891 = vmatprep.mubr.msk.bf16.mxu1 %vm358_vm0, %v933_v11 }
  0x23   : > { %876 = vmatmul.mubr.msk.bf16.gmra.mrb[4].mxu0 %vm358_vm0, %v934_v12  ;;  %892 = vmatmul.mubr.msk.bf16.gmra.mrb[4].mxu1 %vm358_vm0, %v935_v13 }
  0x24   : > { %879 = vmatprep.mubr.msk.bf16.mxu0 %vm358_vm0, %v936_v14  ;;  %895 = vmatprep.mubr.msk.bf16.mxu1 %vm358_vm0, %v937_v15 }
  0x2b   : > { %880 = vmatmul.mubr.msk.bf16.gmra.mrb[8].mxu0 %vm358_vm0, %v938_v16  ;;  %896 = vmatmul.mubr.msk.bf16.gmra.mrb[8].mxu1 %vm358_vm0, %v939_v17 }
  0x2c   : > { %883 = vmatprep.mubr.msk.bf16.mxu0 %vm358_vm0, %v940_v18  ;;  %899 = vmatprep.mubr.msk.bf16.mxu1 %vm358_vm0, %v941_v19 }
  0x33   : > { %884 = vmatmul.mubr.msk.bf16.gmra.mrb[12].mxu0 %vm358_vm0, %v942_v20  ;;  %900 = vmatmul.mubr.msk.bf16.gmra.mrb[12].mxu1 %vm358_vm0, %v943_v21 }
  0xee   : > { %v873_v23 = vpop.f32.mrb[0].mxu0  ;;  %v889_v24 = vpop.f32.mrb[0].mxu1 }
  0xef   : > { %v454_v25 = vadd.f32 %v873_v23, %v1046_v22  ;;  %v518_v26 = vadd.f32 %v889_v24, %v1046_v22  ;;  %v445_v27 = vpop.f32.mrb[1].mxu0  ;;  %v509_v28 = vpop.f32.mrb[1].mxu1 }
  0xf0   : > { %v446_v30 = vadd.f32 %v1046_v22, %v445_v27  ;;  %v510_v31 = vadd.f32 %v1046_v22, %v509_v28  ;;  %v874_v32 = vpop.f32.mrb[2].mxu0  ;;  %v890_v33 = vpop.f32.mrb[2].mxu1 }
  0xf1   : > { %v575_v34 = vmax.f32 %v454_v25, 0.0  ;;  %v607_v35 = vmin.f32 %v454_v25, 0.0  ;;  %v591_v36 = vmax.f32 %v518_v26, 0.0  ;;  %v623_v37 = vmin.f32 %v518_v26, 0.0  ;;  %v448_v38 = vpop.f32.mrb[3].mxu0  ;;  %v512_v39 = vpop.f32.mrb[3].mxu1 }
  0xf2   : > { %v573_v40 = vmax.f32 %v446_v30, 0.0  ;;  %v605_v41 = vmin.f32 %v446_v30, 0.0  ;;  %v589_v42 = vmax.f32 %v510_v31, 0.0  ;;  %v621_v43 = vmin.f32 %v510_v31, 0.0 }
  0xf3   : > { %v640_v44 = vmul.f32 %v1051_v29, %v607_v35  ;;  %v656_v45 = vmul.f32 %v1051_v29, %v623_v37  ;;  %v457_v46 = vadd.f32 %v874_v32, %v1046_v22  ;;  %v521_v47 = vadd.f32 %v890_v33, %v1046_v22 }
  0xf4   : > { %v638_v48 = vmul.f32 %v1051_v29, %v605_v41  ;;  %v654_v49 = vmul.f32 %v1051_v29, %v621_v43  ;;  %v449_v50 = vadd.f32 %v1046_v22, %v448_v38  ;;  %v513_v51 = vadd.f32 %v1046_v22, %v512_v39 }
  0xf5   : > { %v672_v52 = vadd.f32 %v640_v44, %v575_v34  ;;  %v688_v53 = vadd.f32 %v656_v45, %v591_v36  ;;  %v608_v54 = vmin.f32 %v457_v46, 0.0  ;;  %v576_v57 = vmax.f32 %v457_v46, 0.0 }
  0xf6   : > { %v670_v55 = vadd.f32 %v638_v48, %v573_v40  ;;  %v686_v56 = vadd.f32 %v654_v49, %v589_v42  ;;  %v624_v58 = vmin.f32 %v521_v47, 0.0  ;;  %v877_v59 = vpop.f32.mrb[4].mxu0  ;;  %v893_v60 = vpop.f32.mrb[4].mxu1  ;;  %v592_v62 = vmax.f32 %v521_v47, 0.0 }
  0xf7   : > { %705 = vst.msk [vmem:[%s1062_s13 + $0x10] sm:$0xff] %vm702_vm2, %v672_v52  ;;  %721 = vst.msk [vmem:[%s1062_s13 + $0x90] sm:$0xff] %vm702_vm2, %v688_v53  ;;  %v641_v61 = vmul.f32 %v1051_v29, %v608_v54  ;;  %v574_v63 = vmax.f32 %v449_v50, 0.0  ;;  %v606_v0 = vmin.f32 %v449_v50, 0.0  ;;  %v461_v1 = vpop.f32.mrb[5].mxu0  ;;  %v525_v2 = vpop.f32.mrb[5].mxu1  ;;  %v470_v5 = vadd.f32 %v877_v59, %v1046_v22 }
  0xf8   : > { %703 = vst.msk [vmem:[%s1062_s13] sm:$0xff] %vm702_vm2, %v670_v55  ;;  %719 = vst.msk [vmem:[%s1062_s13 + $0x80] sm:$0xff] %vm702_vm2, %v686_v56  ;;  %v657_v3 = vmul.f32 %v1051_v29, %v624_v58  ;;  %v622_v4 = vmin.f32 %v513_v51, 0.0  ;;  %v534_v6 = vadd.f32 %v893_v60, %v1046_v22  ;;  %v878_v7 = vpop.f32.mrb[6].mxu0  ;;  %v894_v8 = vpop.f32.mrb[6].mxu1  ;;  %v462_v11 = vadd.f32 %v1046_v22, %v461_v1 }
  0xf9   : > { %v673_v9 = vadd.f32 %v641_v61, %v576_v57  ;;  %v639_v10 = vmul.f32 %v1051_v29, %v606_v0  ;;  %v526_v12 = vadd.f32 %v1046_v22, %v525_v2  ;;  %v464_v13 = vpop.f32.mrb[7].mxu0  ;;  %v528_v14 = vpop.f32.mrb[7].mxu1  ;;  %v590_v16 = vmax.f32 %v513_v51, 0.0 }
  0xfa   : > { %v689_v15 = vadd.f32 %v657_v3, %v592_v62  ;;  %v655_v17 = vmul.f32 %v1051_v29, %v622_v4  ;;  %v611_v18 = vmin.f32 %v470_v5, 0.0  ;;  %v579_v20 = vmax.f32 %v470_v5, 0.0 }
  0xfb   : > { %706 = vst.msk [vmem:[%s1062_s13 + $0x18] sm:$0xff] %vm702_vm2, %v673_v9  ;;  %v671_v19 = vadd.f32 %v639_v10, %v574_v63  ;;  %v595_v21 = vmax.f32 %v534_v6, 0.0  ;;  %v627_v23 = vmin.f32 %v534_v6, 0.0  ;;  %v577_v26 = vmax.f32 %v462_v11, 0.0 }
  0xfc   : > { %722 = vst.msk [vmem:[%s1062_s13 + $0x98] sm:$0xff] %vm702_vm2, %v689_v15  ;;  %v687_v24 = vadd.f32 %v655_v17, %v590_v16  ;;  %v644_v25 = vmul.f32 %v1051_v29, %v611_v18  ;;  %v609_v27 = vmin.f32 %v462_v11, 0.0  ;;  %v625_v30 = vmin.f32 %v526_v12, 0.0 }
  0xfd   : > { %704 = vst.msk [vmem:[%s1062_s13 + $0x8] sm:$0xff] %vm702_vm2, %v671_v19  ;;  %v660_v28 = vmul.f32 %v1051_v29, %v627_v23  ;;  %v473_v31 = vadd.f32 %v878_v7, %v1046_v22  ;;  %v537_v32 = vadd.f32 %v894_v8, %v1046_v22  ;;  %v465_v35 = vadd.f32 %v1046_v22, %v464_v13 }
  0xfe   : > { %720 = vst.msk [vmem:[%s1062_s13 + $0x88] sm:$0xff] %vm702_vm2, %v687_v24  ;;  %v676_v33 = vadd.f32 %v644_v25, %v579_v20  ;;  %v642_v34 = vmul.f32 %v1051_v29, %v609_v27  ;;  %v529_v36 = vadd.f32 %v1046_v22, %v528_v14  ;;  %v881_v37 = vpop.f32.mrb[8].mxu0  ;;  %v897_v38 = vpop.f32.mrb[8].mxu1  ;;  %v593_v40 = vmax.f32 %v526_v12, 0.0 }
  0xff   : > { %v692_v39 = vadd.f32 %v660_v28, %v595_v21  ;;  %v658_v41 = vmul.f32 %v1051_v29, %v625_v30  ;;  %v612_v42 = vmin.f32 %v473_v31, 0.0  ;;  %v477_v43 = vpop.f32.mrb[9].mxu0  ;;  %v541_v44 = vpop.f32.mrb[9].mxu1  ;;  %v580_v46 = vmax.f32 %v473_v31, 0.0 }
 0x100   : > { %709 = vst.msk [vmem:[%s1062_s13 + $0x30] sm:$0xff] %vm702_vm2, %v676_v33  ;;  %v674_v45 = vadd.f32 %v642_v34, %v577_v26  ;;  %v596_v47 = vmax.f32 %v537_v32, 0.0  ;;  %v628_v48 = vmin.f32 %v537_v32, 0.0  ;;  %v882_v49 = vpop.f32.mrb[10].mxu0  ;;  %v898_v50 = vpop.f32.mrb[10].mxu1  ;;  %v578_v53 = vmax.f32 %v465_v35, 0.0 }
 0x101   : > { %725 = vst.msk [vmem:[%s1062_s13 + $0xb0] sm:$0xff] %vm702_vm2, %v692_v39  ;;  %v690_v51 = vadd.f32 %v658_v41, %v593_v40  ;;  %v645_v52 = vmul.f32 %v1051_v29, %v612_v42  ;;  %v610_v54 = vmin.f32 %v465_v35, 0.0  ;;  %v480_v55 = vpop.f32.mrb[11].mxu0  ;;  %v544_v56 = vpop.f32.mrb[11].mxu1  ;;  %v626_v58 = vmin.f32 %v529_v36, 0.0 }
 0x102   : > { %707 = vst.msk [vmem:[%s1062_s13 + $0x20] sm:$0xff] %vm702_vm2, %v674_v45  ;;  %v661_v57 = vmul.f32 %v1051_v29, %v628_v48  ;;  %v486_v59 = vadd.f32 %v881_v37, %v1046_v22  ;;  %v550_v60 = vadd.f32 %v897_v38, %v1046_v22  ;;  %v478_v63 = vadd.f32 %v1046_v22, %v477_v43 }
 0x103   : > { %723 = vst.msk [vmem:[%s1062_s13 + $0xa0] sm:$0xff] %vm702_vm2, %v690_v51  ;;  %v677_v61 = vadd.f32 %v645_v52, %v580_v46  ;;  %v643_v62 = vmul.f32 %v1051_v29, %v610_v54  ;;  %v542_v0 = vadd.f32 %v1046_v22, %v541_v44  ;;  %v594_v2 = vmax.f32 %v529_v36, 0.0 }
 0x104   : > { %v693_v1 = vadd.f32 %v661_v57, %v596_v47  ;;  %v659_v3 = vmul.f32 %v1051_v29, %v626_v58  ;;  %v615_v4 = vmin.f32 %v486_v59, 0.0  ;;  %v583_v6 = vmax.f32 %v486_v59, 0.0 }
 0x105   : > { %710 = vst.msk [vmem:[%s1062_s13 + $0x38] sm:$0xff] %vm702_vm2, %v677_v61  ;;  %v675_v5 = vadd.f32 %v643_v62, %v578_v53  ;;  %v599_v7 = vmax.f32 %v550_v60, 0.0  ;;  %v631_v8 = vmin.f32 %v550_v60, 0.0  ;;  %v581_v11 = vmax.f32 %v478_v63, 0.0 }
 0x106   : > { %726 = vst.msk [vmem:[%s1062_s13 + $0xb8] sm:$0xff] %vm702_vm2, %v693_v1  ;;  %v691_v9 = vadd.f32 %v659_v3, %v594_v2  ;;  %v648_v10 = vmul.f32 %v1051_v29, %v615_v4  ;;  %v613_v12 = vmin.f32 %v478_v63, 0.0  ;;  %v885_v13 = vpop.f32.mrb[12].mxu0  ;;  %v901_v14 = vpop.f32.mrb[12].mxu1  ;;  %v629_v16 = vmin.f32 %v542_v0, 0.0 }
 0x107   : > { %708 = vst.msk [vmem:[%s1062_s13 + $0x28] sm:$0xff] %vm702_vm2, %v675_v5  ;;  %v664_v15 = vmul.f32 %v1051_v29, %v631_v8  ;;  %v489_v17 = vadd.f32 %v882_v49, %v1046_v22  ;;  %v553_v18 = vadd.f32 %v898_v50, %v1046_v22  ;;  %v493_v19 = vpop.f32.mrb[13].mxu0  ;;  %v557_v20 = vpop.f32.mrb[13].mxu1  ;;  %v481_v24 = vadd.f32 %v1046_v22, %v480_v55 }
 0x108   : > { %724 = vst.msk [vmem:[%s1062_s13 + $0xa8] sm:$0xff] %vm702_vm2, %v691_v9  ;;  %v680_v21 = vadd.f32 %v648_v10, %v583_v6  ;;  %v646_v23 = vmul.f32 %v1051_v29, %v613_v12  ;;  %v545_v25 = vadd.f32 %v1046_v22, %v544_v56  ;;  %v886_v26 = vpop.f32.mrb[14].mxu0  ;;  %v902_v27 = vpop.f32.mrb[14].mxu1  ;;  %v597_v30 = vmax.f32 %v542_v0, 0.0 }
 0x109   : > { %v696_v28 = vadd.f32 %v664_v15, %v599_v7  ;;  %v662_v31 = vmul.f32 %v1051_v29, %v629_v16  ;;  %v616_v32 = vmin.f32 %v489_v17, 0.0  ;;  %v496_v33 = vpop.f32.mrb[15].mxu0  ;;  %v560_v34 = vpop.f32.mrb[15].mxu1  ;;  %v584_v36 = vmax.f32 %v489_v17, 0.0 }
 0x10a   : > { %713 = vst.msk [vmem:[%s1062_s13 + $0x50] sm:$0xff] %vm702_vm2, %v680_v21  ;;  %v678_v35 = vadd.f32 %v646_v23, %v581_v11  ;;  %v600_v37 = vmax.f32 %v553_v18, 0.0  ;;  %v632_v38 = vmin.f32 %v553_v18, 0.0  ;;  %v582_v41 = vmax.f32 %v481_v24, 0.0 }
 0x10b   : > { %729 = vst.msk [vmem:[%s1062_s13 + $0xd0] sm:$0xff] %vm702_vm2, %v696_v28  ;;  %v694_v39 = vadd.f32 %v662_v31, %v597_v30  ;;  %v649_v40 = vmul.f32 %v1051_v29, %v616_v32  ;;  %v614_v42 = vmin.f32 %v481_v24, 0.0  ;;  %v630_v44 = vmin.f32 %v545_v25, 0.0 }
 0x10c   : > { %711 = vst.msk [vmem:[%s1062_s13 + $0x40] sm:$0xff] %vm702_vm2, %v678_v35  ;;  %v665_v43 = vmul.f32 %v1051_v29, %v632_v38  ;;  %v502_v45 = vadd.f32 %v885_v13, %v1046_v22  ;;  %v566_v46 = vadd.f32 %v901_v14, %v1046_v22  ;;  %v494_v49 = vadd.f32 %v1046_v22, %v493_v19 }
 0x10d   : > { %727 = vst.msk [vmem:[%s1062_s13 + $0xc0] sm:$0xff] %vm702_vm2, %v694_v39  ;;  %v681_v47 = vadd.f32 %v649_v40, %v584_v36  ;;  %v647_v48 = vmul.f32 %v1051_v29, %v614_v42  ;;  %v558_v50 = vadd.f32 %v1046_v22, %v557_v20  ;;  %v598_v52 = vmax.f32 %v545_v25, 0.0 }
 0x10e   : > { %v697_v51 = vadd.f32 %v665_v43, %v600_v37  ;;  %v663_v53 = vmul.f32 %v1051_v29, %v630_v44  ;;  %v619_v54 = vmin.f32 %v502_v45, 0.0  ;;  %v587_v56 = vmax.f32 %v502_v45, 0.0 }
 0x10f   : > { %714 = vst.msk [vmem:[%s1062_s13 + $0x58] sm:$0xff] %vm702_vm2, %v681_v47  ;;  %v679_v55 = vadd.f32 %v647_v48, %v582_v41  ;;  %v603_v57 = vmax.f32 %v566_v46, 0.0  ;;  %v635_v58 = vmin.f32 %v566_v46, 0.0  ;;  %v585_v61 = vmax.f32 %v494_v49, 0.0 }
 0x110   : > { %730 = vst.msk [vmem:[%s1062_s13 + $0xd8] sm:$0xff] %vm702_vm2, %v697_v51  ;;  %v695_v59 = vadd.f32 %v663_v53, %v598_v52  ;;  %v652_v60 = vmul.f32 %v1051_v29, %v619_v54  ;;  %v617_v62 = vmin.f32 %v494_v49, 0.0  ;;  %v633_v0 = vmin.f32 %v558_v50, 0.0 }
 0x111   : > { %712 = vst.msk [vmem:[%s1062_s13 + $0x48] sm:$0xff] %vm702_vm2, %v679_v55  ;;  %v668_v63 = vmul.f32 %v1051_v29, %v635_v58  ;;  %v505_v1 = vadd.f32 %v886_v26, %v1046_v22  ;;  %v569_v2 = vadd.f32 %v902_v27, %v1046_v22  ;;  %v497_v5 = vadd.f32 %v1046_v22, %v496_v33 }
 0x112   : > { %728 = vst.msk [vmem:[%s1062_s13 + $0xc8] sm:$0xff] %vm702_vm2, %v695_v59  ;;  %v684_v3 = vadd.f32 %v652_v60, %v587_v56  ;;  %v650_v4 = vmul.f32 %v1051_v29, %v617_v62  ;;  %v561_v6 = vadd.f32 %v1046_v22, %v560_v34  ;;  %v601_v8 = vmax.f32 %v558_v50, 0.0 }
 0x113   : > { %v700_v7 = vadd.f32 %v668_v63, %v603_v57  ;;  %v666_v9 = vmul.f32 %v1051_v29, %v633_v0  ;;  %v620_v10 = vmin.f32 %v505_v1, 0.0  ;;  %v636_v12 = vmin.f32 %v569_v2, 0.0 }
 0x114   : > { %717 = vst.msk [vmem:[%s1062_s13 + $0x70] sm:$0xff] %vm702_vm2, %v684_v3  ;;  %v682_v11 = vadd.f32 %v650_v4, %v585_v61  ;;  %v588_v14 = vmax.f32 %v505_v1, 0.0  ;;  %v618_v16 = vmin.f32 %v497_v5, 0.0  ;;  %v604_v22 = vmax.f32 %v569_v2, 0.0 }
 0x115   : > { %733 = vst.msk [vmem:[%s1062_s13 + $0xf0] sm:$0xff] %vm702_vm2, %v700_v7  ;;  %v698_v13 = vadd.f32 %v666_v9, %v601_v8  ;;  %v653_v15 = vmul.f32 %v1051_v29, %v620_v10  ;;  %v669_v17 = vmul.f32 %v1051_v29, %v636_v12  ;;  %v634_v18 = vmin.f32 %v561_v6, 0.0 }
 0x116   : > { %715 = vst.msk [vmem:[%s1062_s13 + $0x60] sm:$0xff] %vm702_vm2, %v682_v11  ;;  %v586_v20 = vmax.f32 %v497_v5, 0.0  ;;  %v651_v21 = vmul.f32 %v1051_v29, %v618_v16  ;;  %v602_v24 = vmax.f32 %v561_v6, 0.0 }
 0x117   : > { %731 = vst.msk [vmem:[%s1062_s13 + $0xe0] sm:$0xff] %vm702_vm2, %v698_v13  ;;  %v685_v19 = vadd.f32 %v653_v15, %v588_v14  ;;  %v701_v23 = vadd.f32 %v669_v17, %v604_v22  ;;  %v667_v25 = vmul.f32 %v1051_v29, %v634_v18 }
 0x118   : > { %v683_v26 = vadd.f32 %v651_v21, %v586_v20 }
 0x119   : > { %718 = vst.msk [vmem:[%s1062_s13 + $0x78] sm:$0xff] %vm702_vm2, %v685_v19  ;;  %734 = vst.msk [vmem:[%s1062_s13 + $0xf8] sm:$0xff] %vm702_vm2, %v701_v23  ;;  %v699_v27 = vadd.f32 %v667_v25, %v602_v24 }
 0x11a   : > { %716 = vst.msk [vmem:[%s1062_s13 + $0x68] sm:$0xff] %vm702_vm2, %v683_v26 }
 0x11b   : > { %732 = vst.msk [vmem:[%s1062_s13 + $0xe8] sm:$0xff] %vm702_vm2, %v699_v27 }
 0x11c PF: > { %s15_s17 = sadd.s32 1, %s950_s17  }
 0x11d   : > { %p12_p4 = scmp.ge.s32.totalorder %s15_s17, 4  }
 0x11f   :  { %14 = sbr.rel (!%p12_p4) target bundleno = 2 (0x2), region = 66 }

// kernel: _lambda_.4
= control target key start
LH: loop header
LB: loop body
LE: loop exit
PB: predicated region body
PF: predicated region fallthrough
CT: control target
= control target key end

     0   :  { %13 = vsyncpa [#allocation3], 0  ;;  %s3238_s27 = smov 0   ;;  %s4551_s0 = inlined_call_operand.vmem [shape: bf16[2,256,8], index: 0, kind: input, shape index: {}]   ;;  %s4552_s1 = inlined_call_operand.vmem [shape: bf16[8,4], index: 1, kind: input, shape index: {}]   ;;  %s4553_s2 = inlined_call_operand.vmem [shape: bf16[8,4], index: 2, kind: input, shape index: {}]   ;;  %s4554_s3 = inlined_call_operand.vmem [shape: bf16[8,8], index: 3, kind: input, shape index: {}]   ;;  %s4555_s4 = inlined_call_operand.vmem [shape: f32[1,4], index: 4, kind: input, shape index: {}]   ;;  %s4556_s5 = inlined_call_operand.vmem [shape: f32[1,4], index: 5, kind: input, shape index: {}]   ;;  %s4557_s6 = inlined_call_operand.vmem [shape: f32[1,8], index: 6, kind: input, shape index: {}]   ;;  %s4558_s7 = inlined_call_operand.vmem [shape: f32[3], index: 7, kind: input, shape index: {}]   ;;  %s4559_s8 = inlined_call_operand.vmem [shape: f32[2,256,8], index: 8, kind: output, shape index: {}]  }
   0x1 LB: > { %s3244_s28 = sadd.s32 4294967295, %s3190_s27   ;;  %p2501_p0 = scmp.ge.s32.totalorder %s3190_s27, 1  ;;  %s3190_s27 = sphi %s3238_s27, %s19_s27  }
   0x2   : > { %p223_p1 = scmp.lt.s32.totalorder %s3190_s27, 3  ;;  %s254_s9 = sshll.u32 %s4558_s7, 4  ;;  %s255_s9 = int_to_ptr.vmem [resolvable:$true] %s254_s9 }
   0x3   : > { %p2934_p3 = scmp.eq.s32.totalorder %s3244_s28, 0  ;;  %s3165_s11 = scalar_lea.vmem %s255_s9, 16 }
   0x4   : > { %p3251_p2 = pnand %p2501_p0, %p223_p1  ;;  %p3166_p6 = scmp.ne.s32.totalorder %s255_s9, %s3165_s11 }
   0x5   : > { %p3173_p10 = scmp.lt.s32.totalorder %s255_s9, %s255_s9  ;;  %p3174_p11 = scmp.lt.s32.totalorder %s3165_s11, %s3165_s11 }
   0x6   : > { %p2930_p4 = pneg %p3251_p2 }
   0x7   : > { %p3175_p12 = por %p3174_p11, %p3173_p10 }
   0x8   : > { %p2931_p5 = pnand %p2934_p3, %p2930_p4 }
   0xa   : > { %p3167_p7 = pneg %p2931_p5 }
   0xc   : > { %p3168_p8 = pnand %p3167_p7, %p3166_p6 }
   0xe   : > { %p3169_p9 = pneg %p3168_p8 }
  0x10   : > { %p3176_p13 = pnand %p3175_p12, %p3169_p9 }
  0x12   : > { %3179 = shalt.err (!%p3176_p13)
}
  0x13   : > { %s3192_s12 = smov [#allocation2]   ;;  %275 = sbr.rel (%p3251_p2) target bundleno = 1335 (0x537), region = 52 }
  0x14   : > { %2933 = dma.vmem_to_smem (!%p2931_p5), %s255_s9, 16, %s3192_s12, [#allocation3]  }
  0x1a   : > { %3185 = dma.done.wait (%p2934_p3), [#allocation3], 16  }
  0x1b   : > { %3187 = vsyncadd (%p2934_p3), [#allocation3], 4294967280 }
  0x1c   : > { %281 = sfence }
  0x1d   : > { %v354_v0 = vld [vmem:[%s4552_s1] sm:$0xf]  ;;  %vm491_vm0 = vcmask 1043456   ;;  %p310_p0 = scmp.lt.s32.totalorder %s3244_s28, 1  ;;  %vm442_vm1 = vcmask 64512   ;;  %s353_s21 = sld [smem:[#allocation2]] }
  0x1e   : > { %2915 = vmatprep.subr.msk.bf16.mxu1 %vm491_vm0, %v354_v0  ;;  %v493_v1 = vsel %vm491_vm0, %v354_v0, 0  ;;  %v786_v2 = vld [vmem:[%s4553_s2] sm:$0xf]  ;;  %2914 = vmatprep.subr.msk.bf16.mxu0 %vm491_vm0, %v354_v0  ;;  %s3360_s24 = sld [smem:[#allocation2 + $0x1]]  ;;  %vm1421_vm2 = vcmask 31744   ;;  %s2561_s9 = sld [smem:[#allocation2 + $0x2]] }
  0x1f   : > { %2913 = vmatpush3.bf16.msra.mxu1 %v493_v1  ;;  %s4751_s28 = smov (!%p310_p0, %s3244_s28), 1  ;;  %2811 = vmatpush3.bf16.msra.mxu0 %v493_v1  ;;  %v795_v5 = vsel %vm491_vm0, %v786_v2, 0  ;;  %v3351_v20 = vld [vmem:[%s4555_s4] ss:$0 sm:$0xff] }
  0x20   : > { %2916 = vmatprep.subr.msk.bf16.mxu1 %vm491_vm0, %v786_v2  ;;  %s2597_s17 = sshll.u32 %s4751_s28, 7  ;;  %s2598_s12 = sshll.u32 %s4751_s28, 8 }
  0x21   : > { %s3284_s20 = scalar_lea.vmem %s4551_s0, %s2597_s17  ;;  %s4482_s15 = scalar_lea.vmem %s4559_s8, %s2598_s12 }
  0x22   : > { %v2945_v3 = vld [vmem:[%s3284_s20 + $0x40] sm:$0xff]   ;;  %v2946_v4 = vld [vmem:[%s3284_s20 + $0x48] sm:$0xff]   ;;  %v2947_v6 = vld [vmem:[%s3284_s20 + $0x50] sm:$0xff]  }
  0x23   : > { %2828 = vmatprep.mubr.msk.bf16.mxu1 %vm442_vm1, %v2945_v3  ;;  %v2948_v7 = vld [vmem:[%s3284_s20 + $0x58] sm:$0xff]   ;;  %v2949_v8 = vld [vmem:[%s3284_s20 + $0x60] sm:$0xff]   ;;  %v2954_v10 = vld [vmem:[%s3284_s20 + $0x8] sm:$0xff]   ;;  %v3354_v24 = vstv %s353_s21 }
  0x24   : > { %2829 = vmatmul.mubr.msk.bf16.vlgmr.msra.gmra.mrb[0].mxu1 %vm442_vm1, %v2946_v4  ;;  %v2953_v9 = vld [vmem:[%s3284_s20] sm:$0xff]   ;;  %v2955_v11 = vld [vmem:[%s3284_s20 + $0x10] sm:$0xff]   ;;  %v2950_v12 = vld [vmem:[%s3284_s20 + $0x68] sm:$0xff]   ;;  %v3379_v2 = vstv %s3360_s24 }
  0x25   : > { %2845 = vmatpush3.bf16.msra.mxu1 %v795_v5  ;;  %2832 = vmatprep.mubr.msk.bf16.mxu1 %vm442_vm1, %v2947_v6  ;;  %v2951_v13 = vld [vmem:[%s3284_s20 + $0x70] sm:$0xff]   ;;  %v2956_v14 = vld [vmem:[%s3284_s20 + $0x18] sm:$0xff]   ;;  %v2957_v15 = vld [vmem:[%s3284_s20 + $0x20] sm:$0xff]  }
  0x26   : > { %2812 = vmatprep.mubr.msk.bf16.mxu0 %vm442_vm1, %v2953_v9  ;;  %v2952_v16 = vld [vmem:[%s3284_s20 + $0x78] sm:$0xff]   ;;  %v3313_v17 = vld [vmem:[%s3284_s20 + $0x28] sm:$0xff]   ;;  %v3316_v18 = vld [vmem:[%s3284_s20 + $0x30] sm:$0xff]  }
  0x27   : > { %2813 = vmatmul.mubr.msk.bf16.vlgmr.msra.gmra.mrb[0].mxu0 %vm442_vm1, %v2954_v10  ;;  %v3325_v19 = vld [vmem:[%s3284_s20 + $0x38] sm:$0xff]  }
  0x28   : > { %2816 = vmatprep.mubr.msk.bf16.mxu0 %vm442_vm1, %v2955_v11 }
  0x2c   : > { %2833 = vmatmul.mubr.msk.bf16.gmra.mrb[4].mxu1 %vm442_vm1, %v2948_v7 }
  0x2d   : > { %2836 = vmatprep.mubr.msk.bf16.mxu1 %vm442_vm1, %v2949_v8 }
  0x2f   : > { %2817 = vmatmul.mubr.msk.bf16.gmra.mrb[4].mxu0 %vm442_vm1, %v2956_v14 }
  0x30   : > { %2820 = vmatprep.mubr.msk.bf16.mxu0 %vm442_vm1, %v2957_v15 }
  0x34   : > { %2837 = vmatmul.mubr.msk.bf16.gmra.mrb[8].mxu1 %vm442_vm1, %v2950_v12 }
  0x35   : > { %2840 = vmatprep.mubr.msk.bf16.mxu1 %vm442_vm1, %v2951_v13 }
  0x37   : > { %2821 = vmatmul.mubr.msk.bf16.gmra.mrb[8].mxu0 %vm442_vm1, %v3313_v17 }
  0x38   : > { %2824 = vmatprep.mubr.msk.bf16.mxu0 %vm442_vm1, %v3316_v18 }
  0x3c   : > { %2841 = vmatmul.mubr.msk.bf16.gmra.mrb[12].mxu1 %vm442_vm1, %v2952_v16 }
  0x3d   : > { %2846 = vmatprep.mubr.msk.bf16.mxu1 %vm442_vm1, %v2953_v9 }
  0x3f   : > { %2825 = vmatmul.mubr.msk.bf16.gmra.mrb[12].mxu0 %vm442_vm1, %v3325_v19 }
  0x40   : > { %2880 = vmatprep.mubr.msk.bf16.mxu0 %vm442_vm1, %v2953_v9 }
  0x44   : > { %2847 = vmatmul.mubr.msk.bf16.vlgmr.msra.gmra.mrb[16].mxu1 %vm442_vm1, %v2954_v10 }
  0x45   : > { %2850 = vmatprep.mubr.msk.bf16.mxu1 %vm442_vm1, %v2955_v11 }
  0x4c   : > { %2851 = vmatmul.mubr.msk.bf16.gmra.mrb[20].mxu1 %vm442_vm1, %v2956_v14 }
  0x4d   : > { %2854 = vmatprep.mubr.msk.bf16.mxu1 %vm442_vm1, %v2957_v15 }
  0x54   : > { %2855 = vmatmul.mubr.msk.bf16.gmra.mrb[24].mxu1 %vm442_vm1, %v3313_v17 }
  0x55   : > { %2858 = vmatprep.mubr.msk.bf16.mxu1 %vm442_vm1, %v3316_v18 }
  0x5c   : > { %2859 = vmatmul.mubr.msk.bf16.gmra.mrb[28].mxu1 %vm442_vm1, %v3325_v19 }
  0x5d   : > { %2862 = vmatprep.mubr.msk.bf16.mxu1 %vm442_vm1, %v2945_v3 }
  0x64   : > { %2863 = vmatmul.mubr.msk.bf16.gmra.mrb[32].mxu1 %vm442_vm1, %v2946_v4 }
  0x65   : > { %2866 = vmatprep.mubr.msk.bf16.mxu1 %vm442_vm1, %v2947_v6 }
  0x6c   : > { %2867 = vmatmul.mubr.msk.bf16.gmra.mrb[36].mxu1 %vm442_vm1, %v2948_v7 }
  0x6d   : > { %2870 = vmatprep.mubr.msk.bf16.mxu1 %vm442_vm1, %v2949_v8 }
  0x74   : > { %2871 = vmatmul.mubr.msk.bf16.gmra.mrb[40].mxu1 %vm442_vm1, %v2950_v12 }
  0x75   : > { %2874 = vmatprep.mubr.msk.bf16.mxu1 %vm442_vm1, %v2951_v13 }
  0x7c   : > { %2875 = vmatmul.mubr.msk.bf16.gmra.mrb[44].mxu1 %vm442_vm1, %v2952_v16 }
  0xf7   : > { %v2830_v21 = vpop.f32.mrb[0].mxu1 }
  0xf8   : > { %v602_v22 = vadd.f32 %v2830_v21, %v3351_v20  ;;  %v593_v23 = vpop.f32.mrb[1].mxu1 }
  0xf9   : > { %v594_v25 = vadd.f32 %v3351_v20, %v593_v23  ;;  %v2831_v26 = vpop.f32.mrb[2].mxu1 }
  0xfa   : > { %v706_v27 = vmin.f32 %v602_v22, 0.0  ;;  %v605_v28 = vadd.f32 %v2831_v26, %v3351_v20  ;;  %v596_v29 = vpop.f32.mrb[3].mxu1  ;;  %v674_v36 = vmax.f32 %v602_v22, 0.0  ;;  %v2814_v43 = vpop.f32.mrb[0].mxu0 }
  0xfb   : > { %v704_v30 = vmin.f32 %v594_v25, 0.0  ;;  %v597_v31 = vadd.f32 %v3351_v20, %v596_v29  ;;  %v672_v39 = vmax.f32 %v594_v25, 0.0  ;;  %v529_v48 = vpop.f32.mrb[1].mxu0  ;;  %v538_v53 = vadd.f32 %v2814_v43, %v3351_v20 }
  0xfc   : > { %v739_v32 = vmul.f32 %v3354_v24, %v706_v27  ;;  %v707_v33 = vmin.f32 %v605_v28, 0.0  ;;  %v675_v37 = vmax.f32 %v605_v28, 0.0  ;;  %v2815_v54 = vpop.f32.mrb[2].mxu0  ;;  %v3375_v63 = vadd.f32 %v3351_v20, %v529_v48 }
  0xfd   : > { %v737_v34 = vmul.f32 %v3354_v24, %v704_v30  ;;  %v705_v35 = vmin.f32 %v597_v31, 0.0  ;;  %v673_v40 = vmax.f32 %v597_v31, 0.0  ;;  %v532_v59 = vpop.f32.mrb[3].mxu0  ;;  %v690_v6 = vmin.f32 %v538_v53, 0.0 }
  0xfe   : > { %v740_v38 = vmul.f32 %v3354_v24, %v707_v33  ;;  %v771_v44 = vadd.f32 %v739_v32, %v674_v36  ;;  %v658_v10 = vmax.f32 %v538_v53, 0.0  ;;  %v688_v15 = vmin.f32 %v3375_v63, 0.0 }
  0xff   : > { %v738_v41 = vmul.f32 %v3354_v24, %v705_v35  ;;  %v2834_v42 = vpop.f32.mrb[4].mxu1  ;;  %v769_v49 = vadd.f32 %v737_v34, %v672_v39  ;;  %v723_v25 = vmul.f32 %v3354_v24, %v690_v6  ;;  %v656_v26 = vmax.f32 %v3375_v63, 0.0 }
 0x100   : > { %v772_v45 = vadd.f32 %v740_v38, %v675_v37  ;;  %v618_v46 = vadd.f32 %v2834_v42, %v3351_v20  ;;  %v609_v47 = vpop.f32.mrb[5].mxu1  ;;  %v541_v32 = vadd.f32 %v2815_v54, %v3351_v20  ;;  %v533_v38 = vadd.f32 %v3351_v20, %v532_v59 }
 0x101   : > { %v770_v50 = vadd.f32 %v738_v41, %v673_v40  ;;  %v610_v51 = vadd.f32 %v3351_v20, %v609_v47  ;;  %v2835_v52 = vpop.f32.mrb[6].mxu1  ;;  %v721_v43 = vmul.f32 %v3354_v24, %v688_v15 }
 0x102   : > { %v3368_v55 = vpack.c.bf16 %v772_v45, %v771_v44  ;;  %v710_v56 = vmin.f32 %v618_v46, 0.0  ;;  %v621_v57 = vadd.f32 %v2835_v52, %v3351_v20  ;;  %v612_v58 = vpop.f32.mrb[7].mxu1  ;;  %v678_v3 = vmax.f32 %v618_v46, 0.0  ;;  %v2818_v16 = vpop.f32.mrb[4].mxu0 }
 0x103   : > { %v3371_v60 = vpack.c.bf16 %v770_v50, %v769_v49  ;;  %v708_v61 = vmin.f32 %v610_v51, 0.0  ;;  %v613_v62 = vadd.f32 %v3351_v20, %v612_v58  ;;  %v676_v7 = vmax.f32 %v610_v51, 0.0  ;;  %v545_v27 = vpop.f32.mrb[5].mxu0 }
 0x104   : > { %v743_v0 = vmul.f32 %v3354_v24, %v710_v56  ;;  %v711_v1 = vmin.f32 %v621_v57, 0.0  ;;  %v679_v8 = vmax.f32 %v621_v57, 0.0  ;;  %v3390_v33 = vpop.f32.mrb[6].mxu0  ;;  %v755_v46 = vadd.f32 %v723_v25, %v658_v10 }
 0x105   : > { %v741_v4 = vmul.f32 %v3354_v24, %v708_v61  ;;  %v709_v5 = vmin.f32 %v613_v62, 0.0  ;;  %v677_v12 = vmax.f32 %v613_v62, 0.0  ;;  %v3396_v39 = vpop.f32.mrb[7].mxu0  ;;  %v659_v47 = vmax.f32 %v541_v32, 0.0 }
 0x106   : > { %v744_v9 = vmul.f32 %v3354_v24, %v711_v1  ;;  %v775_v11 = vadd.f32 %v743_v0, %v678_v3  ;;  %v691_v51 = vmin.f32 %v541_v32, 0.0  ;;  %v689_v56 = vmin.f32 %v533_v38, 0.0  ;;  %v3426_v32 = vld [vmem:[%s4556_s5] ss:$0 sm:$0xff] }
 0x107   : > { %v742_v13 = vmul.f32 %v3354_v24, %v709_v5  ;;  %v2838_v14 = vpop.f32.mrb[8].mxu1  ;;  %v773_v28 = vadd.f32 %v741_v4, %v676_v7  ;;  %v657_v4 = vmax.f32 %v533_v38, 0.0 }
 0x108   : > { %v776_v21 = vadd.f32 %v744_v9, %v679_v8  ;;  %v634_v22 = vadd.f32 %v2838_v14, %v3351_v20  ;;  %v625_v23 = vpop.f32.mrb[9].mxu1  ;;  %v724_v62 = vmul.f32 %v3354_v24, %v691_v51  ;;  %v722_v9 = vmul.f32 %v3354_v24, %v689_v56 }
 0x109   : > { %v774_v29 = vadd.f32 %v742_v13, %v677_v12  ;;  %v626_v30 = vadd.f32 %v3351_v20, %v625_v23  ;;  %v2839_v31 = vpop.f32.mrb[10].mxu1 }
 0x10a   : > { %v3392_v34 = vpack.c.bf16 %v776_v21, %v775_v11  ;;  %v714_v35 = vmin.f32 %v634_v22, 0.0  ;;  %v637_v36 = vadd.f32 %v2839_v31, %v3351_v20  ;;  %v628_v37 = vpop.f32.mrb[11].mxu1  ;;  %v682_v48 = vmax.f32 %v634_v22, 0.0 }
 0x10b   : > { %v3398_v40 = vpack.c.bf16 %v774_v29, %v773_v28  ;;  %v712_v41 = vmin.f32 %v626_v30, 0.0  ;;  %v629_v42 = vadd.f32 %v3351_v20, %v628_v37  ;;  %v680_v52 = vmax.f32 %v626_v30, 0.0 }
 0x10c   : > { %v747_v44 = vmul.f32 %v3354_v24, %v714_v35  ;;  %v715_v45 = vmin.f32 %v637_v36, 0.0  ;;  %v683_v53 = vmax.f32 %v637_v36, 0.0  ;;  %v756_v8 = vadd.f32 %v724_v62, %v659_v47 }
 0x10d   : > { %v745_v49 = vmul.f32 %v3354_v24, %v712_v41  ;;  %v713_v50 = vmin.f32 %v629_v42, 0.0  ;;  %v681_v58 = vmax.f32 %v629_v42, 0.0  ;;  %v753_v22 = vadd.f32 %v721_v43, %v656_v26  ;;  %v3431_v26 = vpop.f32.mrb[8].mxu0 }
 0x10e   : > { %v748_v54 = vmul.f32 %v3354_v24, %v715_v45  ;;  %v779_v57 = vadd.f32 %v747_v44, %v682_v48  ;;  %v3417_v28 = vpack.c.bf16 %v756_v8, %v755_v46  ;;  %v3420_v29 = vadd.f32 %v2818_v16, %v3351_v20  ;;  %v3435_v42 = vpop.f32.mrb[9].mxu0 }
 0x10f   : > { %v746_v59 = vmul.f32 %v3354_v24, %v713_v50  ;;  %v2842_v61 = vpop.f32.mrb[12].mxu1  ;;  %v777_v63 = vadd.f32 %v745_v49, %v680_v52  ;;  %v754_v35 = vadd.f32 %v722_v9, %v657_v4  ;;  %v3429_v36 = vadd.f32 %v3351_v20, %v545_v27  ;;  %v3440_v48 = vpop.f32.mrb[10].mxu0 }
 0x110   : > { %v780_v0 = vadd.f32 %v748_v54, %v683_v53  ;;  %v650_v1 = vadd.f32 %v2842_v61, %v3351_v20  ;;  %v641_v3 = vpop.f32.mrb[13].mxu1  ;;  %v662_v16 = vmax.f32 %v3420_v29, 0.0  ;;  %v694_v52 = vmin.f32 %v3420_v29, 0.0  ;;  %v3444_v53 = vpop.f32.mrb[11].mxu0 }
 0x111   : > { %v778_v5 = vadd.f32 %v746_v59, %v681_v58  ;;  %v642_v6 = vadd.f32 %v3351_v20, %v641_v3  ;;  %v2843_v7 = vpop.f32.mrb[14].mxu1  ;;  %v3438_v47 = vpack.c.bf16 %v754_v35, %v753_v22  ;;  %v692_v59 = vmin.f32 %v3429_v36, 0.0 }
 0x112   : > { %v3410_v10 = vpack.c.bf16 %v780_v0, %v779_v57  ;;  %v718_v11 = vmin.f32 %v650_v1, 0.0  ;;  %v653_v12 = vadd.f32 %v2843_v7, %v3351_v20  ;;  %v644_v13 = vpop.f32.mrb[15].mxu1  ;;  %v686_v37 = vmax.f32 %v650_v1, 0.0 }
 0x113   : > { %v3413_v14 = vpack.c.bf16 %v778_v5, %v777_v63  ;;  %v716_v15 = vmin.f32 %v642_v6, 0.0  ;;  %v645_v21 = vadd.f32 %v3351_v20, %v644_v13  ;;  %v684_v43 = vmax.f32 %v642_v6, 0.0  ;;  %2666 = vmatprep.mubr.msk.bf16.mxu1 %vm1421_vm2, %v3438_v47 }
 0x114   : > { %v751_v23 = vmul.f32 %v3354_v24, %v718_v11  ;;  %v719_v25 = vmin.f32 %v653_v12, 0.0  ;;  %v687_v38 = vmax.f32 %v653_v12, 0.0  ;;  %v557_v1 = vadd.f32 %v3390_v33, %v3351_v20 }
 0x115   : > { %v749_v30 = vmul.f32 %v3354_v24, %v716_v15  ;;  %v717_v31 = vmin.f32 %v645_v21, 0.0  ;;  %v685_v44 = vmax.f32 %v645_v21, 0.0  ;;  %v549_v6 = vadd.f32 %v3351_v20, %v3396_v39 }
 0x116   : > { %v752_v41 = vmul.f32 %v3354_v24, %v719_v25  ;;  %v783_v27 = vadd.f32 %v751_v23, %v686_v37  ;;  %v727_v9 = vmul.f32 %v3354_v24, %v694_v52  ;;  %v660_v11 = vmax.f32 %v3429_v36, 0.0 }
 0x117   : > { %v750_v45 = vmul.f32 %v3354_v24, %v717_v31  ;;  %v2848_v46 = vpop.f32.mrb[16].mxu1  ;;  %v781_v54 = vadd.f32 %v749_v30, %v684_v43  ;;  %v725_v33 = vmul.f32 %v3354_v24, %v692_v59  ;;  %v695_v25 = vmin.f32 %v557_v1, 0.0 }
 0x118   : > { %v784_v49 = vadd.f32 %v752_v41, %v687_v38  ;;  %v840_v50 = vadd.f32 %v2848_v46, %v3426_v32  ;;  %v831_v51 = vpop.f32.mrb[17].mxu1  ;;  %v693_v37 = vmin.f32 %v549_v6, 0.0 }
 0x119   : > { %v782_v56 = vadd.f32 %v750_v45, %v685_v44  ;;  %v832_v57 = vadd.f32 %v3426_v32, %v831_v51  ;;  %v2849_v58 = vpop.f32.mrb[18].mxu1  ;;  %v663_v44 = vmax.f32 %v557_v1, 0.0  ;;  %v759_v1 = vadd.f32 %v727_v9, %v662_v16 }
 0x11a   : > { %v3450_v61 = vpack.c.bf16 %v784_v49, %v783_v27  ;;  %v992_v62 = vmin.f32 %v840_v50, 0.0  ;;  %v843_v63 = vadd.f32 %v2849_v58, %v3426_v32  ;;  %v834_v0 = vpop.f32.mrb[19].mxu1  ;;  %v960_v12 = vmax.f32 %v840_v50, 0.0 }
 0x11b   : > { %v3455_v3 = vpack.c.bf16 %v782_v56, %v781_v54  ;;  %v990_v4 = vmin.f32 %v832_v57, 0.0  ;;  %v835_v5 = vadd.f32 %v3426_v32, %v834_v0  ;;  %v958_v21 = vmax.f32 %v832_v57, 0.0 }
 0x11c   : > { %v1025_v7 = vmul.f32 %v3379_v2, %v992_v62  ;;  %v993_v8 = vmin.f32 %v843_v63, 0.0  ;;  %v961_v22 = vmax.f32 %v843_v63, 0.0  ;;  %v728_v49 = vmul.f32 %v3354_v24, %v695_v25 }
 0x11d   : > { %v1023_v13 = vmul.f32 %v3379_v2, %v990_v4  ;;  %v991_v15 = vmin.f32 %v835_v5, 0.0  ;;  %v959_v39 = vmax.f32 %v835_v5, 0.0  ;;  %v661_v50 = vmax.f32 %v549_v6, 0.0 }
 0x11e   : > { %v1026_v23 = vmul.f32 %v3379_v2, %v993_v8  ;;  %v3466_v30 = vadd.f32 %v1025_v7, %v960_v12  ;;  %v726_v57 = vmul.f32 %v3354_v24, %v693_v37  ;;  %v757_v4 = vadd.f32 %v725_v33, %v660_v11  ;;  %v3482_v12 = vpop.f32.mrb[12].mxu0 }
 0x11f   : > { %v1024_v31 = vmul.f32 %v3379_v2, %v991_v15  ;;  %v2852_v35 = vpop.f32.mrb[20].mxu1  ;;  %v1055_v38 = vadd.f32 %v1023_v13, %v958_v21  ;;  %v570_v8 = vadd.f32 %v3431_v26, %v3351_v20  ;;  %v760_v21 = vadd.f32 %v728_v49, %v663_v44 }
 0x120   : > { %v1058_v36 = vadd.f32 %v1026_v23, %v961_v22  ;;  %v856_v41 = vadd.f32 %v2852_v35, %v3426_v32  ;;  %v847_v43 = vpop.f32.mrb[21].mxu1  ;;  %v758_v22 = vadd.f32 %v726_v57, %v661_v50  ;;  %v3485_v23 = vpop.f32.mrb[13].mxu0 }
 0x121   : > { %v1056_v45 = vadd.f32 %v1024_v31, %v959_v39  ;;  %v848_v46 = vadd.f32 %v3426_v32, %v847_v43  ;;  %v2853_v27 = vpop.f32.mrb[22].mxu1  ;;  %v3490_v33 = vpop.f32.mrb[14].mxu0  ;;  %v3495_v31 = vpack.c.bf16 %v760_v21, %v759_v1  ;;  %v698_v44 = vmin.f32 %v570_v8, 0.0 }
 0x122   : > { %v996_v51 = vmin.f32 %v856_v41, 0.0  ;;  %v859_v52 = vadd.f32 %v2853_v27, %v3426_v32  ;;  %v850_v54 = vpop.f32.mrb[23].mxu1  ;;  %v1406_v56 = vpack.c.bf16 %v1058_v36, %v3466_v30  ;;  %v964_v5 = vmax.f32 %v856_v41, 0.0  ;;  %v3499_v37 = vpop.f32.mrb[15].mxu0 }
 0x123   : > { %v994_v58 = vmin.f32 %v848_v46, 0.0  ;;  %v851_v59 = vadd.f32 %v3426_v32, %v850_v54  ;;  %v1405_v62 = vpack.c.bf16 %v1056_v45, %v1055_v38  ;;  %v962_v29 = vmax.f32 %v848_v46, 0.0 }
 0x124   : > { %v1029_v63 = vmul.f32 %v3379_v2, %v996_v51  ;;  %v997_v0 = vmin.f32 %v859_v52, 0.0  ;;  %v965_v13 = vmax.f32 %v859_v52, 0.0  ;;  %v3497_v35 = vpack.c.bf16 %v758_v22, %v757_v4 }
 0x125   : > { %v1027_v6 = vmul.f32 %v3379_v2, %v994_v58  ;;  %v995_v7 = vmin.f32 %v851_v59, 0.0  ;;  %v963_v16 = vmax.f32 %v851_v59, 0.0  ;;  %v562_v54 = vadd.f32 %v3351_v20, %v3435_v42 }
 0x126   : > { %v1030_v15 = vmul.f32 %v3379_v2, %v997_v0  ;;  %v3487_v25 = vadd.f32 %v1029_v63, %v964_v5  ;;  %v3516_v59 = vsel %vm1421_vm2, %v1405_v62, 0  ;;  %v3519_v63 = vsel %vm1421_vm2, %v1406_v56, 0 }
 0x127   : > { %v1028_v9 = vmul.f32 %v3379_v2, %v995_v7  ;;  %v2856_v11 = vpop.f32.mrb[24].mxu1  ;;  %v3501_v38 = vadd.f32 %v1027_v6, %v962_v29  ;;  %v666_v4 = vmax.f32 %v570_v8, 0.0  ;;  %v731_v5 = vmul.f32 %v3354_v24, %v698_v44 }
 0x128   : > { %v3492_v30 = vadd.f32 %v1030_v15, %v965_v13  ;;  %v872_v26 = vadd.f32 %v2856_v11, %v3426_v32  ;;  %v863_v39 = vpop.f32.mrb[25].mxu1  ;;  %v664_v42 = vmax.f32 %v562_v54, 0.0  ;;  %v573_v56 = vadd.f32 %v3440_v48, %v3351_v20 }
 0x129   : > { %v3503_v36 = vadd.f32 %v1028_v9, %v963_v16  ;;  %v864_v41 = vadd.f32 %v3426_v32, %v863_v39  ;;  %v2857_v43 = vpop.f32.mrb[26].mxu1  ;;  %v696_v11 = vmin.f32 %v562_v54, 0.0  ;;  %v763_v44 = vadd.f32 %v731_v5, %v666_v4 }
 0x12a   : > { %v1000_v45 = vmin.f32 %v872_v26, 0.0  ;;  %v875_v46 = vadd.f32 %v2857_v43, %v3426_v32  ;;  %v866_v27 = vpop.f32.mrb[27].mxu1  ;;  %v968_v6 = vmax.f32 %v872_v26, 0.0  ;;  %v3549_v5 = vadd.f32 %v3482_v12, %v3351_v20 }
 0x12b   : > { %v998_v50 = vmin.f32 %v864_v41, 0.0  ;;  %v867_v51 = vadd.f32 %v3426_v32, %v866_v27  ;;  %v966_v15 = vmax.f32 %v864_v41, 0.0  ;;  %v729_v4 = vmul.f32 %v3354_v24, %v696_v11 }
 0x12c   : > { %v1033_v57 = vmul.f32 %v3379_v2, %v1000_v45  ;;  %v1001_v58 = vmin.f32 %v875_v46, 0.0  ;;  %v969_v7 = vmax.f32 %v875_v46, 0.0 }
 0x12d   : > { %v1031_v0 = vmul.f32 %v3379_v2, %v998_v50  ;;  %v999_v1 = vmin.f32 %v867_v51, 0.0  ;;  %v967_v21 = vmax.f32 %v867_v51, 0.0  ;;  %v699_v50 = vmin.f32 %v573_v56, 0.0 }
 0x12e   : > { %v1034_v13 = vmul.f32 %v3379_v2, %v1001_v58  ;;  %v3527_v29 = vadd.f32 %v1033_v57, %v968_v6  ;;  %v565_v58 = vadd.f32 %v3351_v20, %v3444_v53 }
 0x12f   : > { %v1032_v22 = vmul.f32 %v3379_v2, %v999_v1  ;;  %v2860_v62 = vpop.f32.mrb[28].mxu1  ;;  %v3532_v26 = vadd.f32 %v1031_v0, %v966_v15  ;;  %v667_v15 = vmax.f32 %v573_v56, 0.0  ;;  %v732_v53 = vmul.f32 %v3354_v24, %v699_v50 }
 0x130   : > { %v3529_v16 = vadd.f32 %v1034_v13, %v969_v7  ;;  %v888_v8 = vadd.f32 %v2860_v62, %v3426_v32  ;;  %v879_v9 = vpop.f32.mrb[29].mxu1 }
 0x131   : > { %v3534_v39 = vadd.f32 %v1032_v22, %v967_v21  ;;  %v880_v41 = vadd.f32 %v3426_v32, %v879_v9  ;;  %v2861_v43 = vpop.f32.mrb[30].mxu1 }
 0x132   : > { %v1004_v45 = vmin.f32 %v888_v8, 0.0  ;;  %v891_v46 = vadd.f32 %v2861_v43, %v3426_v32  ;;  %v882_v48 = vpop.f32.mrb[31].mxu1  ;;  %v972_v6 = vmax.f32 %v888_v8, 0.0 }
 0x133   : > { %v1002_v51 = vmin.f32 %v880_v41, 0.0  ;;  %v883_v57 = vadd.f32 %v3426_v32, %v882_v48  ;;  %v970_v21 = vmax.f32 %v880_v41, 0.0  ;;  %v697_v48 = vmin.f32 %v565_v58, 0.0 }
 0x134   : > { %v1037_v0 = vmul.f32 %v3379_v2, %v1004_v45  ;;  %v1005_v1 = vmin.f32 %v891_v46, 0.0  ;;  %v973_v22 = vmax.f32 %v891_v46, 0.0  ;;  %v761_v41 = vadd.f32 %v729_v4, %v664_v42 }
 0x135   : > { %v1035_v7 = vmul.f32 %v3379_v2, %v1002_v51  ;;  %v1003_v13 = vmin.f32 %v883_v57, 0.0  ;;  %v971_v43 = vmax.f32 %v883_v57, 0.0  ;;  %v670_v4 = vmax.f32 %v3549_v5, 0.0 }
 0x136   : > { %v1038_v62 = vmul.f32 %v3379_v2, %v1005_v1  ;;  %v3554_v9 = vadd.f32 %v1037_v0, %v972_v6  ;;  %v764_v0 = vadd.f32 %v732_v53, %v667_v15  ;;  %v665_v6 = vmax.f32 %v565_v58, 0.0 }
 0x137   : > { %v1036_v11 = vmul.f32 %v3379_v2, %v1003_v13  ;;  %v2864_v45 = vpop.f32.mrb[32].mxu1  ;;  %v3557_v12 = vadd.f32 %v1035_v7, %v970_v21  ;;  %v730_v21 = vmul.f32 %v3354_v24, %v697_v48  ;;  %v702_v53 = vmin.f32 %v3549_v5, 0.0 }
 0x138   : > { %v3559_v8 = vadd.f32 %v1038_v62, %v973_v22  ;;  %v904_v51 = vadd.f32 %v2864_v45, %v3426_v32  ;;  %v895_v56 = vpop.f32.mrb[33].mxu1 }
 0x139   : > { %v3562_v46 = vadd.f32 %v1036_v11, %v971_v43  ;;  %v896_v1 = vadd.f32 %v3426_v32, %v895_v56  ;;  %v2865_v50 = vpop.f32.mrb[34].mxu1  ;;  %v762_v54 = vadd.f32 %v730_v21, %v665_v6  ;;  %v589_v21 = vadd.f32 %v3490_v33, %v3351_v20 }
 0x13a   : > { %v1008_v57 = vmin.f32 %v904_v51, 0.0  ;;  %v907_v13 = vadd.f32 %v2865_v50, %v3426_v32  ;;  %v898_v27 = vpop.f32.mrb[35].mxu1  ;;  %v976_v43 = vmax.f32 %v904_v51, 0.0 }
 0x13b   : > { %v1006_v22 = vmin.f32 %v896_v1, 0.0  ;;  %v899_v62 = vadd.f32 %v3426_v32, %v898_v27  ;;  %v974_v11 = vmax.f32 %v896_v1, 0.0  ;;  %v3577_v27 = vpack.c.bf16 %v764_v0, %v763_v44 }
 0x13c   : > { %v1041_v58 = vmul.f32 %v3379_v2, %v1008_v57  ;;  %v1009_v15 = vmin.f32 %v907_v13, 0.0  ;;  %v977_v56 = vmax.f32 %v907_v13, 0.0  ;;  %v578_v57 = vadd.f32 %v3351_v20, %v3485_v23 }
 0x13d   : > { %v1039_v45 = vmul.f32 %v3379_v2, %v1006_v22  ;;  %v1007_v50 = vmin.f32 %v899_v62, 0.0  ;;  %v975_v7 = vmax.f32 %v899_v62, 0.0  ;;  %v3583_v13 = vpack.c.bf16 %v762_v54, %v761_v41 }
 0x13e   : > { %v1042_v48 = vmul.f32 %v3379_v2, %v1009_v15  ;;  %v1073_v42 = vadd.f32 %v1041_v58, %v976_v43  ;;  %v735_v15 = vmul.f32 %v3354_v24, %v702_v53  ;;  %v668_v6 = vmax.f32 %v578_v57, 0.0 }
 0x13f   : > { %v1071_v49 = vadd.f32 %v1039_v45, %v974_v11  ;;  %v1040_v51 = vmul.f32 %v3379_v2, %v1007_v50  ;;  %v2868_v52 = vpop.f32.mrb[36].mxu1 }
 0x140   : > { %v1074_v5 = vadd.f32 %v1042_v48, %v977_v56  ;;  %v920_v1 = vadd.f32 %v2868_v52, %v3426_v32  ;;  %v911_v22 = vpop.f32.mrb[37].mxu1  ;;  %v700_v48 = vmin.f32 %v578_v57, 0.0 }
 0x141   : > { %v1072_v62 = vadd.f32 %v1040_v51, %v975_v7  ;;  %v912_v44 = vadd.f32 %v3426_v32, %v911_v22  ;;  %v2869_v0 = vpop.f32.mrb[38].mxu1 }
 0x142   : > { %v1414_v43 = vpack.c.bf16 %v1074_v5, %v1073_v42  ;;  %v980_v58 = vmax.f32 %v920_v1, 0.0  ;;  %v1012_v11 = vmin.f32 %v920_v1, 0.0  ;;  %v923_v23 = vadd.f32 %v2869_v0, %v3426_v32  ;;  %v914_v45 = vpop.f32.mrb[39].mxu1 }
 0x143   : > { %v1413_v52 = vpack.c.bf16 %v1072_v62, %v1071_v49  ;;  %v978_v56 = vmax.f32 %v912_v44, 0.0  ;;  %v1010_v54 = vmin.f32 %v912_v44, 0.0  ;;  %v915_v41 = vadd.f32 %v3426_v32, %v914_v45 }
 0x144   : > { %v1045_v7 = vmul.f32 %v3379_v2, %v1012_v11  ;;  %v981_v53 = vmax.f32 %v923_v23, 0.0  ;;  %v1013_v50 = vmin.f32 %v923_v23, 0.0  ;;  %v767_v42 = vadd.f32 %v735_v15, %v670_v4 }
 0x145   : > { %v1043_v51 = vmul.f32 %v3379_v2, %v1010_v54  ;;  %v979_v22 = vmax.f32 %v915_v41, 0.0  ;;  %v1011_v33 = vmin.f32 %v915_v41, 0.0  ;;  %2918 = vmatprep.subr.msk.bf16.mxu1 %vm1421_vm2, %v1413_v52  ;;  %v733_v1 = vmul.f32 %v3354_v24, %v700_v48 }
 0x146   : > { %v3594_v5 = vadd.f32 %v1045_v7, %v980_v58  ;;  %v1046_v49 = vmul.f32 %v3379_v2, %v1013_v50  ;;  %2651 = vmatpush3.bf16.xpose.msra.mxu1 %v3516_v59  ;;  %v703_v62 = vmin.f32 %v589_v21, 0.0  ;;  %v671_v11 = vmax.f32 %v589_v21, 0.0 }
 0x147   : > { %v1075_v44 = vadd.f32 %v1043_v51, %v978_v56  ;;  %v1044_v0 = vmul.f32 %v3379_v2, %v1011_v33  ;;  %2919 = vmatprep.subr.msk.bf16.mxu1 %vm1421_vm2, %v1414_v43  ;;  %v2872_v57 = vpop.f32.mrb[40].mxu1  ;;  %v581_v23 = vadd.f32 %v3351_v20, %v3499_v37  ;;  %v765_v45 = vadd.f32 %v733_v1, %v668_v6 }
 0x148   : > { %v3603_v4 = vadd.f32 %v1046_v49, %v981_v53  ;;  %v936_v15 = vadd.f32 %v2872_v57, %v3426_v32  ;;  %v927_v58 = vpop.f32.mrb[41].mxu1  ;;  %v736_v59 = vmul.f32 %v3354_v24, %v703_v62 }
 0x149   : > { %v1076_v52 = vadd.f32 %v1044_v0, %v979_v22  ;;  %v928_v56 = vadd.f32 %v3426_v32, %v927_v58  ;;  %v2873_v54 = vpop.f32.mrb[42].mxu1  ;;  %v669_v41 = vmax.f32 %v581_v23, 0.0  ;;  %v701_v7 = vmin.f32 %v581_v23, 0.0 }
 0x14a   : > { %v1416_v21 = vpack.c.bf16 %v3603_v4, %v3594_v5  ;;  %v984_v43 = vmax.f32 %v936_v15, 0.0  ;;  %v1016_v50 = vmin.f32 %v936_v15, 0.0  ;;  %v939_v20 = vadd.f32 %v2873_v54, %v3426_v32  ;;  %v930_v37 = vpop.f32.mrb[43].mxu1 }
 0x14b   : > { %v1415_v53 = vpack.c.bf16 %v1076_v52, %v1075_v44  ;;  %v982_v48 = vmax.f32 %v928_v56, 0.0  ;;  %v1014_v51 = vmin.f32 %v928_v56, 0.0  ;;  %v931_v6 = vadd.f32 %v3426_v32, %v930_v37 }
 0x14c   : > { %v1049_v22 = vmul.f32 %v3379_v2, %v1016_v50  ;;  %v985_v33 = vmax.f32 %v939_v20, 0.0  ;;  %v1017_v49 = vmin.f32 %v939_v20, 0.0  ;;  %v768_v1 = vadd.f32 %v736_v59, %v671_v11 }
 0x14d   : > { %v1047_v62 = vmul.f32 %v3379_v2, %v1014_v51  ;;  %v983_v0 = vmax.f32 %v931_v6, 0.0  ;;  %v1015_v57 = vmin.f32 %v931_v6, 0.0  ;;  %v734_v5 = vmul.f32 %v3354_v24, %v701_v7 }
 0x14e   : > { %2653 = vmatpush3.bf16.xpose.msra.mxu1 %v3519_v63  ;;  %v1081_v23 = vadd.f32 %v1049_v22, %v984_v43  ;;  %v1050_v44 = vmul.f32 %v3379_v2, %v1017_v49  ;;  %v3617_v4 = vpack.c.bf16 %v768_v1, %v767_v42  ;;  %v4622_v1 = vpack.c.bf16 %v3503_v36, %v3501_v38 }
 0x14f   : > { %2920 = vmatprep.subr.msk.bf16.mxu1 %vm1421_vm2, %v1415_v53  ;;  %v1079_v15 = vadd.f32 %v1047_v62, %v982_v48  ;;  %v1048_v58 = vmul.f32 %v3379_v2, %v1015_v57  ;;  %v2876_v52 = vpop.f32.mrb[44].mxu1  ;;  %v766_v11 = vadd.f32 %v734_v5, %v669_v41  ;;  %v4623_v38 = vpack.c.bf16 %v3492_v30, %v3487_v25 }
 0x150   : > { %v1082_v59 = vadd.f32 %v1050_v44, %v985_v33  ;;  %v952_v56 = vadd.f32 %v2876_v52, %v3426_v32  ;;  %v943_v54 = vpop.f32.mrb[45].mxu1  ;;  %v4626_v25 = vpack.c.bf16 %v3562_v46, %v3557_v12 }
 0x151   : > { %v1080_v50 = vadd.f32 %v1048_v58, %v983_v0  ;;  %v944_v24 = vadd.f32 %v3426_v32, %v943_v54  ;;  %v2877_v63 = vpop.f32.mrb[46].mxu1  ;;  %v1395_v7 = vpack.c.bf16 %v766_v11, %v765_v45  ;;  %v1477_v45 = vsel %vm1421_vm2, %v4622_v1, 0 }
 0x152   : > { %v1418_v43 = vpack.c.bf16 %v1082_v59, %v1081_v23  ;;  %v988_v20 = vmax.f32 %v952_v56, 0.0  ;;  %v1020_v42 = vmin.f32 %v952_v56, 0.0  ;;  %v955_v37 = vadd.f32 %v2877_v63, %v3426_v32  ;;  %v946_v53 = vpop.f32.mrb[47].mxu1 }
 0x153   : > { %v1417_v48 = vpack.c.bf16 %v1080_v50, %v1079_v15  ;;  %v986_v51 = vmax.f32 %v944_v24, 0.0  ;;  %v1018_v6 = vmin.f32 %v944_v24, 0.0  ;;  %v947_v41 = vadd.f32 %v3426_v32, %v946_v53 }
 0x154   : > { %v1053_v22 = vmul.f32 %v3379_v2, %v1020_v42  ;;  %v989_v33 = vmax.f32 %v955_v37, 0.0  ;;  %v1021_v49 = vmin.f32 %v955_v37, 0.0  ;;  %v1480_v36 = vsel %vm1421_vm2, %v4623_v38, 0 }
 0x155   : > { %v1051_v62 = vmul.f32 %v3379_v2, %v1018_v6  ;;  %v987_v0 = vmax.f32 %v947_v41, 0.0  ;;  %v1019_v57 = vmin.f32 %v947_v41, 0.0  ;;  %v4624_v59 = vpack.c.bf16 %v3534_v39, %v3532_v26 }
 0x156   : > { %2655 = vmatpush3.bf16.xpose.msra.mxu1 %v1477_v45  ;;  %v1085_v5 = vadd.f32 %v1053_v22, %v988_v20  ;;  %v1054_v23 = vmul.f32 %v3379_v2, %v1021_v49  ;;  %v1489_v30 = vsel %vm1421_vm2, %v4626_v25, 0  ;;  %v4627_v26 = vpack.c.bf16 %v3559_v8, %v3554_v9 }
 0x157   : > { %2921 = vmatprep.subr.msk.bf16.mxu1 %vm1421_vm2, %v1416_v21  ;;  %v1083_v32 = vadd.f32 %v1051_v62, %v986_v51  ;;  %v1052_v44 = vmul.f32 %v3379_v2, %v1019_v57  ;;  %v1483_v21 = vsel %vm1421_vm2, %v4624_v59, 0  ;;  %v4625_v2 = vpack.c.bf16 %v3529_v16, %v3527_v29 }
 0x158   : > { %v1086_v15 = vadd.f32 %v1054_v23, %v989_v33  ;;  %v1492_v39 = vsel %vm1421_vm2, %v4627_v26, 0 }
 0x159   : > { %v1084_v58 = vadd.f32 %v1052_v44, %v987_v0  ;;  %v1486_v56 = vsel %vm1421_vm2, %v4625_v2, 0 }
 0x15a   : > { %v1420_v52 = vpack.c.bf16 %v1086_v15, %v1085_v5 }
 0x15b   : > { %v1419_v11 = vpack.c.bf16 %v1084_v58, %v1083_v32 }
 0x15e   : > { %2657 = vmatpush3.bf16.xpose.msra.mxu1 %v1480_v36 }
 0x15f   : > { %2922 = vmatprep.subr.msk.bf16.mxu1 %vm1421_vm2, %v1417_v48 }
 0x166   : > { %2659 = vmatpush3.bf16.xpose.msra.mxu1 %v1483_v21 }
 0x167   : > { %2923 = vmatprep.subr.msk.bf16.mxu1 %vm1421_vm2, %v1418_v43 }
 0x16e   : > { %2661 = vmatpush3.bf16.xpose.msra.mxu1 %v1486_v56 }
 0x16f   : > { %2924 = vmatprep.subr.msk.bf16.mxu1 %vm1421_vm2, %v1419_v11 }
 0x176   : > { %2663 = vmatpush3.bf16.xpose.msra.mxu1 %v1489_v30 }
 0x177   : > { %2925 = vmatprep.subr.msk.bf16.mxu1 %vm1421_vm2, %v1420_v52 }
 0x17e   : > { %2665 = vmatpush3.bf16.xpose.msra.mxu1 %v1492_v39 }
 0x185   : > { %2667 = vmatmul.mubr.msk.bf16.vlgmr.msra.gmra.mrb[48].mxu1 %vm1421_vm2, %v3438_v47  ;;  %v3158_v47 = vld [vmem:[%s3284_s20 + $0x48] sm:$0xff]  }
 0x186   : > { %2668 = vmatprep.mubr.msk.bf16.mxu1 %vm1421_vm2, %v3417_v28 }
 0x18d   : > { %2669 = vmatmul.mubr.msk.bf16.gmra.mrb[52].mxu1 %vm1421_vm2, %v3417_v28  ;;  %v3157_v28 = vld [vmem:[%s3284_s20 + $0x40] sm:$0xff]  }
 0x18e   : > { %2670 = vmatprep.mubr.msk.bf16.mxu1 %vm1421_vm2, %v3497_v35 }
 0x195   : > { %2671 = vmatmul.mubr.msk.bf16.gmra.mrb[56].mxu1 %vm1421_vm2, %v3497_v35 }
 0x196   : > { %2672 = vmatprep.mubr.msk.bf16.mxu1 %vm1421_vm2, %v3495_v31 }
 0x19d   : > { %2673 = vmatmul.mubr.msk.bf16.gmra.mrb[60].mxu1 %vm1421_vm2, %v3495_v31  ;;  %v3163_v31 = vld [vmem:[%s3284_s20 + $0x70] sm:$0xff]  }
 0x19e   : > { %2674 = vmatprep.mubr.msk.bf16.mxu1 %vm1421_vm2, %v3583_v13 }
 0x1a5   : > { %2675 = vmatmul.mubr.msk.bf16.gmra.mrb[64].mxu1 %vm1421_vm2, %v3583_v13 }
 0x1a6   : > { %2676 = vmatprep.mubr.msk.bf16.mxu1 %vm1421_vm2, %v3577_v27 }
 0x1ad   : > { %2677 = vmatmul.mubr.msk.bf16.gmra.mrb[68].mxu1 %vm1421_vm2, %v3577_v27 }
 0x1ae   : > { %2678 = vmatprep.mubr.msk.bf16.mxu1 %vm1421_vm2, %v1395_v7 }
 0x1b5   : > { %2679 = vmatmul.mubr.msk.bf16.gmra.mrb[72].mxu1 %vm1421_vm2, %v1395_v7 }
 0x1b6   : > { %2680 = vmatprep.mubr.msk.bf16.mxu1 %vm1421_vm2, %v3617_v4 }
 0x1bd   : > { %2681 = vmatmul.mubr.msk.bf16.gmra.mrb[76].mxu1 %vm1421_vm2, %v3617_v4 }
 0x1be   : > { %2682 = vmatprep.mubr.msk.bf16.mxu1 %vm1421_vm2, %v3371_v60 }
 0x1c5   : > { %2683 = vmatmul.mubr.msk.bf16.gmra.mrb[80].mxu1 %vm1421_vm2, %v3371_v60 }
 0x1c6   : > { %2684 = vmatprep.mubr.msk.bf16.mxu1 %vm1421_vm2, %v3368_v55 }
 0x1cd   : > { %2685 = vmatmul.mubr.msk.bf16.gmra.mrb[84].mxu1 %vm1421_vm2, %v3368_v55  ;;  %v1088_v55 = vld [vmem:[%s4554_s3] sm:$0xf] }
 0x1ce   : > { %2686 = vmatprep.mubr.msk.bf16.mxu1 %vm1421_vm2, %v3398_v40  ;;  %2917 = vmatprep.subr.msk.bf16.mxu0 %vm491_vm0, %v1088_v55  ;;  %v1097_v60 = vsel %vm491_vm0, %v1088_v55, 0 }
 0x1cf   : > { %2879 = vmatpush3.bf16.msra.mxu0 %v1097_v60 }
 0x1d5   : > { %2687 = vmatmul.mubr.msk.bf16.gmra.mrb[88].mxu1 %vm1421_vm2, %v3398_v40  ;;  %v3154_v40 = vld [vmem:[%s3284_s20 + $0x10] sm:$0xff]  }
 0x1d6   : > { %2688 = vmatprep.mubr.msk.bf16.mxu1 %vm1421_vm2, %v3392_v34 }
 0x1dd   : > { %2689 = vmatmul.mubr.msk.bf16.gmra.mrb[92].mxu1 %vm1421_vm2, %v3392_v34  ;;  %v3153_v34 = vld [vmem:[%s3284_s20 + $0x8] sm:$0xff]  }
 0x1de   : > { %2690 = vmatprep.mubr.msk.bf16.mxu1 %vm1421_vm2, %v3413_v14  ;;  %2881 = vmatmul.mubr.msk.bf16.vlgmr.msra.gmra.mrb[16].mxu0 %vm442_vm1, %v3153_v34 }
 0x1df   : > { %2884 = vmatprep.mubr.msk.bf16.mxu0 %vm442_vm1, %v3154_v40 }
 0x1e5   : > { %2691 = vmatmul.mubr.msk.bf16.gmra.mrb[96].mxu1 %vm1421_vm2, %v3413_v14  ;;  %v3156_v14 = vld [vmem:[%s3284_s20 + $0x20] sm:$0xff]  }
 0x1e6   : > { %2692 = vmatprep.mubr.msk.bf16.mxu1 %vm1421_vm2, %v3410_v10 }
 0x1ed   : > { %2693 = vmatmul.mubr.msk.bf16.gmra.mrb[100].mxu1 %vm1421_vm2, %v3410_v10  ;;  %v3155_v10 = vld [vmem:[%s3284_s20 + $0x18] sm:$0xff]  }
 0x1ee   : > { %2694 = vmatprep.mubr.msk.bf16.mxu1 %vm1421_vm2, %v3455_v3  ;;  %2885 = vmatmul.mubr.msk.bf16.gmra.mrb[20].mxu0 %vm442_vm1, %v3155_v10 }
 0x1ef   : > { %2888 = vmatprep.mubr.msk.bf16.mxu0 %vm442_vm1, %v3156_v14 }
 0x1f5   : > { %2695 = vmatmul.mubr.msk.bf16.gmra.mrb[104].mxu1 %vm1421_vm2, %v3455_v3  ;;  %v3160_v3 = vld [vmem:[%s3284_s20 + $0x58] sm:$0xff]  }
 0x1f6   : > { %2696 = vmatprep.mubr.msk.bf16.mxu1 %vm1421_vm2, %v3450_v61  ;;  %2889 = vmatmul.mubr.msk.bf16.gmra.mrb[24].mxu0 %vm442_vm1, %v3313_v17  ;;  %v3161_v17 = vld [vmem:[%s3284_s20 + $0x60] sm:$0xff]  }
 0x1f7   : > { %2892 = vmatprep.mubr.msk.bf16.mxu0 %vm442_vm1, %v3316_v18  ;;  %v3162_v18 = vld [vmem:[%s3284_s20 + $0x68] sm:$0xff]  }
 0x1fd   : > { %2697 = vmatmul.mubr.msk.bf16.gmra.mrb[108].mxu1 %vm1421_vm2, %v3450_v61  ;;  %v3159_v61 = vld [vmem:[%s3284_s20 + $0x50] sm:$0xff]  }
 0x1fe   : > { %2893 = vmatmul.mubr.msk.bf16.gmra.mrb[28].mxu0 %vm442_vm1, %v3325_v19  ;;  %v3164_v19 = vld [vmem:[%s3284_s20 + $0x78] sm:$0xff]  }
 0x1ff   : > { %2896 = vmatprep.mubr.msk.bf16.mxu0 %vm442_vm1, %v3157_v28 }
 0x206   : > { %2897 = vmatmul.mubr.msk.bf16.gmra.mrb[32].mxu0 %vm442_vm1, %v3158_v47 }
 0x207   : > { %2900 = vmatprep.mubr.msk.bf16.mxu0 %vm442_vm1, %v3159_v61 }
 0x20e   : > { %2901 = vmatmul.mubr.msk.bf16.gmra.mrb[36].mxu0 %vm442_vm1, %v3160_v3 }
 0x20f   : > { %2904 = vmatprep.mubr.msk.bf16.mxu0 %vm442_vm1, %v3161_v17 }
 0x216   : > { %2905 = vmatmul.mubr.msk.bf16.gmra.mrb[40].mxu0 %vm442_vm1, %v3162_v18 }
 0x217   : > { %2908 = vmatprep.mubr.msk.bf16.mxu0 %vm442_vm1, %v3163_v31 }
 0x21e   : > { %2909 = vmatmul.mubr.msk.bf16.gmra.mrb[44].mxu0 %vm442_vm1, %v3164_v19 }
 0x258   : > { %v3753_v35 = vpop.f32.mrb[48].mxu1 }
 0x259   : > { %v3755_v29 = vpop.f32.mrb[49].mxu1 }
 0x25a   : > { %v3757_v16 = vpop.f32.mrb[50].mxu1  ;;  %v1711_v9 = vmax.f32 %v3753_v35, %v3755_v29 }
 0x25b   : > { %v3761_v12 = vpop.f32.mrb[51].mxu1 }
 0x25c   : > { %1712 = vmax.xlane.f32.xlu0 %v1711_v9  ;;  %v1714_v8 = vmax.f32 %v3757_v16, %v3761_v12 }
 0x260   : > { %1715 = vmax.xlane.f32.xlu0 %v1714_v8  ;;  %v3765_v46 = vpop.f32.mrb[52].mxu1 }
 0x261   : > { %v3767_v27 = vpop.f32.mrb[53].mxu1 }
 0x262   : > { %v3769_v13 = vpop.f32.mrb[54].mxu1  ;;  %v1717_v4 = vmax.f32 %v3765_v46, %v3767_v27 }
 0x263   : > { %v3773_v54 = vpop.f32.mrb[55].mxu1 }
 0x264   : > { %1718 = vmax.xlane.f32.xlu1 %v1717_v4  ;;  %v1720_v50 = vmax.f32 %v3769_v13, %v3773_v54 }
 0x268   : > { %1721 = vmax.xlane.f32.xlu1 %v1720_v50  ;;  %v3777_v24 = vpop.f32.mrb[56].mxu1 }
 0x269   : > { %v3779_v63 = vpop.f32.mrb[57].mxu1 }
 0x26a   : > { %v3781_v7 = vpop.f32.mrb[58].mxu1  ;;  %v1723_v43 = vmax.f32 %v3777_v24, %v3779_v63 }
 0x26b   : > { %v3785_v20 = vpop.f32.mrb[59].mxu1 }
 0x26c   : > { %1724 = vmax.xlane.f32.xlu0 %v1723_v43  ;;  %v1726_v42 = vmax.f32 %v3781_v7, %v3785_v20 }
 0x26e   : > { %1727 = vmax.xlane.f32.xlu1 %v1726_v42 }
 0x270   : > { %v3789_v37 = vpop.f32.mrb[60].mxu1 }
 0x271   : > { %v3791_v53 = vpop.f32.mrb[61].mxu1 }
 0x272   : > { %v3793_v48 = vpop.f32.mrb[62].mxu1  ;;  %v1729_v51 = vmax.f32 %v3789_v37, %v3791_v53 }
 0x273   : > { %v3797_v6 = vpop.f32.mrb[63].mxu1 }
 0x274   : > { %1730 = vmax.xlane.f32.xlu0 %v1729_v51  ;;  %v1732_v41 = vmax.f32 %v3793_v48, %v3797_v6 }
 0x276   : > { %1733 = vmax.xlane.f32.xlu1 %v1732_v41 }
 0x278   : > { %v3801_v22 = vpop.f32.mrb[64].mxu1 }
 0x279   : > { %v3803_v33 = vpop.f32.mrb[65].mxu1 }
 0x27a   : > { %v3805_v49 = vpop.f32.mrb[66].mxu1  ;;  %v1735_v1 = vmax.f32 %v3801_v22, %v3803_v33 }
 0x27b   : > { %v3809_v45 = vpop.f32.mrb[67].mxu1 }
 0x27c   : > { %1736 = vmax.xlane.f32.xlu0 %v1735_v1  ;;  %v1738_v62 = vmax.f32 %v3805_v49, %v3809_v45 }
 0x27e   : > { %1739 = vmax.xlane.f32.xlu1 %v1738_v62 }
 0x280   : > { %v3813_v0 = vpop.f32.mrb[68].mxu1 }
 0x281   : > { %4628 = vst [vmem:[#allocation5_spill] sm:$0xff] %v3813_v0  ;;  %v3815_v57 = vpop.f32.mrb[69].mxu1 }
 0x282   : > { %4629 = vst [vmem:[#allocation6_spill] sm:$0xff] %v3815_v57  ;;  %v3817_v5 = vpop.f32.mrb[70].mxu1  ;;  %v1741_v23 = vmax.f32 %v3813_v0, %v3815_v57 }
 0x283   : > { %4630 = vst [vmem:[#allocation7_spill] sm:$0xff] %v3817_v5  ;;  %v3821_v32 = vpop.f32.mrb[71].mxu1 }
 0x284   : > { %4631 = vst [vmem:[#allocation8_spill] sm:$0xff] %v3821_v32  ;;  %1742 = vmax.xlane.f32.xlu0 %v1741_v23  ;;  %v1744_v44 = vmax.f32 %v3817_v5, %v3821_v32 }
 0x286   : > { %1745 = vmax.xlane.f32.xlu1 %v1744_v44  ;;  %v3948_v44 = vld [vmem:[%s4557_s6] ss:$0 sm:$0xff] }
 0x288   : > { %v3825_v15 = vpop.f32.mrb[72].mxu1 }
 0x289   : > { %4632 = vst [vmem:[#allocation9_spill] sm:$0xff] %v3825_v15  ;;  %v3827_v58 = vpop.f32.mrb[73].mxu1 }
 0x28a   : > { %4633 = vst [vmem:[#allocation10_spill] sm:$0xff] %v3827_v58  ;;  %v3829_v52 = vpop.f32.mrb[74].mxu1  ;;  %v1747_v11 = vmax.f32 %v3825_v15, %v3827_v58 }
 0x28b   : > { %4634 = vst [vmem:[#allocation11_spill] sm:$0xff] %v3829_v52  ;;  %v3833_v38 = vpop.f32.mrb[75].mxu1 }
 0x28c   : > { %4635 = vst [vmem:[#allocation12_spill] sm:$0xff] %v3833_v38  ;;  %1748 = vmax.xlane.f32.xlu0 %v1747_v11  ;;  %v1750_v36 = vmax.f32 %v3829_v52, %v3833_v38 }
 0x28e   : > { %1751 = vmax.xlane.f32.xlu1 %v1750_v36 }
 0x290   : > { %v3837_v59 = vpop.f32.mrb[76].mxu1 }
 0x291   : > { %4636 = vst [vmem:[#allocation13_spill] sm:$0xff] %v3837_v59  ;;  %v3839_v21 = vpop.f32.mrb[77].mxu1 }
 0x292   : > { %4637 = vst [vmem:[#allocation14_spill] sm:$0xff] %v3839_v21  ;;  %v3841_v2 = vpop.f32.mrb[78].mxu1  ;;  %v1753_v56 = vmax.f32 %v3837_v59, %v3839_v21 }
 0x293   : > { %4638 = vst [vmem:[#allocation15_spill] sm:$0xff] %v3841_v2  ;;  %v3845_v25 = vpop.f32.mrb[79].mxu1 }
 0x294   : > { %4639 = vst [vmem:[#allocation16_spill] sm:$0xff] %v3845_v25  ;;  %1754 = vmax.xlane.f32.xlu0 %v1753_v56  ;;  %v1756_v30 = vmax.f32 %v3841_v2, %v3845_v25 }
 0x296   : > { %1757 = vmax.xlane.f32.xlu1 %v1756_v30 }
 0x298   : > { %v3849_v26 = vpop.f32.mrb[80].mxu1 }
 0x299   : > { %4640 = vst [vmem:[#allocation17_spill] sm:$0xff] %v3849_v26  ;;  %v3851_v39 = vpop.f32.mrb[81].mxu1 }
 0x29a   : > { %4641 = vst [vmem:[#allocation18_spill] sm:$0xff] %v3851_v39  ;;  %v3853_v55 = vpop.f32.mrb[82].mxu1  ;;  %v1759_v60 = vmax.f32 %v3849_v26, %v3851_v39 }
 0x29b   : > { %4642 = vst [vmem:[#allocation19_spill] sm:$0xff] %v3853_v55  ;;  %v3857_v34 = vpop.f32.mrb[83].mxu1 }
 0x29c   : > { %4643 = vst [vmem:[#allocation20_spill] sm:$0xff] %v3857_v34  ;;  %1760 = vmax.xlane.f32.xlu0 %v1759_v60  ;;  %v1762_v40 = vmax.f32 %v3853_v55, %v3857_v34 }
 0x29e   : > { %1763 = vmax.xlane.f32.xlu1 %v1762_v40 }
 0x2a0   : > { %v3861_v10 = vpop.f32.mrb[84].mxu1 }
 0x2a1   : > { %4644 = vst [vmem:[#allocation21_spill] sm:$0xff] %v3861_v10  ;;  %v3863_v14 = vpop.f32.mrb[85].mxu1 }
 0x2a2   : > { %4645 = vst [vmem:[#allocation22_spill] sm:$0xff] %v3863_v14  ;;  %v3865_v28 = vpop.f32.mrb[86].mxu1  ;;  %v1765_v47 = vmax.f32 %v3861_v10, %v3863_v14 }
 0x2a3   : > { %4646 = vst [vmem:[#allocation23_spill] sm:$0xff] %v3865_v28  ;;  %v3869_v61 = vpop.f32.mrb[87].mxu1 }
 0x2a4   : > { %4647 = vst [vmem:[#allocation24_spill] sm:$0xff] %v3869_v61  ;;  %1766 = vmax.xlane.f32.xlu0 %v1765_v47  ;;  %v1768_v3 = vmax.f32 %v3865_v28, %v3869_v61 }
 0x2a6   : > { %1769 = vmax.xlane.f32.xlu1 %v1768_v3 }
 0x2a8   : > { %v3873_v17 = vpop.f32.mrb[88].mxu1 }
 0x2a9   : > { %4648 = vst [vmem:[#allocation25_spill] sm:$0xff] %v3873_v17  ;;  %v3875_v18 = vpop.f32.mrb[89].mxu1 }
 0x2aa   : > { %4649 = vst [vmem:[#allocation26_spill] sm:$0xff] %v3875_v18  ;;  %v3877_v31 = vpop.f32.mrb[90].mxu1  ;;  %v1771_v19 = vmax.f32 %v3873_v17, %v3875_v18 }
 0x2ab   : > { %4650 = vst [vmem:[#allocation27_spill] sm:$0xff] %v3877_v31  ;;  %v3881_v9 = vpop.f32.mrb[91].mxu1 }
 0x2ac   : > { %4651 = vst [vmem:[#allocation28_spill] sm:$0xff] %v3881_v9  ;;  %1772 = vmax.xlane.f32.xlu0 %v1771_v19  ;;  %v1774_v8 = vmax.f32 %v3877_v31, %v3881_v9 }
 0x2ae   : > { %1775 = vmax.xlane.f32.xlu1 %v1774_v8 }
 0x2b0   : > { %v3885_v4 = vpop.f32.mrb[92].mxu1 }
 0x2b1   : > { %4652 = vst [vmem:[#allocation29_spill] sm:$0xff] %v3885_v4  ;;  %v3887_v50 = vpop.f32.mrb[93].mxu1 }
 0x2b2   : > { %4653 = vst [vmem:[#allocation30_spill] sm:$0xff] %v3887_v50  ;;  %v3889_v43 = vpop.f32.mrb[94].mxu1  ;;  %v1777_v42 = vmax.f32 %v3885_v4, %v3887_v50 }
 0x2b3   : > { %4654 = vst [vmem:[#allocation31_spill] sm:$0xff] %v3889_v43  ;;  %v3893_v51 = vpop.f32.mrb[95].mxu1 }
 0x2b4   : > { %4655 = vst [vmem:[#allocation32_spill] sm:$0xff] %v3893_v51  ;;  %1778 = vmax.xlane.f32.xlu0 %v1777_v42  ;;  %v1780_v41 = vmax.f32 %v3889_v43, %v3893_v51 }
 0x2b6   : > { %1781 = vmax.xlane.f32.xlu1 %v1780_v41  ;;  %v2882_v41 = vpop.f32.mrb[16].mxu0 }
 0x2b7   : > { %v1142_v9 = vadd.f32 %v2882_v41, %v3948_v44  ;;  %v1133_v31 = vpop.f32.mrb[17].mxu0  ;;  %v3955_v41 = vstv %s2561_s9 }
 0x2b8   : > { %v3897_v1 = vpop.f32.mrb[96].mxu1  ;;  %v1134_v18 = vadd.f32 %v3948_v44, %v1133_v31  ;;  %v2883_v17 = vpop.f32.mrb[18].mxu0 }
 0x2b9   : > { %v3899_v62 = vpop.f32.mrb[97].mxu1  ;;  %v1294_v61 = vmin.f32 %v1142_v9, 0.0  ;;  %v1145_v3 = vadd.f32 %v2883_v17, %v3948_v44  ;;  %v1136_v28 = vpop.f32.mrb[19].mxu0  ;;  %v1262_v14 = vmax.f32 %v1142_v9, 0.0 }
 0x2ba   : > { %v3901_v23 = vpop.f32.mrb[98].mxu1  ;;  %v1292_v10 = vmin.f32 %v1134_v18, 0.0  ;;  %v1137_v4 = vadd.f32 %v3948_v44, %v1136_v28  ;;  %v1260_v55 = vmax.f32 %v1134_v18, 0.0 }
 0x2bb   : > { %v3905_v11 = vpop.f32.mrb[99].mxu1  ;;  %v1263_v39 = vmax.f32 %v1145_v3, 0.0  ;;  %v1295_v26 = vmin.f32 %v1145_v3, 0.0  ;;  %v1327_v17 = vmul.f32 %v3955_v41, %v1294_v61 }
 0x2bc   : > { %v1261_v21 = vmax.f32 %v1137_v4, 0.0  ;;  %v1293_v31 = vmin.f32 %v1137_v4, 0.0  ;;  %v1325_v9 = vmul.f32 %v3955_v41, %v1292_v10 }
 0x2bd   : > { %v1328_v28 = vmul.f32 %v3955_v41, %v1295_v26  ;;  %v3962_v15 = vadd.f32 %v1327_v17, %v1262_v14 }
 0x2be   : > { %v1326_v3 = vmul.f32 %v3955_v41, %v1293_v31  ;;  %v3964_v4 = vadd.f32 %v1325_v9, %v1260_v55 }
 0x2c0   : > { %v3909_v56 = vpop.f32.mrb[100].mxu1  ;;  %v3969_v10 = vadd.f32 %v1326_v3, %v1261_v21 }
 0x2c1   : > { %v3911_v30 = vpop.f32.mrb[101].mxu1  ;;  %v2886_v34 = vpop.f32.mrb[20].mxu0 }
 0x2c2   : > { %v3913_v60 = vpop.f32.mrb[102].mxu1  ;;  %v1158_v25 = vadd.f32 %v2886_v34, %v3948_v44  ;;  %v1149_v2 = vpop.f32.mrb[21].mxu0 }
 0x2c3   : > { %v3917_v47 = vpop.f32.mrb[103].mxu1  ;;  %v1150_v59 = vadd.f32 %v3948_v44, %v1149_v2  ;;  %v3966_v2 = vadd.f32 %v1328_v28, %v1263_v39 }
 0x2c4   : > { %v1298_v38 = vmin.f32 %v1158_v25, 0.0 }
 0x2c5   : > { %v1264_v34 = vmax.f32 %v1150_v59, 0.0  ;;  %v1296_v52 = vmin.f32 %v1150_v59, 0.0 }
 0x2c6   : > { %v1331_v26 = vmul.f32 %v3955_v41, %v1298_v38 }
 0x2c8   : > { %v3921_v19 = vpop.f32.mrb[104].mxu1 }
 0x2c9   : > { %4656 = vst [vmem:[#allocation33_spill] sm:$0xff] %v3921_v19  ;;  %v3923_v8 = vpop.f32.mrb[105].mxu1 }
 0x2ca   : > { %4657 = vst [vmem:[#allocation34_spill] sm:$0xff] %v3923_v8  ;;  %v3925_v42 = vpop.f32.mrb[106].mxu1 }
 0x2cb   : > { %4658 = vst [vmem:[#allocation35_spill] sm:$0xff] %v3925_v42  ;;  %v3929_v36 = vpop.f32.mrb[107].mxu1 }
 0x2cc   : > { %4659 = vst [vmem:[#allocation36_spill] sm:$0xff] %v3929_v36 }
 0x2d0   : > { %v3933_v40 = vpop.f32.mrb[108].mxu1 }
 0x2d1   : > { %4660 = vst [vmem:[#allocation37_spill] sm:$0xff] %v3933_v40  ;;  %v3935_v51 = vpop.f32.mrb[109].mxu1  ;;  %v1329_v40 = vmul.f32 %v3955_v41, %v1296_v52 }
 0x2d2   : > { %4661 = vst [vmem:[#allocation38_spill] sm:$0xff] %v3935_v51  ;;  %v3937_v43 = vpop.f32.mrb[110].mxu1 }
 0x2d3   : > { %4662 = vst [vmem:[#allocation39_spill] sm:$0xff] %v3937_v43  ;;  %v3941_v50 = vpop.f32.mrb[111].mxu1  ;;  %v1266_v43 = vmax.f32 %v1158_v25, 0.0  ;;  %v3981_v9 = vadd.f32 %v1329_v40, %v1264_v34 }
 0x2d4   : > { %4663 = vst [vmem:[#allocation40_spill] sm:$0xff] %v3941_v50  ;;  %v2887_v50 = vpop.f32.mrb[22].mxu0 }
 0x2d5   : > { %v1152_v18 = vpop.f32.mrb[23].mxu0  ;;  %v1161_v61 = vadd.f32 %v2887_v50, %v3948_v44  ;;  %v3979_v21 = vadd.f32 %v1331_v26, %v1266_v43 }
 0x2d6   : > { %v2890_v58 = vpop.f32.mrb[24].mxu0  ;;  %v1153_v25 = vadd.f32 %v3948_v44, %v1152_v18 }
 0x2d7   : > { %v1165_v51 = vpop.f32.mrb[25].mxu0  ;;  %v1267_v14 = vmax.f32 %v1161_v61, 0.0  ;;  %v1299_v55 = vmin.f32 %v1161_v61, 0.0  ;;  %v1174_v39 = vadd.f32 %v2890_v58, %v3948_v44  ;;  %4664 = vst [vmem:[#allocation41_spill] sm:$0xff] %v3979_v21 }
 0x2d8   : > { %v2891_v31 = vpop.f32.mrb[26].mxu0  ;;  %v1265_v38 = vmax.f32 %v1153_v25, 0.0  ;;  %v1297_v18 = vmin.f32 %v1153_v25, 0.0  ;;  %v1166_v61 = vadd.f32 %v3948_v44, %v1165_v51 }
 0x2d9   : > { %v1168_v17 = vpop.f32.mrb[27].mxu0  ;;  %v1332_v28 = vmul.f32 %v3955_v41, %v1299_v55  ;;  %v1270_v3 = vmax.f32 %v1174_v39, 0.0  ;;  %v1302_v36 = vmin.f32 %v1174_v39, 0.0  ;;  %v1177_v58 = vadd.f32 %v2891_v31, %v3948_v44 }
 0x2da   : > { %v2894_v52 = vpop.f32.mrb[28].mxu0  ;;  %v1169_v42 = vadd.f32 %v3948_v44, %v1168_v17  ;;  %v1330_v40 = vmul.f32 %v3955_v41, %v1297_v18  ;;  %v1268_v39 = vmax.f32 %v1166_v61, 0.0  ;;  %v1300_v32 = vmin.f32 %v1166_v61, 0.0 }
 0x2db   : > { %v1181_v59 = vpop.f32.mrb[29].mxu0  ;;  %v1190_v50 = vadd.f32 %v2894_v52, %v3948_v44  ;;  %v3988_v26 = vadd.f32 %v1332_v28, %v1267_v14  ;;  %v1335_v34 = vmul.f32 %v3955_v41, %v1302_v36  ;;  %v1271_v5 = vmax.f32 %v1177_v58, 0.0 }
 0x2dc   : > { %v2895_v43 = vpop.f32.mrb[30].mxu0  ;;  %v1182_v25 = vadd.f32 %v3948_v44, %v1181_v59  ;;  %v1303_v51 = vmin.f32 %v1177_v58, 0.0  ;;  %v3995_v17 = vadd.f32 %v1330_v40, %v1265_v38  ;;  %v1269_v14 = vmax.f32 %v1169_v42, 0.0 }
 0x2dd   : > { %4665 = vst [vmem:[#allocation42_spill] sm:$0xff] %v3988_v26  ;;  %v1184_v55 = vpop.f32.mrb[31].mxu0  ;;  %v3997_v52 = vadd.f32 %v1335_v34, %v1270_v3  ;;  %v1333_v28 = vmul.f32 %v3955_v41, %v1300_v32  ;;  %v1301_v36 = vmin.f32 %v1169_v42, 0.0  ;;  %v1274_v57 = vmax.f32 %v1190_v50, 0.0 }
 0x2de   : > { %v1336_v18 = vmul.f32 %v3955_v41, %v1303_v51  ;;  %v2898_v59 = vpop.f32.mrb[32].mxu0  ;;  %v1306_v58 = vmin.f32 %v1190_v50, 0.0  ;;  %v1272_v8 = vmax.f32 %v1182_v25, 0.0  ;;  %v1304_v19 = vmin.f32 %v1182_v25, 0.0 }
 0x2df   : > { %v1197_v31 = vpop.f32.mrb[33].mxu0  ;;  %v4005_v40 = vadd.f32 %v1333_v28, %v1268_v39  ;;  %v1334_v42 = vmul.f32 %v3955_v41, %v1301_v36  ;;  %v1193_v50 = vadd.f32 %v2895_v43, %v3948_v44 }
 0x2e0   : > { %v4007_v32 = vadd.f32 %v1336_v18, %v1271_v5  ;;  %v2899_v34 = vpop.f32.mrb[34].mxu0  ;;  %v1339_v51 = vmul.f32 %v3955_v41, %v1306_v58  ;;  %v1337_v21 = vmul.f32 %v3955_v41, %v1304_v19 }
 0x2e1   : > { %v1200_v61 = vpop.f32.mrb[35].mxu0  ;;  %v4016_v5 = vadd.f32 %v1334_v42, %v1269_v14  ;;  %v1275_v18 = vmax.f32 %v1193_v50, 0.0  ;;  %v1307_v36 = vmin.f32 %v1193_v50, 0.0 }
 0x2e2   : > { %v4018_v39 = vadd.f32 %v1339_v51, %v1274_v57  ;;  %v4020_v28 = vadd.f32 %v1337_v21, %v1272_v8  ;;  %v1206_v8 = vadd.f32 %v2898_v59, %v3948_v44  ;;  %v2902_v21 = vpop.f32.mrb[36].mxu0 }
 0x2e3   : > { %v1340_v57 = vmul.f32 %v3955_v41, %v1307_v36  ;;  %v1213_v50 = vpop.f32.mrb[37].mxu0 }
 0x2e4   : > { %4666 = vst [vmem:[#allocation43_spill] sm:$0xff] %v4018_v39  ;;  %v1310_v36 = vmin.f32 %v1206_v8, 0.0 }
 0x2e9   : > { %v1713_v0 = vpop.xlane.xlu0 %1712 }
 0x2ea   : > { %v1807_v38 = vsub.f32 %v3753_v35, %v1713_v0  ;;  %v1808_v3 = vsub.f32 %v3755_v29, %v1713_v0  ;;  %v1185_v29 = vadd.f32 %v3948_v44, %v1184_v55 }
 0x2ec   : > { %v1871_v25 = vmul.f32 1.442695, %v1807_v38  ;;  %v1873_v26 = vmul.f32 1.442695, %v1808_v3  ;;  %v1273_v38 = vmax.f32 %v1185_v29, 0.0  ;;  %v1305_v55 = vmin.f32 %v1185_v29, 0.0 }
 0x2ed   : > { %v1716_v0 = vpop.xlane.xlu0 %1715 }
 0x2ee   : > { %2961 = vpow2.f32 %v1871_v25  ;;  %v1809_v19 = vsub.f32 %v3757_v16, %v1716_v0  ;;  %v1810_v43 = vsub.f32 %v3761_v12, %v1716_v0  ;;  %v1338_v51 = vmul.f32 %v3955_v41, %v1305_v55 }
 0x2ef   : > { %2963 = vpow2.f32 %v1873_v26  ;;  %v1198_v16 = vadd.f32 %v3948_v44, %v1197_v31  ;;  %v1209_v12 = vadd.f32 %v2899_v34, %v3948_v44  ;;  %v1201_v26 = vadd.f32 %v3948_v44, %v1200_v61 }
 0x2f0   : > { %v1875_v3 = vmul.f32 1.442695, %v1809_v19  ;;  %v1877_v14 = vmul.f32 1.442695, %v1810_v43  ;;  %v4034_v0 = vadd.f32 %v1340_v57, %v1275_v18  ;;  %v2903_v19 = vpop.f32.mrb[38].mxu0  ;;  %v4036_v59 = vadd.f32 %v1338_v51, %v1273_v38 }
 0x2f1   : > { %v1719_v42 = vpop.xlane.xlu1 %1718  ;;  %v1278_v43 = vmax.f32 %v1206_v8, 0.0  ;;  %v4038_v55 = vpop.f32.mrb[39].mxu0  ;;  %v1308_v18 = vmin.f32 %v1198_v16, 0.0  ;;  %v1311_v8 = vmin.f32 %v1209_v12, 0.0 }
 0x2f2   : > { %2965 = vpow2.f32 %v1875_v3  ;;  %v1811_v25 = vsub.f32 %v3765_v46, %v1719_v42  ;;  %v1812_v29 = vsub.f32 %v3767_v27, %v1719_v42  ;;  %v1276_v3 = vmax.f32 %v1198_v16, 0.0  ;;  %v2906_v58 = vpop.f32.mrb[40].mxu0 }
 0x2f3   : > { %2967 = vpow2.f32 %v1877_v14  ;;  %v1343_v27 = vmul.f32 %v3955_v41, %v1310_v36  ;;  %v1279_v14 = vmax.f32 %v1209_v12, 0.0  ;;  %v1341_v51 = vmul.f32 %v3955_v41, %v1308_v18 }
 0x2f4   : > { %v1879_v31 = vmul.f32 1.442695, %v1811_v25  ;;  %v1881_v34 = vmul.f32 1.442695, %v1812_v29  ;;  %v1277_v25 = vmax.f32 %v1201_v26, 0.0  ;;  %v1344_v36 = vmul.f32 %v3955_v41, %v1311_v8 }
 0x2f5   : > { %v1722_v35 = vpop.xlane.xlu1 %1721  ;;  %v4047_v42 = vadd.f32 %v1343_v27, %v1278_v43  ;;  %v1309_v16 = vmin.f32 %v1201_v26, 0.0  ;;  %v1373_v39 = vadd.f32 %v1341_v51, %v1276_v3  ;;  %v4058_v12 = vadd.f32 %v2903_v19, %v3948_v44  ;;  %v4060_v43 = vpop.f32.mrb[41].mxu0 }
 0x2f6   : > { %2969 = vpow2.f32 %v1879_v31  ;;  %v1813_v38 = vsub.f32 %v3769_v13, %v1722_v35  ;;  %v1814_v57 = vsub.f32 %v3773_v54, %v1722_v35  ;;  %v1222_v54 = vadd.f32 %v2902_v21, %v3948_v44  ;;  %v4066_v18 = vpop.f32.mrb[42].mxu0 }
 0x2f7   : > { %2971 = vpow2.f32 %v1881_v34  ;;  %v1214_v35 = vadd.f32 %v3948_v44, %v1213_v50  ;;  %v4068_v21 = vadd.f32 %v1344_v36, %v1279_v14  ;;  %v1342_v50 = vmul.f32 %v3955_v41, %v1309_v16 }
 0x2f8   : > { %v4050_v29 = vpop.eup %2961  ;;  %v1883_v61 = vmul.f32 1.442695, %v1813_v38  ;;  %v1885_v46 = vmul.f32 1.442695, %v1814_v57  ;;  %v1282_v19 = vmax.f32 %v1222_v54, 0.0  ;;  %v4071_v38 = vpop.f32.mrb[43].mxu0 }
 0x2f9   : > { %4667 = vst [vmem:[#allocation44_spill] sm:$0xff] %v4050_v29  ;;  %v4053_v31 = vpop.eup %2963  ;;  %v1725_v13 = vpop.xlane.xlu0 %1724  ;;  %v1280_v14 = vmax.f32 %v1214_v35, 0.0  ;;  %v1312_v36 = vmin.f32 %v1214_v35, 0.0  ;;  %v1217_v35 = vadd.f32 %v3948_v44, %v4038_v55 }
 0x2fa   : > { %4668 = vst [vmem:[#allocation45_spill] sm:$0xff] %v4053_v31  ;;  %2973 = vpow2.f32 %v1883_v61  ;;  %v1815_v34 = vsub.f32 %v3777_v24, %v1725_v13  ;;  %v1816_v27 = vsub.f32 %v3779_v63, %v1725_v13  ;;  %v1999_v26 = vadd.f32 %v4053_v31, %v4050_v29 }
 0x2fb   : > { %2975 = vpow2.f32 %v1885_v46  ;;  %v1728_v3 = vpop.xlane.xlu1 %1727  ;;  %v1374_v46 = vadd.f32 %v1342_v50, %v1277_v25  ;;  %v1314_v13 = vmin.f32 %v1222_v54, 0.0  ;;  %v4669_v25 = vmax.f32 %v3897_v1, %v3899_v62 }
 0x2fc   : > { %v4073_v57 = vpop.eup %2965  ;;  %v1887_v61 = vmul.f32 1.442695, %v1815_v34  ;;  %v1889_v24 = vmul.f32 1.442695, %v1816_v27  ;;  %v1817_v63 = vsub.f32 %v3781_v7, %v1728_v3  ;;  %v1818_v8 = vsub.f32 %v3785_v20, %v1728_v3  ;;  %2000 = vadd.xlane.f32.xlu0 %v1999_v26  ;;  %v2910_v3 = vpop.f32.mrb[44].mxu0 }
 0x2fd   : > { %v4077_v51 = vpop.eup %2967  ;;  %v1347_v34 = vmul.f32 %v3955_v41, %v1314_v13  ;;  %v1345_v7 = vmul.f32 %v3955_v41, %v1312_v36  ;;  %v1283_v20 = vmax.f32 %v4058_v12, 0.0  ;;  %v1315_v54 = vmin.f32 %v4058_v12, 0.0 }
 0x2fe   : > { %2977 = vpow2.f32 %v1887_v61  ;;  %v1891_v16 = vmul.f32 1.442695, %v1817_v63  ;;  %v1893_v31 = vmul.f32 1.442695, %v1818_v8  ;;  %v2002_v29 = vadd.f32 %v4077_v51, %v4073_v57  ;;  %v4099_v8 = vpop.f32.mrb[45].mxu0 }
 0x2ff   : > { %2979 = vpow2.f32 %v1889_v24  ;;  %v2231_v26 = vpack.c.bf16 %v1374_v46, %v1373_v39  ;;  %v4094_v24 = vadd.f32 %v1347_v34, %v1282_v19  ;;  %v4096_v63 = vadd.f32 %v1345_v7, %v1280_v14 }
 0x300   : > { %v4084_v27 = vpop.eup %2969  ;;  %2981 = vpow2.f32 %v1891_v16  ;;  %2003 = vadd.xlane.f32.xlu1 %v2002_v29  ;;  %1784 = vmax.xlane.f32.xlu0 %v4669_v25  ;;  %v1238_v29 = vadd.f32 %v2906_v58, %v3948_v44  ;;  %v1348_v55 = vmul.f32 %v3955_v41, %v1315_v54  ;;  %v1281_v46 = vmax.f32 %v1217_v35, 0.0 }
 0x301   : > { %v4092_v50 = vpop.eup %2971  ;;  %2983 = vpow2.f32 %v1893_v31  ;;  %v1731_v61 = vpop.xlane.xlu0 %1730  ;;  %2698 = vmatprep.subr.bf16.mxu0 %v2231_v26  ;;  %v1313_v14 = vmin.f32 %v1217_v35, 0.0  ;;  %v4670_v58 = vpack.c.bf16 %v3969_v10, %v3964_v4  ;;  %v4671_v35 = vmax.f32 %v3901_v23, %v3905_v11 }
 0x302   : > { %v1819_v13 = vsub.f32 %v3789_v37, %v1731_v61  ;;  %v1820_v12 = vsub.f32 %v3791_v53, %v1731_v61  ;;  %v2005_v39 = vadd.f32 %v4092_v50, %v4084_v27  ;;  %v4106_v31 = vpop.f32.mrb[46].mxu0  ;;  %v1286_v36 = vmax.f32 %v1238_v29, 0.0 }
 0x303   : > { %v1734_v19 = vpop.xlane.xlu1 %1733  ;;  %2699 = vmatpush3.bf16.msra.mxu0 %v4670_v58  ;;  %v1318_v16 = vmin.f32 %v1238_v29, 0.0  ;;  %v4111_v37 = vpop.f32.mrb[47].mxu0  ;;  %v4122_v4 = vadd.f32 %v1348_v55, %v1283_v20  ;;  %v1346_v10 = vmul.f32 %v3955_v41, %v1313_v14  ;;  %v1230_v29 = vadd.f32 %v3948_v44, %v4060_v43 }
 0x304   : > { %v4113_v53 = vpop.eup %2973  ;;  %v1895_v34 = vmul.f32 1.442695, %v1819_v13  ;;  %v1897_v7 = vmul.f32 1.442695, %v1820_v12  ;;  %v1821_v25 = vsub.f32 %v3793_v48, %v1734_v19  ;;  %v1822_v54 = vsub.f32 %v3797_v6, %v1734_v19  ;;  %2006 = vadd.xlane.f32.xlu0 %v2005_v39  ;;  %1787 = vmax.xlane.f32.xlu1 %v4671_v35 }
 0x305   : > { %v4120_v26 = vpop.eup %2975  ;;  %v1351_v61 = vmul.f32 %v3955_v41, %v1318_v16  ;;  %v1378_v12 = vadd.f32 %v1346_v10, %v1281_v46  ;;  %v1284_v19 = vmax.f32 %v1230_v29, 0.0  ;;  %v4672_v55 = vmax.f32 %v3909_v56, %v3911_v30 }
 0x306   : > { %2985 = vpow2.f32 %v1895_v34  ;;  %v1899_v48 = vmul.f32 1.442695, %v1821_v25  ;;  %v1901_v13 = vmul.f32 1.442695, %v1822_v54  ;;  %v2008_v6 = vadd.f32 %v4120_v26, %v4113_v53 }
 0x307   : > { %2987 = vpow2.f32 %v1897_v7  ;;  %v4130_v39 = vadd.f32 %v1351_v61, %v1286_v36  ;;  %v1316_v43 = vmin.f32 %v1230_v29, 0.0  ;;  %v1241_v14 = vadd.f32 %v4066_v18, %v3948_v44 }
 0x308   : > { %v4132_v20 = vpop.eup %2977  ;;  %2989 = vpow2.f32 %v1899_v48  ;;  %2009 = vadd.xlane.f32.xlu1 %v2008_v6  ;;  %1790 = vmax.xlane.f32.xlu0 %v4672_v55  ;;  %v2232_v58 = vpack.c.bf16 %v4068_v21, %v4047_v42  ;;  %v1233_v36 = vadd.f32 %v3948_v44, %v4071_v38  ;;  %v2233_v34 = vpack.c.bf16 %v1378_v12, %v4096_v63 }
 0x309   : > { %v4141_v16 = vpop.eup %2979  ;;  %2991 = vpow2.f32 %v1901_v13  ;;  %v1737_v46 = vpop.xlane.xlu0 %1736  ;;  %v1254_v7 = vadd.f32 %v2910_v3, %v3948_v44  ;;  %v1349_v21 = vmul.f32 %v3955_v41, %v1316_v43  ;;  %v1287_v38 = vmax.f32 %v1241_v14, 0.0 }
 0x30a   : > { %v4147_v25 = vpop.eup %2981  ;;  %v1823_v54 = vsub.f32 %v3801_v22, %v1737_v46  ;;  %v1824_v18 = vsub.f32 %v3803_v33, %v1737_v46  ;;  %v2011_v42 = vadd.f32 %v4141_v16, %v4132_v20  ;;  %2700 = vmatprep.subr.bf16.mxu0 %v2232_v58  ;;  %v1319_v61 = vmin.f32 %v1241_v14, 0.0 }
 0x30b   : > { %v4154_v35 = vpop.eup %2983  ;;  %v1740_v10 = vpop.xlane.xlu1 %1739  ;;  %v1285_v63 = vmax.f32 %v1233_v36, 0.0  ;;  %v1317_v29 = vmin.f32 %v1233_v36, 0.0  ;;  %v4673_v3 = vpack.c.bf16 %v3966_v2, %v3962_v15  ;;  %v4674_v6 = vmax.f32 %v3913_v60, %v3917_v47 }
 0x30c   : > { %v1903_v22 = vmul.f32 1.442695, %v1823_v54  ;;  %v1905_v48 = vmul.f32 1.442695, %v1824_v18  ;;  %v1825_v33 = vsub.f32 %v3805_v49, %v1740_v10  ;;  %v1826_v13 = vsub.f32 %v3809_v45, %v1740_v10  ;;  %2012 = vadd.xlane.f32.xlu0 %v2011_v42  ;;  %v4677_v18 = vld [vmem:[#allocation34_spill] sm:$0xff] }
 0x30d   : > { %2701 = vmatpush3.bf16.msra.mxu0 %v4673_v3  ;;  %1793 = vmax.xlane.f32.xlu1 %v4674_v6  ;;  %v2014_v12 = vadd.f32 %v4154_v35, %v4147_v25  ;;  %v1381_v55 = vadd.f32 %v1349_v21, %v1284_v19  ;;  %v1352_v43 = vmul.f32 %v3955_v41, %v1319_v61  ;;  %v1290_v49 = vmax.f32 %v1254_v7, 0.0  ;;  %v4676_v19 = vld [vmem:[#allocation33_spill] sm:$0xff]  ;;  %v4680_v3 = vld [vmem:[#allocation6_spill] sm:$0xff] }
 0x30e   : > { %v1350_v15 = vmul.f32 %v3955_v41, %v1317_v29  ;;  %2702 = vmatprep.subr.bf16.mxu0 %v2233_v34  ;;  %2993 = vpow2.f32 %v1903_v22  ;;  %v1907_v2 = vmul.f32 1.442695, %v1825_v33  ;;  %v1909_v14 = vmul.f32 1.442695, %v1826_v13  ;;  %v4679_v29 = vld [vmem:[#allocation5_spill] sm:$0xff] }
 0x30f   : > { %2995 = vpow2.f32 %v1905_v48  ;;  %v1384_v45 = vadd.f32 %v1352_v43, %v1287_v38  ;;  %v4675_v46 = vpack.c.bf16 %v3995_v17, %v3981_v9  ;;  %v1322_v36 = vmin.f32 %v1254_v7, 0.0 }
 0x310   : > { %v1382_v58 = vadd.f32 %v1350_v15, %v1285_v63  ;;  %v4171_v54 = vpop.eup %2985  ;;  %2997 = vpow2.f32 %v1907_v2  ;;  %v4678_v42 = vmax.f32 %v4676_v19, %v4677_v18  ;;  %v1246_v34 = vadd.f32 %v3948_v44, %v4099_v8  ;;  %v4684_v2 = vld [vmem:[#allocation7_spill] sm:$0xff] }
 0x311   : > { %2703 = vmatpush3.bf16.msra.mxu0 %v4675_v46  ;;  %2015 = vadd.xlane.f32.xlu1 %v2014_v12  ;;  %v1257_v21 = vadd.f32 %v4106_v31, %v3948_v44  ;;  %v2234_v10 = vpack.c.bf16 %v4122_v4, %v4094_v24  ;;  %v4182_v9 = vpop.eup %2987  ;;  %2999 = vpow2.f32 %v1909_v14  ;;  %v1743_v17 = vpop.xlane.xlu0 %1742  ;;  %v1355_v7 = vmul.f32 %v3955_v41, %v1322_v36  ;;  %v4682_v12 = vld [vmem:[#allocation41_spill] sm:$0xff]  ;;  %v4686_v36 = vld [vmem:[#allocation35_spill] sm:$0xff] }
 0x312   : > { %1796 = vmax.xlane.f32.xlu0 %v4678_v42  ;;  %v1249_v38 = vadd.f32 %v3948_v44, %v4111_v37  ;;  %v2235_v61 = vpack.c.bf16 %v1382_v58, %v1381_v55  ;;  %v4187_v63 = vpop.eup %2989  ;;  %v1827_v8 = vsub.f32 %v4679_v29, %v1743_v17  ;;  %v1828_v22 = vsub.f32 %v4680_v3, %v1743_v17  ;;  %v4681_v37 = vld [vmem:[#allocation42_spill] sm:$0xff]  ;;  %v4685_v58 = vld [vmem:[#allocation8_spill] sm:$0xff] }
 0x313   : > { %v2017_v31 = vadd.f32 %v4182_v9, %v4171_v54  ;;  %v1288_v24 = vmax.f32 %v1246_v34, 0.0  ;;  %2704 = vmatprep.subr.bf16.mxu0 %v2234_v10  ;;  %v4193_v4 = vpop.eup %2991  ;;  %v1746_v48 = vpop.xlane.xlu1 %1745  ;;  %v4195_v33 = vadd.f32 %v1355_v7, %v1290_v49  ;;  %v1320_v13 = vmin.f32 %v1246_v34, 0.0  ;;  %v4687_v42 = vld [vmem:[#allocation36_spill] sm:$0xff] }
 0x314   : > { %v1291_v6 = vmax.f32 %v1257_v21, 0.0  ;;  %v1323_v44 = vmin.f32 %v1257_v21, 0.0  ;;  %v4683_v55 = vpack.c.bf16 %v4681_v37, %v4682_v12  ;;  %v1911_v43 = vmul.f32 1.442695, %v1827_v8 }
 0x315   : > { %v1913_v15 = vmul.f32 1.442695, %v1828_v22  ;;  %v1829_v14 = vsub.f32 %v4684_v2, %v1746_v48  ;;  %v1830_v46 = vsub.f32 %v4685_v58, %v1746_v48  ;;  %v4688_v10 = vmax.f32 %v4686_v36, %v4687_v42 }
 0x316   : > { %2705 = vmatpush3.bf16.msra.mxu0 %v4683_v55  ;;  %2018 = vadd.xlane.f32.xlu0 %v2017_v31  ;;  %v2020_v49 = vadd.f32 %v4193_v4, %v4187_v63  ;;  %v1353_v34 = vmul.f32 %v3955_v41, %v1320_v13  ;;  %v1356_v21 = vmul.f32 %v3955_v41, %v1323_v44  ;;  %v1289_v17 = vmax.f32 %v1249_v38, 0.0  ;;  %v4690_v13 = vld [vmem:[#allocation37_spill] sm:$0xff]  ;;  %v4691_v44 = vld [vmem:[#allocation38_spill] sm:$0xff] }
 0x317   : > { %1799 = vmax.xlane.f32.xlu1 %v4688_v10  ;;  %2706 = vmatprep.subr.bf16.mxu0 %v2235_v61  ;;  %3001 = vpow2.f32 %v1911_v43  ;;  %v1915_v7 = vmul.f32 1.442695, %v1829_v14  ;;  %v1917_v29 = vmul.f32 1.442695, %v1830_v46  ;;  %v1321_v8 = vmin.f32 %v1249_v38, 0.0  ;;  %v4694_v55 = vld [vmem:[#allocation10_spill] sm:$0xff] }
 0x318   : > { %3003 = vpow2.f32 %v1913_v15  ;;  %v1388_v3 = vadd.f32 %v1356_v21, %v1291_v6  ;;  %v4689_v22 = vpack.c.bf16 %v4016_v5, %v4005_v40  ;;  %v2236_v31 = vpack.c.bf16 %v1384_v45, %v4130_v39  ;;  %v4213_v48 = vpop.eup %2993  ;;  %v4693_v39 = vld [vmem:[#allocation9_spill] sm:$0xff]  ;;  %v4698_v21 = vld [vmem:[#allocation39_spill] sm:$0xff] }
 0x319   : > { %3005 = vpow2.f32 %v1915_v7  ;;  %v4692_v37 = vmax.f32 %v4690_v13, %v4691_v44  ;;  %v1354_v61 = vmul.f32 %v3955_v41, %v1321_v8  ;;  %v4219_v12 = vpop.eup %2995  ;;  %v1749_v38 = vpop.xlane.xlu0 %1748  ;;  %v1385_v6 = vadd.f32 %v1353_v34, %v1288_v24  ;;  %v4699_v7 = vld [vmem:[#allocation40_spill] sm:$0xff] }
 0x31a   : > { %2707 = vmatpush3.bf16.msra.mxu0 %v4689_v22  ;;  %3007 = vpow2.f32 %v1917_v29  ;;  %v2238_v40 = vpack.c.bf16 %v1388_v3, %v4195_v33  ;;  %v4222_v5 = vpop.eup %2997  ;;  %v1831_v45 = vsub.f32 %v4693_v39, %v1749_v38  ;;  %v1832_v43 = vsub.f32 %v4694_v55, %v1749_v38  ;;  %v4696_v33 = vld [vmem:[#allocation11_spill] sm:$0xff]  ;;  %v4702_v38 = vld [vmem:[#allocation13_spill] sm:$0xff]  ;;  %v4703_v39 = vld [vmem:[#allocation14_spill] sm:$0xff] }
 0x31b   : > { %2021 = vadd.xlane.f32.xlu1 %v2020_v49  ;;  %1802 = vmax.xlane.f32.xlu0 %v4692_v37  ;;  %v2023_v15 = vadd.f32 %v4219_v12, %v4213_v48  ;;  %v1386_v2 = vadd.f32 %v1354_v61, %v1289_v17  ;;  %v4228_v14 = vpop.eup %2999  ;;  %v1752_v41 = vpop.xlane.xlu1 %1751  ;;  %v4695_v58 = vpack.c.bf16 %v4007_v32, %v3997_v52  ;;  %v4697_v49 = vld [vmem:[#allocation12_spill] sm:$0xff] }
 0x31c   : > { %2708 = vmatprep.subr.bf16.mxu0 %v2236_v31  ;;  %v1919_v24 = vmul.f32 1.442695, %v1831_v45  ;;  %v1921_v46 = vmul.f32 1.442695, %v1832_v43  ;;  %v1833_v10 = vsub.f32 %v4696_v33, %v1752_v41  ;;  %v1834_v34 = vsub.f32 %v4697_v49, %v1752_v41 }
 0x31d   : > { %v4700_v29 = vmax.f32 %v4698_v21, %v4699_v7  ;;  %v2237_v8 = vpack.c.bf16 %v1386_v2, %v1385_v6  ;;  %v2026_v22 = vadd.f32 %v4228_v14, %v4222_v5  ;;  %v4701_v32 = vpack.c.bf16 %v4036_v59, %v4020_v28  ;;  %v4704_v59 = vld [vmem:[#allocation15_spill] sm:$0xff] }
 0x31e   : > { %2709 = vmatpush3.bf16.msra.mxu0 %v4695_v58  ;;  %3009 = vpow2.f32 %v1919_v24  ;;  %v1923_v17 = vmul.f32 1.442695, %v1833_v10  ;;  %v1925_v3 = vmul.f32 1.442695, %v1834_v34  ;;  %v4705_v58 = vld [vmem:[#allocation16_spill] sm:$0xff] }
 0x31f   : > { %2024 = vadd.xlane.f32.xlu0 %v2023_v15  ;;  %1805 = vmax.xlane.f32.xlu1 %v4700_v29  ;;  %3011 = vpow2.f32 %v1921_v46 }
 0x320   : > { %2710 = vmatprep.subr.bf16.mxu0 %v2237_v8  ;;  %3013 = vpow2.f32 %v1923_v17 }
 0x321   : > { %v4240_v52 = vpop.eup %3001  ;;  %3015 = vpow2.f32 %v1925_v3  ;;  %v1755_v37 = vpop.xlane.xlu0 %1754  ;;  %v4708_v3 = vld [vmem:[#allocation17_spill] sm:$0xff] }
 0x322   : > { %2711 = vmatpush3.bf16.msra.mxu0 %v4701_v32  ;;  %v4245_v31 = vpop.eup %3003  ;;  %v1835_v6 = vsub.f32 %v4702_v38, %v1755_v37  ;;  %v1836_v45 = vsub.f32 %v4703_v39, %v1755_v37 }
 0x323   : > { %2027 = vadd.xlane.f32.xlu1 %v2026_v22  ;;  %2712 = vmatprep.subr.bf16.mxu0 %v2238_v40  ;;  %v4247_v61 = vpop.eup %3005  ;;  %v2029_v55 = vadd.f32 %v4245_v31, %v4240_v52  ;;  %v1758_v15 = vpop.xlane.xlu1 %1757  ;;  %v4706_v40 = vld [vmem:[#allocation43_spill] sm:$0xff]  ;;  %v4709_v22 = vld [vmem:[#allocation18_spill] sm:$0xff] }
 0x324   : > { %v4253_v43 = vpop.eup %3007  ;;  %v1927_v2 = vmul.f32 1.442695, %v1835_v6  ;;  %v1929_v28 = vmul.f32 1.442695, %v1836_v45  ;;  %v1837_v41 = vsub.f32 %v4704_v59, %v1758_v15  ;;  %v1838_v24 = vsub.f32 %v4705_v58, %v1758_v15 }
 0x325   : > { %2030 = vadd.xlane.f32.xlu0 %v2029_v55  ;;  %v4707_v46 = vpack.c.bf16 %v4034_v0, %v4706_v40  ;;  %v2032_v33 = vadd.f32 %v4253_v43, %v4247_v61  ;;  %v4710_v55 = vld [vmem:[#allocation19_spill] sm:$0xff] }
 0x326   : > { %3017 = vpow2.f32 %v1927_v2  ;;  %v1931_v10 = vmul.f32 1.442695, %v1837_v41  ;;  %v1933_v49 = vmul.f32 1.442695, %v1838_v24  ;;  %v4711_v2 = vld [vmem:[#allocation20_spill] sm:$0xff] }
 0x327   : > { %2713 = vmatpush3.bf16.msra.mxu0 %v4707_v46  ;;  %3019 = vpow2.f32 %v1929_v28  ;;  %2033 = vadd.xlane.f32.xlu1 %v2032_v33 }
 0x328   : > { %v4262_v34 = vpop.eup %3009  ;;  %3021 = vpow2.f32 %v1931_v10  ;;  %v4713_v10 = vld [vmem:[#allocation21_spill] sm:$0xff] }
 0x329   : > { %v4264_v29 = vpop.eup %3011  ;;  %3023 = vpow2.f32 %v1933_v49  ;;  %v1761_v8 = vpop.xlane.xlu0 %1760 }
 0x32a   : > { %v4266_v17 = vpop.eup %3013  ;;  %v1839_v0 = vsub.f32 %v4708_v3, %v1761_v8  ;;  %v1840_v32 = vsub.f32 %v4709_v22, %v1761_v8  ;;  %v2035_v37 = vadd.f32 %v4264_v29, %v4262_v34  ;;  %v4714_v8 = vld [vmem:[#allocation22_spill] sm:$0xff] }
 0x32b   : > { %v4272_v38 = vpop.eup %3015  ;;  %v1764_v6 = vpop.xlane.xlu1 %1763 }
 0x32c   : > { %v1935_v39 = vmul.f32 1.442695, %v1839_v0  ;;  %v1937_v45 = vmul.f32 1.442695, %v1840_v32  ;;  %v1841_v15 = vsub.f32 %v4710_v55, %v1764_v6  ;;  %v1842_v28 = vsub.f32 %v4711_v2, %v1764_v6  ;;  %2036 = vadd.xlane.f32.xlu0 %v2035_v37  ;;  %v4716_v55 = vld [vmem:[#allocation24_spill] sm:$0xff] }
 0x32d   : > { %v2038_v59 = vadd.f32 %v4272_v38, %v4266_v17 }
 0x32e   : > { %3025 = vpow2.f32 %v1935_v39  ;;  %v1939_v41 = vmul.f32 1.442695, %v1841_v15  ;;  %v1941_v58 = vmul.f32 1.442695, %v1842_v28  ;;  %v4715_v39 = vld [vmem:[#allocation23_spill] sm:$0xff] }
 0x32f   : > { %3027 = vpow2.f32 %v1937_v45  ;;  %2039 = vadd.xlane.f32.xlu1 %v2038_v59 }
 0x330   : > { %v4278_v24 = vpop.eup %3017  ;;  %3029 = vpow2.f32 %v1939_v41 }
 0x331   : > { %4712 = vst [vmem:[#allocation33_spill] sm:$0xff] %v4278_v24  ;;  %v4280_v40 = vpop.eup %3019  ;;  %3031 = vpow2.f32 %v1941_v58  ;;  %v1767_v46 = vpop.xlane.xlu0 %1766 }
 0x332   : > { %v4282_v33 = vpop.eup %3021  ;;  %v1843_v49 = vsub.f32 %v4713_v10, %v1767_v46  ;;  %v1844_v3 = vsub.f32 %v4714_v8, %v1767_v46  ;;  %v2041_v0 = vadd.f32 %v4280_v40, %v4278_v24 }
 0x333   : > { %v4288_v22 = vpop.eup %3023  ;;  %v1770_v32 = vpop.xlane.xlu1 %1769 }
 0x334   : > { %v1943_v37 = vmul.f32 1.442695, %v1843_v49  ;;  %v1945_v6 = vmul.f32 1.442695, %v1844_v3  ;;  %v1845_v45 = vsub.f32 %v4715_v39, %v1770_v32  ;;  %v1846_v15 = vsub.f32 %v4716_v55, %v1770_v32  ;;  %2042 = vadd.xlane.f32.xlu0 %v2041_v0  ;;  %v4720_v49 = vld [vmem:[#allocation25_spill] sm:$0xff]  ;;  %v4721_v3 = vld [vmem:[#allocation26_spill] sm:$0xff] }
 0x335   : > { %v2044_v2 = vadd.f32 %v4288_v22, %v4282_v33  ;;  %v4723_v55 = vld [vmem:[#allocation27_spill] sm:$0xff] }
 0x336   : > { %3033 = vpow2.f32 %v1943_v37  ;;  %v1947_v28 = vmul.f32 1.442695, %v1845_v45  ;;  %v1949_v59 = vmul.f32 1.442695, %v1846_v15 }
 0x337   : > { %3035 = vpow2.f32 %v1945_v6  ;;  %2045 = vadd.xlane.f32.xlu1 %v2044_v2  ;;  %v4724_v2 = vld [vmem:[#allocation28_spill] sm:$0xff] }
 0x338   : > { %v4294_v41 = vpop.eup %3025  ;;  %3037 = vpow2.f32 %v1947_v28 }
 0x339   : > { %4717 = vst [vmem:[#allocation34_spill] sm:$0xff] %v4294_v41  ;;  %v4296_v58 = vpop.eup %3027  ;;  %3039 = vpow2.f32 %v1949_v59  ;;  %v1773_v46 = vpop.xlane.xlu0 %1772 }
 0x33a   : > { %4718 = vst [vmem:[#allocation5_spill] sm:$0xff] %v4296_v58  ;;  %v4298_v10 = vpop.eup %3029  ;;  %v1847_v8 = vsub.f32 %v4720_v49, %v1773_v46  ;;  %v1848_v0 = vsub.f32 %v4721_v3, %v1773_v46  ;;  %v2047_v32 = vadd.f32 %v4296_v58, %v4294_v41  ;;  %v4727_v41 = vld [vmem:[#allocation31_spill] sm:$0xff] }
 0x33b   : > { %4719 = vst [vmem:[#allocation6_spill] sm:$0xff] %v4298_v10  ;;  %v4304_v37 = vpop.eup %3031  ;;  %v1776_v6 = vpop.xlane.xlu1 %1775 }
 0x33c   : > { %4722 = vst [vmem:[#allocation42_spill] sm:$0xff] %v4304_v37  ;;  %v1951_v39 = vmul.f32 1.442695, %v1847_v8  ;;  %v1953_v45 = vmul.f32 1.442695, %v1848_v0  ;;  %v1849_v15 = vsub.f32 %v4723_v55, %v1776_v6  ;;  %v1850_v28 = vsub.f32 %v4724_v2, %v1776_v6  ;;  %2048 = vadd.xlane.f32.xlu0 %v2047_v32  ;;  %v4725_v55 = vld [vmem:[#allocation29_spill] sm:$0xff] }
 0x33d   : > { %v2050_v59 = vadd.f32 %v4304_v37, %v4298_v10  ;;  %v4726_v32 = vld [vmem:[#allocation30_spill] sm:$0xff]  ;;  %v4728_v10 = vld [vmem:[#allocation32_spill] sm:$0xff] }
 0x33e   : > { %3041 = vpow2.f32 %v1951_v39  ;;  %v1955_v49 = vmul.f32 1.442695, %v1849_v15  ;;  %v1957_v24 = vmul.f32 1.442695, %v1850_v28 }
 0x33f   : > { %3043 = vpow2.f32 %v1953_v45  ;;  %2051 = vadd.xlane.f32.xlu1 %v2050_v59 }
 0x340   : > { %v4310_v46 = vpop.eup %3033  ;;  %3045 = vpow2.f32 %v1955_v49 }
 0x341   : > { %v4312_v3 = vpop.eup %3035  ;;  %3047 = vpow2.f32 %v1957_v24  ;;  %v1779_v8 = vpop.xlane.xlu0 %1778 }
 0x342   : > { %v4314_v0 = vpop.eup %3037  ;;  %v1851_v6 = vsub.f32 %v4725_v55, %v1779_v8  ;;  %v1852_v2 = vsub.f32 %v4726_v32, %v1779_v8  ;;  %v2053_v39 = vadd.f32 %v4312_v3, %v4310_v46 }
 0x343   : > { %v4320_v15 = vpop.eup %3039  ;;  %v1782_v45 = vpop.xlane.xlu1 %1781 }
 0x344   : > { %v1959_v28 = vmul.f32 1.442695, %v1851_v6  ;;  %v1961_v59 = vmul.f32 1.442695, %v1852_v2  ;;  %v1853_v49 = vsub.f32 %v4727_v41, %v1782_v45  ;;  %v1854_v37 = vsub.f32 %v4728_v10, %v1782_v45  ;;  %2054 = vadd.xlane.f32.xlu0 %v2053_v39 }
 0x345   : > { %v2056_v24 = vadd.f32 %v4320_v15, %v4314_v0 }
 0x346   : > { %3049 = vpow2.f32 %v1959_v28  ;;  %v1963_v55 = vmul.f32 1.442695, %v1853_v49  ;;  %v1965_v58 = vmul.f32 1.442695, %v1854_v37 }
 0x347   : > { %3051 = vpow2.f32 %v1961_v59  ;;  %2057 = vadd.xlane.f32.xlu1 %v2056_v24 }
 0x348   : > { %v4326_v8 = vpop.eup %3041  ;;  %3053 = vpow2.f32 %v1963_v55 }
 0x349   : > { %4729 = vst [vmem:[#allocation41_spill] sm:$0xff] %v4326_v8  ;;  %v4328_v32 = vpop.eup %3043  ;;  %3055 = vpow2.f32 %v1965_v58 }
 0x34a   : > { %v4330_v6 = vpop.eup %3045  ;;  %v2059_v41 = vadd.f32 %v4328_v32, %v4326_v8 }
 0x34b   : > { %4730 = vst [vmem:[#allocation7_spill] sm:$0xff] %v4330_v6  ;;  %v4334_v10 = vpop.eup %3047 }
 0x34c   : > { %4731 = vst [vmem:[#allocation8_spill] sm:$0xff] %v4334_v10  ;;  %2060 = vadd.xlane.f32.xlu0 %v2059_v41  ;;  %v2062_v2 = vadd.f32 %v4334_v10, %v4330_v6 }
 0x34e   : > { %2063 = vadd.xlane.f32.xlu1 %v2062_v2 }
 0x350   : > { %v4338_v37 = vpop.eup %3049 }
 0x351   : > { %4732 = vst [vmem:[#allocation35_spill] sm:$0xff] %v4338_v37  ;;  %v4340_v39 = vpop.eup %3051 }
 0x352   : > { %4733 = vst [vmem:[#allocation36_spill] sm:$0xff] %v4340_v39  ;;  %v4342_v45 = vpop.eup %3053  ;;  %v2065_v58 = vadd.f32 %v4340_v39, %v4338_v37 }
 0x353   : > { %4734 = vst [vmem:[#allocation37_spill] sm:$0xff] %v4342_v45  ;;  %v4346_v28 = vpop.eup %3055 }
 0x354   : > { %4735 = vst [vmem:[#allocation38_spill] sm:$0xff] %v4346_v28  ;;  %2066 = vadd.xlane.f32.xlu0 %v2065_v58  ;;  %v2068_v59 = vadd.f32 %v4346_v28, %v4342_v45 }
 0x356   : > { %2069 = vadd.xlane.f32.xlu1 %v2068_v59 }
 0x389   : > { %v2001_v49 = vpop.xlane.xlu0 %2000 }
 0x38a   : > { %3057 = vrcp.f32 %v2001_v49 }
 0x38d   : > { %v2004_v24 = vpop.xlane.xlu1 %2003  ;;  %v1785_v55 = vpop.xlane.xlu0 %1784 }
 0x38e   : > { %3059 = vrcp.f32 %v2004_v24  ;;  %v1855_v41 = vsub.f32 %v3897_v1, %v1785_v55  ;;  %v1856_v2 = vsub.f32 %v3899_v62, %v1785_v55 }
 0x390   : > { %v1967_v8 = vmul.f32 1.442695, %v1855_v41  ;;  %v1969_v6 = vmul.f32 1.442695, %v1856_v2 }
 0x391   : > { %v2007_v10 = vpop.xlane.xlu0 %2006  ;;  %v1788_v37 = vpop.xlane.xlu1 %1787 }
 0x392   : > { %3061 = vpow2.f32 %v1967_v8  ;;  %v1857_v58 = vsub.f32 %v3901_v23, %v1788_v37  ;;  %v1858_v39 = vsub.f32 %v3905_v11, %v1788_v37  ;;  %v4736_v23 = vld [vmem:[#allocation44_spill] sm:$0xff]  ;;  %v4737_v37 = vld [vmem:[#allocation45_spill] sm:$0xff] }
 0x393   : > { %3063 = vpow2.f32 %v1969_v6 }
 0x394   : > { %3065 = vrcp.f32 %v2007_v10  ;;  %v1971_v59 = vmul.f32 1.442695, %v1857_v58  ;;  %v1973_v49 = vmul.f32 1.442695, %v1858_v39  ;;  %v3058_v24 = vpop.eup %3057 }
 0x395   : > { %v2010_v45 = vpop.xlane.xlu1 %2009  ;;  %v1791_v28 = vpop.xlane.xlu0 %1790  ;;  %v2127_v2 = vmul.f32 %v3058_v24, %v4736_v23  ;;  %v2128_v39 = vmul.f32 %v3058_v24, %v4737_v37 }
 0x396   : > { %3067 = vpow2.f32 %v1971_v59  ;;  %v1859_v1 = vsub.f32 %v3909_v56, %v1791_v28  ;;  %v1860_v62 = vsub.f32 %v3911_v30, %v1791_v28 }
 0x397   : > { %3069 = vpow2.f32 %v1973_v49 }
 0x398   : > { %v3060_v55 = vpop.eup %3059  ;;  %3071 = vrcp.f32 %v2010_v45  ;;  %v1975_v8 = vmul.f32 1.442695, %v1859_v1  ;;  %v1977_v41 = vmul.f32 1.442695, %v1860_v62 }
 0x399   : > { %v2129_v11 = vmul.f32 %v3060_v55, %v4073_v57  ;;  %v2013_v6 = vpop.xlane.xlu0 %2012  ;;  %v2130_v58 = vmul.f32 %v3060_v55, %v4077_v51 }
 0x39a   : > { %v1794_v10 = vpop.xlane.xlu1 %1793  ;;  %3073 = vpow2.f32 %v1975_v8 }
 0x39b   : > { %v1861_v56 = vsub.f32 %v3913_v60, %v1794_v10  ;;  %v1862_v30 = vsub.f32 %v3917_v47, %v1794_v10  ;;  %3075 = vpow2.f32 %v1977_v41  ;;  %v2192_v28 = vpack.c.bf16 %v2130_v58, %v2128_v39 }
 0x39c   : > { %v2191_v45 = vpack.c.bf16 %v2129_v11, %v2127_v2  ;;  %v4362_v59 = vpop.eup %3061  ;;  %3077 = vrcp.f32 %v2013_v6 }
 0x39d   : > { %v1979_v49 = vmul.f32 1.442695, %v1861_v56  ;;  %v1981_v1 = vmul.f32 1.442695, %v1862_v30  ;;  %v4364_v57 = vpop.eup %3063  ;;  %2271 = vmatprep.mubr.bf16.mxu0 %v2192_v28 }
 0x39e   : > { %v2016_v62 = vpop.xlane.xlu1 %2015  ;;  %v3066_v23 = vpop.eup %3065  ;;  %2272 = vmatmul.mubr.bf16.vlgmr.msra.gmra.mrb[48].mxu0 %v2191_v45  ;;  %v2071_v47 = vadd.f32 %v4364_v57, %v4362_v59 }
 0x39f   : > { %v1797_v24 = vpop.xlane.xlu0 %1796  ;;  %3079 = vpow2.f32 %v1979_v49  ;;  %v2132_v10 = vmul.f32 %v3066_v23, %v4092_v50  ;;  %v2131_v56 = vmul.f32 %v3066_v23, %v4084_v27 }
 0x3a0   : > { %v1863_v51 = vsub.f32 %v4676_v19, %v1797_v24  ;;  %v1864_v60 = vsub.f32 %v4677_v18, %v1797_v24  ;;  %3081 = vpow2.f32 %v1981_v1  ;;  %v4370_v55 = vpop.eup %3067  ;;  %2072 = vadd.xlane.f32.xlu0 %v2071_v47 }
 0x3a1   : > { %3083 = vrcp.f32 %v2016_v62  ;;  %v4372_v2 = vpop.eup %3069 }
 0x3a2   : > { %v1983_v8 = vmul.f32 1.442695, %v1863_v51  ;;  %v1985_v41 = vmul.f32 1.442695, %v1864_v60  ;;  %v3072_v19 = vpop.eup %3071  ;;  %v2074_v39 = vadd.f32 %v4372_v2, %v4370_v55 }
 0x3a3   : > { %v2019_v11 = vpop.xlane.xlu0 %2018  ;;  %v2134_v58 = vmul.f32 %v3072_v19, %v4120_v26  ;;  %v2133_v30 = vmul.f32 %v3072_v19, %v4113_v53 }
 0x3a4   : > { %v1800_v6 = vpop.xlane.xlu1 %1799  ;;  %3085 = vpow2.f32 %v1983_v8  ;;  %v4382_v28 = vpop.eup %3073  ;;  %2075 = vadd.xlane.f32.xlu1 %v2074_v39 }
 0x3a5   : > { %v1865_v18 = vsub.f32 %v4686_v36, %v1800_v6  ;;  %v1866_v37 = vsub.f32 %v4687_v42, %v1800_v6  ;;  %3087 = vpow2.f32 %v1985_v41  ;;  %v4384_v49 = vpop.eup %3075  ;;  %v2194_v36 = vpack.c.bf16 %v2134_v58, %v2132_v10 }
 0x3a6   : > { %3089 = vrcp.f32 %v2019_v11  ;;  %v2193_v62 = vpack.c.bf16 %v2133_v30, %v2131_v56  ;;  %v3078_v24 = vpop.eup %3077  ;;  %v2077_v53 = vadd.f32 %v4384_v49, %v4382_v28 }
 0x3a7   : > { %v1987_v45 = vmul.f32 1.442695, %v1865_v18  ;;  %v1989_v50 = vmul.f32 1.442695, %v1866_v37  ;;  %2279 = vmatprep.mubr.bf16.mxu0 %v2194_v36  ;;  %v2136_v41 = vmul.f32 %v3078_v24, %v4141_v16  ;;  %v2135_v18 = vmul.f32 %v3078_v24, %v4132_v20 }
 0x3a8   : > { %v2022_v42 = vpop.xlane.xlu1 %2021  ;;  %v1803_v1 = vpop.xlane.xlu0 %1802  ;;  %2280 = vmatmul.mubr.bf16.gmra.mrb[52].mxu0 %v2193_v62  ;;  %2078 = vadd.xlane.f32.xlu0 %v2077_v53 }
 0x3a9   : > { %3091 = vpow2.f32 %v1987_v45  ;;  %v1867_v26 = vsub.f32 %v4690_v13, %v1803_v1  ;;  %v1868_v27 = vsub.f32 %v4691_v44, %v1803_v1  ;;  %v4390_v23 = vpop.eup %3079 }
 0x3aa   : > { %3093 = vpow2.f32 %v1989_v50  ;;  %v4392_v47 = vpop.eup %3081 }
 0x3ab   : > { %3095 = vrcp.f32 %v2022_v42  ;;  %v1991_v51 = vmul.f32 1.442695, %v1867_v26  ;;  %v1993_v60 = vmul.f32 1.442695, %v1868_v27  ;;  %v3084_v13 = vpop.eup %3083  ;;  %v2080_v10 = vadd.f32 %v4392_v47, %v4390_v23 }
 0x3ac   : > { %v1806_v8 = vpop.xlane.xlu1 %1805  ;;  %v2025_v44 = vpop.xlane.xlu0 %2024  ;;  %v2138_v19 = vmul.f32 %v3084_v13, %v4154_v35  ;;  %v2137_v37 = vmul.f32 %v3084_v13, %v4147_v25 }
 0x3ad   : > { %3097 = vpow2.f32 %v1991_v51  ;;  %v1869_v11 = vsub.f32 %v4698_v21, %v1806_v8  ;;  %v1870_v6 = vsub.f32 %v4699_v7, %v1806_v8  ;;  %2081 = vadd.xlane.f32.xlu1 %v2080_v10 }
 0x3ae   : > { %3099 = vpow2.f32 %v1993_v60  ;;  %v4402_v39 = vpop.eup %3085  ;;  %v2196_v21 = vpack.c.bf16 %v2138_v19, %v2136_v41  ;;  %v2195_v30 = vpack.c.bf16 %v2137_v37, %v2135_v18 }
 0x3af   : > { %v1995_v16 = vmul.f32 1.442695, %v1869_v11  ;;  %v1997_v58 = vmul.f32 1.442695, %v1870_v6  ;;  %v4404_v56 = vpop.eup %3087  ;;  %3101 = vrcp.f32 %v2025_v44 }
 0x3b0   : > { %v2028_v7 = vpop.xlane.xlu1 %2027  ;;  %v2083_v45 = vadd.f32 %v4404_v56, %v4402_v39  ;;  %v3090_v35 = vpop.eup %3089  ;;  %2287 = vmatprep.mubr.bf16.mxu0 %v2196_v21 }
 0x3b1   : > { %3103 = vpow2.f32 %v1995_v16  ;;  %2288 = vmatmul.mubr.bf16.gmra.mrb[56].mxu0 %v2195_v30  ;;  %v2140_v1 = vmul.f32 %v3090_v35, %v4182_v9  ;;  %v2139_v24 = vmul.f32 %v3090_v35, %v4171_v54 }
 0x3b2   : > { %3105 = vpow2.f32 %v1997_v58  ;;  %2084 = vadd.xlane.f32.xlu0 %v2083_v45  ;;  %v2031_v50 = vpop.xlane.xlu0 %2030 }
 0x3b3   : > { %v4408_v20 = vpop.eup %3091  ;;  %3107 = vrcp.f32 %v2028_v7 }
 0x3b4   : > { %v4410_v25 = vpop.eup %3093  ;;  %3109 = vrcp.f32 %v2031_v50  ;;  %v2034_v53 = vpop.xlane.xlu1 %2033 }
 0x3b5   : > { %v3096_v36 = vpop.eup %3095  ;;  %v2086_v42 = vadd.f32 %v4410_v25, %v4408_v20  ;;  %3111 = vrcp.f32 %v2034_v53 }
 0x3b6   : > { %v2142_v62 = vmul.f32 %v3096_v36, %v4193_v4  ;;  %v2141_v26 = vmul.f32 %v3096_v36, %v4187_v63 }
 0x3b7   : > { %v4418_v27 = vpop.eup %3097  ;;  %2087 = vadd.xlane.f32.xlu1 %v2086_v42 }
 0x3b8   : > { %v4420_v51 = vpop.eup %3099  ;;  %v2198_v60 = vpack.c.bf16 %v2142_v62, %v2140_v1  ;;  %v2197_v8 = vpack.c.bf16 %v2141_v26, %v2139_v24 }
 0x3b9   : > { %v2089_v41 = vadd.f32 %v4420_v51, %v4418_v27  ;;  %v3102_v9 = vpop.eup %3101  ;;  %v2037_v63 = vpop.xlane.xlu0 %2036 }
 0x3ba   : > { %2295 = vmatprep.mubr.bf16.mxu0 %v2198_v60  ;;  %v2144_v11 = vmul.f32 %v3102_v9, %v4219_v12  ;;  %3113 = vrcp.f32 %v2037_v63  ;;  %v2143_v10 = vmul.f32 %v3102_v9, %v4213_v48  ;;  %v4738_v9 = vld [vmem:[#allocation33_spill] sm:$0xff] }
 0x3bb   : > { %v4424_v13 = vpop.eup %3103  ;;  %2296 = vmatmul.mubr.bf16.gmra.mrb[60].mxu0 %v2197_v8  ;;  %2090 = vadd.xlane.f32.xlu0 %v2089_v41 }
 0x3bc   : > { %v4426_v54 = vpop.eup %3105  ;;  %v2040_v18 = vpop.xlane.xlu1 %2039 }
 0x3bd   : > { %v3108_v4 = vpop.eup %3107  ;;  %v2092_v44 = vadd.f32 %v4426_v54, %v4424_v13  ;;  %3115 = vrcp.f32 %v2040_v18  ;;  %v4741_v18 = vld [vmem:[#allocation6_spill] sm:$0xff] }
 0x3be   : > { %v2146_v6 = vmul.f32 %v3108_v4, %v4228_v14  ;;  %v2145_v19 = vmul.f32 %v3108_v4, %v4222_v5  ;;  %v3110_v37 = vpop.eup %3109 }
 0x3bf   : > { %2093 = vadd.xlane.f32.xlu1 %v2092_v44  ;;  %v3112_v21 = vpop.eup %3111  ;;  %v2148_v7 = vmul.f32 %v3110_v37, %v4245_v31  ;;  %v2147_v5 = vmul.f32 %v3110_v37, %v4240_v52 }
 0x3c0   : > { %v2200_v16 = vpack.c.bf16 %v2146_v6, %v2144_v11  ;;  %v2199_v58 = vpack.c.bf16 %v2145_v19, %v2143_v10  ;;  %v2150_v12 = vmul.f32 %v3112_v21, %v4253_v43  ;;  %v2149_v14 = vmul.f32 %v3112_v21, %v4247_v61  ;;  %v4739_v11 = vld [vmem:[#allocation5_spill] sm:$0xff]  ;;  %v4740_v10 = vld [vmem:[#allocation42_spill] sm:$0xff] }
 0x3c1   : > { %v2043_v30 = vpop.xlane.xlu0 %2042 }
 0x3c2   : > { %2303 = vmatprep.mubr.bf16.mxu0 %v2200_v16  ;;  %v2202_v45 = vpack.c.bf16 %v2150_v12, %v2148_v7  ;;  %3117 = vrcp.f32 %v2043_v30  ;;  %v2201_v50 = vpack.c.bf16 %v2149_v14, %v2147_v5  ;;  %v4742_v16 = vld [vmem:[#allocation34_spill] sm:$0xff] }
 0x3c3   : > { %2304 = vmatmul.mubr.bf16.gmra.mrb[64].mxu0 %v2199_v58 }
 0x3c4   : > { %2311 = vmatprep.mubr.bf16.mxu0 %v2202_v45  ;;  %v2046_v48 = vpop.xlane.xlu1 %2045  ;;  %v3114_v35 = vpop.eup %3113 }
 0x3c5   : > { %3119 = vrcp.f32 %v2046_v48  ;;  %v2152_v42 = vmul.f32 %v3114_v35, %v4264_v29  ;;  %v2151_v24 = vmul.f32 %v3114_v35, %v4262_v34 }
 0x3c7   : > { %v3116_v36 = vpop.eup %3115 }
 0x3c8   : > { %v2154_v31 = vmul.f32 %v3116_v36, %v4272_v38  ;;  %v2153_v62 = vmul.f32 %v3116_v36, %v4266_v17 }
 0x3c9   : > { %v2049_v1 = vpop.xlane.xlu0 %2048 }
 0x3ca   : > { %v2204_v43 = vpack.c.bf16 %v2154_v31, %v2152_v42  ;;  %3121 = vrcp.f32 %v2049_v1  ;;  %v2203_v52 = vpack.c.bf16 %v2153_v62, %v2151_v24 }
 0x3cb   : > { %2312 = vmatmul.mubr.bf16.gmra.mrb[68].mxu0 %v2201_v50 }
 0x3cc   : > { %2319 = vmatprep.mubr.bf16.mxu0 %v2204_v43  ;;  %v2052_v61 = vpop.xlane.xlu1 %2051  ;;  %v3118_v26 = vpop.eup %3117  ;;  %v4743_v43 = vld [vmem:[#allocation8_spill] sm:$0xff] }
 0x3cd   : > { %3123 = vrcp.f32 %v2052_v61  ;;  %v2156_v60 = vmul.f32 %v3118_v26, %v4280_v40  ;;  %v2155_v63 = vmul.f32 %v3118_v26, %v4738_v9  ;;  %v4745_v26 = vld [vmem:[#allocation41_spill] sm:$0xff] }
 0x3cf   : > { %v3120_v53 = vpop.eup %3119 }
 0x3d0   : > { %v2158_v29 = vmul.f32 %v3120_v53, %v4288_v22  ;;  %v2157_v41 = vmul.f32 %v3120_v53, %v4282_v33 }
 0x3d1   : > { %v2055_v8 = vpop.xlane.xlu0 %2054 }
 0x3d2   : > { %v2206_v38 = vpack.c.bf16 %v2158_v29, %v2156_v60  ;;  %3125 = vrcp.f32 %v2055_v8  ;;  %v2205_v34 = vpack.c.bf16 %v2157_v41, %v2155_v63  ;;  %v4746_v60 = vld [vmem:[#allocation36_spill] sm:$0xff]  ;;  %v4747_v8 = vld [vmem:[#allocation38_spill] sm:$0xff]  ;;  %v4748_v41 = vld [vmem:[#allocation37_spill] sm:$0xff] }
 0x3d3   : > { %2320 = vmatmul.mubr.bf16.gmra.mrb[72].mxu0 %v2203_v52 }
 0x3d4   : > { %2327 = vmatprep.mubr.bf16.mxu0 %v2206_v38  ;;  %v2058_v17 = vpop.xlane.xlu1 %2057  ;;  %v3122_v4 = vpop.eup %3121 }
 0x3d5   : > { %3127 = vrcp.f32 %v2058_v17  ;;  %v2160_v6 = vmul.f32 %v3122_v4, %v4739_v11  ;;  %v2159_v58 = vmul.f32 %v3122_v4, %v4742_v16  ;;  %v4749_v17 = vld [vmem:[#allocation35_spill] sm:$0xff] }
 0x3d7   : > { %v3124_v44 = vpop.eup %3123 }
 0x3d8   : > { %v2162_v40 = vmul.f32 %v3124_v44, %v4740_v10  ;;  %v2161_v37 = vmul.f32 %v3124_v44, %v4741_v18 }
 0x3d9   : > { %v2061_v19 = vpop.xlane.xlu0 %2060 }
 0x3da   : > { %3129 = vrcp.f32 %v2061_v19  ;;  %v2208_v22 = vpack.c.bf16 %v2162_v40, %v2160_v6  ;;  %v2207_v7 = vpack.c.bf16 %v2161_v37, %v2159_v58 }
 0x3db   : > { %2328 = vmatmul.mubr.bf16.gmra.mrb[76].mxu0 %v2205_v34  ;;  %v2064_v33 = vpop.xlane.xlu1 %2063 }
 0x3dc   : > { %2335 = vmatprep.mubr.bf16.mxu0 %v2208_v22  ;;  %3131 = vrcp.f32 %v2064_v33  ;;  %v3126_v21 = vpop.eup %3125 }
 0x3dd   : > { %v2164_v30 = vmul.f32 %v3126_v21, %v4312_v3  ;;  %v2163_v36 = vmul.f32 %v3126_v21, %v4310_v46 }
 0x3df   : > { %v3128_v12 = vpop.eup %3127 }
 0x3e0   : > { %v2166_v45 = vmul.f32 %v3128_v12, %v4320_v15  ;;  %v2165_v5 = vmul.f32 %v3128_v12, %v4314_v0  ;;  %v4744_v15 = vld [vmem:[#allocation7_spill] sm:$0xff] }
 0x3e1   : > { %v2067_v14 = vpop.xlane.xlu0 %2066 }
 0x3e2   : > { %3133 = vrcp.f32 %v2067_v14  ;;  %v2210_v48 = vpack.c.bf16 %v2166_v45, %v2164_v30  ;;  %v2209_v31 = vpack.c.bf16 %v2165_v5, %v2163_v36 }
 0x3e3   : > { %2336 = vmatmul.mubr.bf16.gmra.mrb[80].mxu0 %v2207_v7  ;;  %v2070_v35 = vpop.xlane.xlu1 %2069 }
 0x3e4   : > { %v3130_v50 = vpop.eup %3129  ;;  %2343 = vmatprep.mubr.bf16.mxu0 %v2210_v48  ;;  %3135 = vrcp.f32 %v2070_v35 }
 0x3e5   : > { %v2168_v1 = vmul.f32 %v3130_v50, %v4328_v32  ;;  %v2167_v0 = vmul.f32 %v3130_v50, %v4745_v26 }
 0x3e6   : > { %v3132_v42 = vpop.eup %3131 }
 0x3e7   : > { %v2170_v62 = vmul.f32 %v3132_v42, %v4743_v43  ;;  %v2169_v61 = vmul.f32 %v3132_v42, %v4744_v15 }
 0x3e9   : > { %v2212_v3 = vpack.c.bf16 %v2170_v62, %v2168_v1  ;;  %v2211_v53 = vpack.c.bf16 %v2169_v61, %v2167_v0 }
 0x3eb   : > { %2344 = vmatmul.mubr.bf16.gmra.mrb[84].mxu0 %v2209_v31 }
 0x3ec   : > { %2351 = vmatprep.mubr.bf16.mxu0 %v2212_v3  ;;  %v3134_v24 = vpop.eup %3133 }
 0x3ed   : > { %v2172_v29 = vmul.f32 %v3134_v24, %v4746_v60  ;;  %v2171_v9 = vmul.f32 %v3134_v24, %v4749_v17 }
 0x3ee   : > { %v3136_v52 = vpop.eup %3135 }
 0x3ef   : > { %v2174_v46 = vmul.f32 %v3136_v52, %v4747_v8  ;;  %v2173_v32 = vmul.f32 %v3136_v52, %v4748_v41 }
 0x3f1   : > { %v2214_v38 = vpack.c.bf16 %v2174_v46, %v2172_v29  ;;  %v2213_v63 = vpack.c.bf16 %v2173_v32, %v2171_v9 }
 0x3f3   : > { %2352 = vmatmul.mubr.bf16.gmra.mrb[88].mxu0 %v2211_v53 }
 0x3f4   : > { %2359 = vmatprep.mubr.bf16.mxu0 %v2214_v38 }
 0x3fb   : > { %2360 = vmatmul.mubr.bf16.gmra.mrb[92].mxu0 %v2213_v63 }
 0x42d   : > { %v2073_v4 = vpop.xlane.xlu0 %2072 }
 0x42e   : > { %3137 = vrcp.f32 %v2073_v4 }
 0x431   : > { %v2076_v34 = vpop.xlane.xlu1 %2075 }
 0x432   : > { %3139 = vrcp.f32 %v2076_v34 }
 0x435   : > { %v2079_v44 = vpop.xlane.xlu0 %2078 }
 0x436   : > { %3141 = vrcp.f32 %v2079_v44 }
 0x438   : > { %v3138_v6 = vpop.eup %3137 }
 0x439   : > { %v2176_v19 = vmul.f32 %v3138_v6, %v4364_v57  ;;  %v2175_v18 = vmul.f32 %v3138_v6, %v4362_v59 }
 0x43a   : > { %v2082_v11 = vpop.xlane.xlu1 %2081 }
 0x43b   : > { %3143 = vrcp.f32 %v2082_v11 }
 0x43c   : > { %v3140_v10 = vpop.eup %3139 }
 0x43d   : > { %v2178_v22 = vmul.f32 %v3140_v10, %v4372_v2  ;;  %v2177_v37 = vmul.f32 %v3140_v10, %v4370_v55 }
 0x43f   : > { %v2085_v40 = vpop.xlane.xlu0 %2084  ;;  %v2216_v33 = vpack.c.bf16 %v2178_v22, %v2176_v19  ;;  %v2215_v16 = vpack.c.bf16 %v2177_v37, %v2175_v18 }
 0x440   : > { %3145 = vrcp.f32 %v2085_v40  ;;  %v3142_v21 = vpop.eup %3141 }
 0x441   : > { %2367 = vmatprep.mubr.bf16.mxu0 %v2216_v33  ;;  %v2180_v30 = vmul.f32 %v3142_v21, %v4384_v49  ;;  %v2179_v2 = vmul.f32 %v3142_v21, %v4382_v28 }
 0x442   : > { %2368 = vmatmul.mubr.bf16.gmra.mrb[96].mxu0 %v2215_v16 }
 0x444   : > { %v2088_v58 = vpop.xlane.xlu1 %2087 }
 0x445   : > { %3147 = vrcp.f32 %v2088_v58  ;;  %v3144_v7 = vpop.eup %3143 }
 0x446   : > { %v2182_v57 = vmul.f32 %v3144_v7, %v4392_v47  ;;  %v2181_v59 = vmul.f32 %v3144_v7, %v4390_v23 }
 0x448   : > { %v2091_v12 = vpop.xlane.xlu0 %2090  ;;  %v2218_v45 = vpack.c.bf16 %v2182_v57, %v2180_v30  ;;  %v2217_v55 = vpack.c.bf16 %v2181_v59, %v2179_v2 }
 0x449   : > { %3149 = vrcp.f32 %v2091_v12 }
 0x44a   : > { %2375 = vmatprep.mubr.bf16.mxu0 %v2218_v45  ;;  %v3146_v48 = vpop.eup %3145 }
 0x44b   : > { %2376 = vmatmul.mubr.bf16.gmra.mrb[100].mxu0 %v2217_v55  ;;  %v2184_v35 = vmul.f32 %v3146_v48, %v4404_v56  ;;  %v2183_v49 = vmul.f32 %v3146_v48, %v4402_v39 }
 0x44c   : > { %v2094_v14 = vpop.xlane.xlu1 %2093 }
 0x44d   : > { %3151 = vrcp.f32 %v2094_v14 }
 0x44f   : > { %v3148_v5 = vpop.eup %3147 }
 0x450   : > { %v2186_v50 = vmul.f32 %v3148_v5, %v4410_v25  ;;  %v2185_v28 = vmul.f32 %v3148_v5, %v4408_v20 }
 0x452   : > { %v2220_v47 = vpack.c.bf16 %v2186_v50, %v2184_v35  ;;  %v2219_v23 = vpack.c.bf16 %v2185_v28, %v2183_v49 }
 0x453   : > { %v3150_v36 = vpop.eup %3149 }
 0x454   : > { %2383 = vmatprep.mubr.bf16.mxu0 %v2220_v47  ;;  %v2188_v31 = vmul.f32 %v3150_v36, %v4420_v51  ;;  %v2187_v43 = vmul.f32 %v3150_v36, %v4418_v27 }
 0x455   : > { %2384 = vmatmul.mubr.bf16.gmra.mrb[104].mxu0 %v2219_v23 }
 0x457   : > { %v3152_v42 = vpop.eup %3151 }
 0x458   : > { %v2190_v1 = vmul.f32 %v3152_v42, %v4426_v54  ;;  %v2189_v56 = vmul.f32 %v3152_v42, %v4424_v13 }
 0x45a   : > { %v2222_v25 = vpack.c.bf16 %v2190_v1, %v2188_v31  ;;  %v2221_v62 = vpack.c.bf16 %v2189_v56, %v2187_v43 }
 0x45c   : > { %2391 = vmatprep.mubr.bf16.mxu0 %v2222_v25 }
 0x45d   : > { %2392 = vmatmul.mubr.bf16.gmra.mrb[108].mxu0 %v2221_v62 }
 0x471   : > { %v2714_v39 = vpop.f32.mrb[48].mxu0 }
 0x472   : > { %v2715_v20 = vpop.f32.mrb[49].mxu0 }
 0x473   : > { %v2716_v51 = vadd.f32 %v2715_v20, %v2714_v39  ;;  %v2717_v27 = vpop.f32.mrb[50].mxu0 }
 0x474   : > { %v2718_v54 = vpop.f32.mrb[51].mxu0 }
 0x475   : > { %2400 = vst.msk [vmem:[%s4482_s15] sm:$0xff] %vm442_vm1, %v2716_v51  ;;  %v2719_v13 = vadd.f32 %v2718_v54, %v2717_v27 }
 0x477   : > { %2401 = vst.msk [vmem:[%s4482_s15 + $0x8] sm:$0xff] %vm442_vm1, %v2719_v13 }
 0x47b   : > { %v2720_v3 = vpop.f32.mrb[52].mxu0 }
 0x47c   : > { %v2721_v15 = vpop.f32.mrb[53].mxu0 }
 0x47d   : > { %v2722_v61 = vadd.f32 %v2721_v15, %v2720_v3  ;;  %v2723_v24 = vpop.f32.mrb[54].mxu0 }
 0x47e   : > { %v2724_v26 = vpop.f32.mrb[55].mxu0 }
 0x47f   : > { %2402 = vst.msk [vmem:[%s4482_s15 + $0x10] sm:$0xff] %vm442_vm1, %v2722_v61  ;;  %v2725_v0 = vadd.f32 %v2724_v26, %v2723_v24 }
 0x481   : > { %2403 = vst.msk [vmem:[%s4482_s15 + $0x18] sm:$0xff] %vm442_vm1, %v2725_v0 }
 0x484   : > { %v2726_v52 = vpop.f32.mrb[56].mxu0 }
 0x485   : > { %v2727_v53 = vpop.f32.mrb[57].mxu0 }
 0x486   : > { %v2728_v60 = vadd.f32 %v2727_v53, %v2726_v52  ;;  %v2729_v29 = vpop.f32.mrb[58].mxu0 }
 0x487   : > { %v2730_v8 = vpop.f32.mrb[59].mxu0 }
 0x488   : > { %2404 = vst.msk [vmem:[%s4482_s15 + $0x20] sm:$0xff] %vm442_vm1, %v2728_v60  ;;  %v2731_v46 = vadd.f32 %v2730_v8, %v2729_v29 }
 0x48a   : > { %2405 = vst.msk [vmem:[%s4482_s15 + $0x28] sm:$0xff] %vm442_vm1, %v2731_v46 }
 0x48e   : > { %v2732_v38 = vpop.f32.mrb[60].mxu0 }
 0x48f   : > { %v2733_v41 = vpop.f32.mrb[61].mxu0 }
 0x490   : > { %v2734_v32 = vadd.f32 %v2733_v41, %v2732_v38  ;;  %v2735_v17 = vpop.f32.mrb[62].mxu0 }
 0x491   : > { %v2736_v9 = vpop.f32.mrb[63].mxu0 }
 0x492   : > { %2406 = vst.msk [vmem:[%s4482_s15 + $0x30] sm:$0xff] %vm442_vm1, %v2734_v32  ;;  %v2737_v63 = vadd.f32 %v2736_v9, %v2735_v17 }
 0x494   : > { %2407 = vst.msk [vmem:[%s4482_s15 + $0x38] sm:$0xff] %vm442_vm1, %v2737_v63 }
 0x496   : > { %v2738_v4 = vpop.f32.mrb[64].mxu0 }
 0x497   : > { %v2739_v34 = vpop.f32.mrb[65].mxu0 }
 0x498   : > { %v2740_v44 = vadd.f32 %v2739_v34, %v2738_v4  ;;  %v2741_v11 = vpop.f32.mrb[66].mxu0 }
 0x499   : > { %v2742_v6 = vpop.f32.mrb[67].mxu0 }
 0x49a   : > { %2408 = vst.msk [vmem:[%s4482_s15 + $0x40] sm:$0xff] %vm442_vm1, %v2740_v44  ;;  %v2743_v10 = vadd.f32 %v2742_v6, %v2741_v11 }
 0x49c   : > { %2409 = vst.msk [vmem:[%s4482_s15 + $0x48] sm:$0xff] %vm442_vm1, %v2743_v10 }
 0x49e   : > { %v2744_v40 = vpop.f32.mrb[68].mxu0 }
 0x49f   : > { %v2745_v19 = vpop.f32.mrb[69].mxu0 }
 0x4a0   : > { %v2746_v22 = vadd.f32 %v2745_v19, %v2744_v40  ;;  %v2747_v18 = vpop.f32.mrb[70].mxu0 }
 0x4a1   : > { %v2748_v37 = vpop.f32.mrb[71].mxu0 }
 0x4a2   : > { %2410 = vst.msk [vmem:[%s4482_s15 + $0x50] sm:$0xff] %vm442_vm1, %v2746_v22  ;;  %v2749_v33 = vadd.f32 %v2748_v37, %v2747_v18 }
 0x4a4   : > { %2411 = vst.msk [vmem:[%s4482_s15 + $0x58] sm:$0xff] %vm442_vm1, %v2749_v33 }
 0x4a6   : > { %v2750_v16 = vpop.f32.mrb[72].mxu0 }
 0x4a7   : > { %v2751_v58 = vpop.f32.mrb[73].mxu0 }
 0x4a8   : > { %v2752_v21 = vadd.f32 %v2751_v58, %v2750_v16  ;;  %v2753_v7 = vpop.f32.mrb[74].mxu0 }
 0x4a9   : > { %v2754_v12 = vpop.f32.mrb[75].mxu0 }
 0x4aa   : > { %2412 = vst.msk [vmem:[%s4482_s15 + $0x60] sm:$0xff] %vm442_vm1, %v2752_v21  ;;  %v2755_v30 = vadd.f32 %v2754_v12, %v2753_v7 }
 0x4ac   : > { %2413 = vst.msk [vmem:[%s4482_s15 + $0x68] sm:$0xff] %vm442_vm1, %v2755_v30 }
 0x4ae   : > { %v2756_v57 = vpop.f32.mrb[76].mxu0 }
 0x4af   : > { %v2757_v2 = vpop.f32.mrb[77].mxu0 }
 0x4b0   : > { %v2758_v59 = vadd.f32 %v2757_v2, %v2756_v57  ;;  %v2759_v45 = vpop.f32.mrb[78].mxu0 }
 0x4b1   : > { %v2760_v55 = vpop.f32.mrb[79].mxu0 }
 0x4b2   : > { %2414 = vst.msk [vmem:[%s4482_s15 + $0x70] sm:$0xff] %vm442_vm1, %v2758_v59  ;;  %v2761_v14 = vadd.f32 %v2760_v55, %v2759_v45 }
 0x4b4   : > { %2415 = vst.msk [vmem:[%s4482_s15 + $0x78] sm:$0xff] %vm442_vm1, %v2761_v14 }
 0x4b6   : > { %v2762_v48 = vpop.f32.mrb[80].mxu0 }
 0x4b7   : > { %v2763_v5 = vpop.f32.mrb[81].mxu0 }
 0x4b8   : > { %v2764_v35 = vadd.f32 %v2763_v5, %v2762_v48  ;;  %v2765_v50 = vpop.f32.mrb[82].mxu0 }
 0x4b9   : > { %v2766_v49 = vpop.f32.mrb[83].mxu0 }
 0x4ba   : > { %2416 = vst.msk [vmem:[%s4482_s15 + $0x80] sm:$0xff] %vm442_vm1, %v2764_v35  ;;  %v2767_v28 = vadd.f32 %v2766_v49, %v2765_v50 }
 0x4bc   : > { %2417 = vst.msk [vmem:[%s4482_s15 + $0x88] sm:$0xff] %vm442_vm1, %v2767_v28 }
 0x4be   : > { %v2768_v47 = vpop.f32.mrb[84].mxu0 }
 0x4bf   : > { %v2769_v23 = vpop.f32.mrb[85].mxu0 }
 0x4c0   : > { %v2770_v36 = vadd.f32 %v2769_v23, %v2768_v47  ;;  %v2771_v42 = vpop.f32.mrb[86].mxu0 }
 0x4c1   : > { %v2772_v31 = vpop.f32.mrb[87].mxu0 }
 0x4c2   : > { %2418 = vst.msk [vmem:[%s4482_s15 + $0x90] sm:$0xff] %vm442_vm1, %v2770_v36  ;;  %v2773_v1 = vadd.f32 %v2772_v31, %v2771_v42 }
 0x4c4   : > { %2419 = vst.msk [vmem:[%s4482_s15 + $0x98] sm:$0xff] %vm442_vm1, %v2773_v1 }
 0x4c6   : > { %v2774_v43 = vpop.f32.mrb[88].mxu0 }
 0x4c7   : > { %v2775_v56 = vpop.f32.mrb[89].mxu0 }
 0x4c8   : > { %v2776_v25 = vadd.f32 %v2775_v56, %v2774_v43  ;;  %v2777_v62 = vpop.f32.mrb[90].mxu0 }
 0x4c9   : > { %v2778_v39 = vpop.f32.mrb[91].mxu0 }
 0x4ca   : > { %2420 = vst.msk [vmem:[%s4482_s15 + $0xa0] sm:$0xff] %vm442_vm1, %v2776_v25  ;;  %v2779_v20 = vadd.f32 %v2778_v39, %v2777_v62 }
 0x4cc   : > { %2421 = vst.msk [vmem:[%s4482_s15 + $0xa8] sm:$0xff] %vm442_vm1, %v2779_v20 }
 0x4ce   : > { %v2780_v51 = vpop.f32.mrb[92].mxu0 }
 0x4cf   : > { %v2781_v27 = vpop.f32.mrb[93].mxu0 }
 0x4d0   : > { %v2782_v54 = vadd.f32 %v2781_v27, %v2780_v51  ;;  %v2783_v13 = vpop.f32.mrb[94].mxu0 }
 0x4d1   : > { %v2784_v3 = vpop.f32.mrb[95].mxu0 }
 0x4d2   : > { %2422 = vst.msk [vmem:[%s4482_s15 + $0xb0] sm:$0xff] %vm442_vm1, %v2782_v54  ;;  %v2785_v15 = vadd.f32 %v2784_v3, %v2783_v13 }
 0x4d4   : > { %2423 = vst.msk [vmem:[%s4482_s15 + $0xb8] sm:$0xff] %vm442_vm1, %v2785_v15 }
 0x515   : > { %v2786_v61 = vpop.f32.mrb[96].mxu0 }
 0x516   : > { %v2787_v24 = vpop.f32.mrb[97].mxu0 }
 0x517   : > { %v2788_v26 = vadd.f32 %v2787_v24, %v2786_v61  ;;  %v2789_v0 = vpop.f32.mrb[98].mxu0 }
 0x518   : > { %v2790_v52 = vpop.f32.mrb[99].mxu0 }
 0x519   : > { %2424 = vst.msk [vmem:[%s4482_s15 + $0xc0] sm:$0xff] %vm442_vm1, %v2788_v26  ;;  %v2791_v53 = vadd.f32 %v2790_v52, %v2789_v0 }
 0x51b   : > { %2425 = vst.msk [vmem:[%s4482_s15 + $0xc8] sm:$0xff] %vm442_vm1, %v2791_v53 }
 0x51e   : > { %v2792_v60 = vpop.f32.mrb[100].mxu0 }
 0x51f   : > { %v2793_v29 = vpop.f32.mrb[101].mxu0 }
 0x520   : > { %v2794_v8 = vadd.f32 %v2793_v29, %v2792_v60  ;;  %v2795_v46 = vpop.f32.mrb[102].mxu0 }
 0x521   : > { %v2796_v38 = vpop.f32.mrb[103].mxu0 }
 0x522   : > { %2426 = vst.msk [vmem:[%s4482_s15 + $0xd0] sm:$0xff] %vm442_vm1, %v2794_v8  ;;  %v2797_v41 = vadd.f32 %v2796_v38, %v2795_v46 }
 0x524   : > { %2427 = vst.msk [vmem:[%s4482_s15 + $0xd8] sm:$0xff] %vm442_vm1, %v2797_v41 }
 0x528   : > { %v2798_v32 = vpop.f32.mrb[104].mxu0 }
 0x529   : > { %v2799_v17 = vpop.f32.mrb[105].mxu0 }
 0x52a   : > { %v2800_v9 = vadd.f32 %v2799_v17, %v2798_v32  ;;  %v2801_v63 = vpop.f32.mrb[106].mxu0 }
 0x52b   : > { %v2802_v4 = vpop.f32.mrb[107].mxu0 }
 0x52c   : > { %2428 = vst.msk [vmem:[%s4482_s15 + $0xe0] sm:$0xff] %vm442_vm1, %v2800_v9  ;;  %v2803_v34 = vadd.f32 %v2802_v4, %v2801_v63 }
 0x52e   : > { %2429 = vst.msk [vmem:[%s4482_s15 + $0xe8] sm:$0xff] %vm442_vm1, %v2803_v34 }
 0x530   : > { %v2804_v44 = vpop.f32.mrb[108].mxu0 }
 0x531   : > { %v2805_v11 = vpop.f32.mrb[109].mxu0 }
 0x532   : > { %v2806_v6 = vadd.f32 %v2805_v11, %v2804_v44  ;;  %v2807_v10 = vpop.f32.mrb[110].mxu0 }
 0x533   : > { %v2808_v40 = vpop.f32.mrb[111].mxu0 }
 0x534   : > { %2430 = vst.msk [vmem:[%s4482_s15 + $0xf0] sm:$0xff] %vm442_vm1, %v2806_v6  ;;  %v2809_v19 = vadd.f32 %v2808_v40, %v2807_v10 }
 0x536   : > { %2431 = vst.msk [vmem:[%s4482_s15 + $0xf8] sm:$0xff] %vm442_vm1, %v2809_v19 }
 0x537 PF: > { %s19_s27 = sadd.s32 1, %s3190_s27  }
 0x538   : > { %p16_p1 = scmp.ge.s32.totalorder %s19_s27, 4  }
 0x53a   :  { %18 = sbr.rel (!%p16_p1) target bundleno = 1 (0x1), region = 87 }
 0x541   :  { %2453 = vsyncpa [#allocation3], 1 }
 0x542   :  { %2455 = vsyncpa [#allocation3 + $0x1], 1 }

// kernel: _lambda_.6
= control target key start
LH: loop header
LB: loop body
LE: loop exit
PB: predicated region body
PF: predicated region fallthrough
CT: control target
= control target key end

     0   :  { %s1524_s17 = smov 0   ;;  %s1957_s0 = inlined_call_operand.vmem [shape: bf16[2048,72], index: 0, kind: input, shape index: {}]   ;;  %s1958_s1 = inlined_call_operand.vmem [shape: bf16[72,8], index: 1, kind: input, shape index: {}]   ;;  %s1959_s2 = inlined_call_operand.vmem [shape: f32[1,8], index: 2, kind: input, shape index: {}]   ;;  %s1960_s3 = inlined_call_operand.<no memory space> [shape: f32[1], index: 3, kind: input, shape index: {}]   ;;  %s1961_s4 = inlined_call_operand.vmem [shape: f32[2048,8], index: 4, kind: output, shape index: {}]  }
   0x1   :  { %9 = sst [smem:[#allocation2]] %s1960_s3 }
   0x2 LB: > { %s1239_s18 = sadd.s32 4294967295, %s1494_s17   ;;  %p1243_p0 = scmp.ge.s32.totalorder %s1494_s17, 1  ;;  %s1494_s17 = sphi %s1524_s17, %s15_s17  }
   0x3   : > { %p164_p1 = scmp.lt.s32.totalorder %s1494_s17, 5 }
   0x5   : > { %p165_p2 = pnand %p1243_p0, %p164_p1 }
   0x6   : > { %v1451_v0 = vld [vmem:[%s1958_s1] sm:$0xff] (!%p165_p2)   ;;  %v1452_v1 = vld [vmem:[%s1958_s1 + $0x8] sm:$0xff] (!%p165_p2)   ;;  %s1244_s22 = sshll.u32 (!%p165_p2), %s1239_s18, 6  ;;  %v1453_v2 = vld [vmem:[%s1958_s1 + $0x10] sm:$0xff] (!%p165_p2)   ;;  %vm470_vm0 = vcmask (!%p165_p2), 588800   ;;  %vm567_vm1 = vcmask (!%p165_p2), 1043456  }
   0x7   : > { %168 = sbr.rel (%p165_p2) target bundleno = 324 (0x144), region = 36  ;;  %1357 = vmatprep.subr.bf16.mxu0 (!%p165_p2), %v1451_v0  ;;  %1431 = vmatprep.subr.bf16.mxu1 (!%p165_p2), %v1451_v0  ;;  %p191_p3 = scmp.lt.s32.totalorder (!%p165_p2), %s1244_s22, 255  ;;  %v1454_v3 = vld [vmem:[%s1958_s1 + $0x18] sm:$0xff] (!%p165_p2)   ;;  %v1455_v6 = vld [vmem:[%s1958_s1 + $0x20] ss:$0 sps:$4 sm:$0xff] (!%p165_p2)   ;;  %vm1118_vm2 = vcmask (!%p165_p2), 64512  }
   0x8   : > { %1358 = vmatpush3.bf16.msra.mxu0 (!%p165_p2), %v1451_v0  ;;  %1436 = vmatpush3.bf16.msra.mxu1 (!%p165_p2), %v1451_v0  ;;  %v569_v7 = vsel (!%p165_p2), %vm567_vm1, %v1455_v6, 0  ;;  %s860_s7 = sld [smem:[#allocation2]] (!%p165_p2)  ;;  %v1622_v38 = vld [vmem:[%s1959_s2] ss:$0 sm:$0xff] (!%p165_p2) }
   0x9   : > { %1359 = vmatprep.subr.bf16.mxu0 (!%p165_p2), %v1452_v1  ;;  %1432 = vmatprep.subr.bf16.mxu1 (!%p165_p2), %v1452_v1 }
   0xc   : > { %1360 = vmatpush3.bf16.msra.mxu0 (!%p165_p2), %v1452_v1  ;;  %1437 = vmatpush3.bf16.msra.mxu1 (!%p165_p2), %v1452_v1 }
   0xd   : > { %1361 = vmatprep.subr.bf16.mxu0 (!%p165_p2), %v1453_v2  ;;  %1433 = vmatprep.subr.bf16.mxu1 (!%p165_p2), %v1453_v2 }
   0xe   : > { %s1963_s22 = smov (!%p191_p3, %s1244_s22), 255  ;;  %v1627_v45 = vstv %s860_s7 }
   0xf   : > { %s1245_s25 = sshll.u32 %s1963_s22, 2  ;;  %s1247_s10 = sshll.u32 %s1963_s22, 3 }
  0x10   : > { %s1550_s30 = scalar_lea.vmem %s1957_s0, %s1245_s25  ;;  %1362 = vmatpush3.bf16.msra.mxu0 %v1453_v2  ;;  %1438 = vmatpush3.bf16.msra.mxu1 %v1453_v2  ;;  %s1638_s13 = scalar_lea.vmem %s1961_s4, %s1247_s10 }
  0x11   : > { %v1456_v4 = vld [vmem:[%s1550_s30] sm:$0xff]   ;;  %1363 = vmatprep.subr.bf16.mxu0 %v1454_v3  ;;  %1434 = vmatprep.subr.bf16.mxu1 %v1454_v3  ;;  %v1458_v8 = vld [vmem:[%s1550_s30 + $0x8] sm:$0xff]   ;;  %v1460_v10 = vld [vmem:[%s1550_s30 + $0x10] sm:$0xff]  }
  0x12   : > { %v1457_v5 = vld [vmem:[%s1550_s30 + $0x80] sm:$0xff]   ;;  %1367 = vmatprep.mubr.msk.bf16.mxu0 %vm470_vm0, %v1456_v4  ;;  %v1459_v9 = vld [vmem:[%s1550_s30 + $0x88] sm:$0xff]   ;;  %v1461_v11 = vld [vmem:[%s1550_s30 + $0x90] sm:$0xff]  }
  0x13   : > { %1399 = vmatprep.mubr.msk.bf16.mxu1 %vm470_vm0, %v1457_v5  ;;  %v1462_v12 = vld [vmem:[%s1550_s30 + $0x18] sm:$0xff]   ;;  %v1464_v14 = vld [vmem:[%s1550_s30 + $0x20] sm:$0xff]   ;;  %v1466_v16 = vld [vmem:[%s1550_s30 + $0x28] sm:$0xff]  }
  0x14   : > { %1364 = vmatpush3.bf16.msra.mxu0 %v1454_v3  ;;  %1439 = vmatpush3.bf16.msra.mxu1 %v1454_v3  ;;  %v1463_v13 = vld [vmem:[%s1550_s30 + $0x98] sm:$0xff]   ;;  %v1465_v15 = vld [vmem:[%s1550_s30 + $0xa0] sm:$0xff]   ;;  %v1467_v17 = vld [vmem:[%s1550_s30 + $0xa8] sm:$0xff]  }
  0x15   : > { %1441 = vmatprep.subr.msk.bf16.mxu0 %vm567_vm1, %v1455_v6  ;;  %1442 = vmatprep.subr.msk.bf16.mxu1 %vm567_vm1, %v1455_v6  ;;  %v1468_v18 = vld [vmem:[%s1550_s30 + $0x30] sm:$0xff]   ;;  %v1470_v20 = vld [vmem:[%s1550_s30 + $0x38] sm:$0xff]   ;;  %v1472_v22 = vld [vmem:[%s1550_s30 + $0x40] sm:$0xff]  }
  0x16   : > { %v1469_v19 = vld [vmem:[%s1550_s30 + $0xb0] sm:$0xff]   ;;  %v1471_v21 = vld [vmem:[%s1550_s30 + $0xb8] sm:$0xff]   ;;  %v1473_v23 = vld [vmem:[%s1550_s30 + $0xc0] sm:$0xff]  }
  0x17   : > { %v1474_v24 = vld [vmem:[%s1550_s30 + $0x48] sm:$0xff]   ;;  %v1476_v26 = vld [vmem:[%s1550_s30 + $0x50] sm:$0xff]   ;;  %v1478_v28 = vld [vmem:[%s1550_s30 + $0x58] sm:$0xff]  }
  0x18   : > { %1366 = vmatpush3.bf16.msra.mxu0 %v569_v7  ;;  %1440 = vmatpush3.bf16.msra.mxu1 %v569_v7  ;;  %v1475_v25 = vld [vmem:[%s1550_s30 + $0xc8] sm:$0xff]   ;;  %v1477_v27 = vld [vmem:[%s1550_s30 + $0xd0] sm:$0xff]   ;;  %v1479_v29 = vld [vmem:[%s1550_s30 + $0xd8] sm:$0xff]  }
  0x19   : > { %v1480_v30 = vld [vmem:[%s1550_s30 + $0x60] sm:$0xff]   ;;  %v1482_v32 = vld [vmem:[%s1550_s30 + $0x68] sm:$0xff]   ;;  %v1484_v34 = vld [vmem:[%s1550_s30 + $0x70] sm:$0xff]  }
  0x1a   : > { %v1481_v31 = vld [vmem:[%s1550_s30 + $0xe0] sm:$0xff]   ;;  %v1483_v33 = vld [vmem:[%s1550_s30 + $0xe8] sm:$0xff]   ;;  %v1485_v35 = vld [vmem:[%s1550_s30 + $0xf0] sm:$0xff]  }
  0x1b   : > { %1368 = vmatmul.mubr.msk.bf16.vlgmr.msra.gmra.mrb[0].mxu0 %vm470_vm0, %v1458_v8  ;;  %1400 = vmatmul.mubr.msk.bf16.vlgmr.msra.gmra.mrb[0].mxu1 %vm470_vm0, %v1459_v9  ;;  %v1486_v36 = vld [vmem:[%s1550_s30 + $0x78] sm:$0xff]  }
  0x1c   : > { %1371 = vmatprep.mubr.msk.bf16.mxu0 %vm470_vm0, %v1460_v10  ;;  %1403 = vmatprep.mubr.msk.bf16.mxu1 %vm470_vm0, %v1461_v11  ;;  %v1487_v37 = vld [vmem:[%s1550_s30 + $0xf8] sm:$0xff]  }
  0x23   : > { %1372 = vmatmul.mubr.msk.bf16.gmra.mrb[4].mxu0 %vm470_vm0, %v1462_v12  ;;  %1404 = vmatmul.mubr.msk.bf16.gmra.mrb[4].mxu1 %vm470_vm0, %v1463_v13 }
  0x24   : > { %1375 = vmatprep.mubr.msk.bf16.mxu0 %vm470_vm0, %v1464_v14  ;;  %1407 = vmatprep.mubr.msk.bf16.mxu1 %vm470_vm0, %v1465_v15 }
  0x2b   : > { %1376 = vmatmul.mubr.msk.bf16.gmra.mrb[8].mxu0 %vm470_vm0, %v1466_v16  ;;  %1408 = vmatmul.mubr.msk.bf16.gmra.mrb[8].mxu1 %vm470_vm0, %v1467_v17 }
  0x2c   : > { %1379 = vmatprep.mubr.msk.bf16.mxu0 %vm470_vm0, %v1468_v18  ;;  %1411 = vmatprep.mubr.msk.bf16.mxu1 %vm470_vm0, %v1469_v19 }
  0x33   : > { %1380 = vmatmul.mubr.msk.bf16.gmra.mrb[12].mxu0 %vm470_vm0, %v1470_v20  ;;  %1412 = vmatmul.mubr.msk.bf16.gmra.mrb[12].mxu1 %vm470_vm0, %v1471_v21 }
  0x34   : > { %1383 = vmatprep.mubr.msk.bf16.mxu0 %vm470_vm0, %v1472_v22  ;;  %1415 = vmatprep.mubr.msk.bf16.mxu1 %vm470_vm0, %v1473_v23 }
  0x3b   : > { %1384 = vmatmul.mubr.msk.bf16.gmra.mrb[16].mxu0 %vm470_vm0, %v1474_v24  ;;  %1416 = vmatmul.mubr.msk.bf16.gmra.mrb[16].mxu1 %vm470_vm0, %v1475_v25 }
  0x3c   : > { %1387 = vmatprep.mubr.msk.bf16.mxu0 %vm470_vm0, %v1476_v26  ;;  %1419 = vmatprep.mubr.msk.bf16.mxu1 %vm470_vm0, %v1477_v27 }
  0x43   : > { %1388 = vmatmul.mubr.msk.bf16.gmra.mrb[20].mxu0 %vm470_vm0, %v1478_v28  ;;  %1420 = vmatmul.mubr.msk.bf16.gmra.mrb[20].mxu1 %vm470_vm0, %v1479_v29 }
  0x44   : > { %1391 = vmatprep.mubr.msk.bf16.mxu0 %vm470_vm0, %v1480_v30  ;;  %1423 = vmatprep.mubr.msk.bf16.mxu1 %vm470_vm0, %v1481_v31 }
  0x4b   : > { %1392 = vmatmul.mubr.msk.bf16.gmra.mrb[24].mxu0 %vm470_vm0, %v1482_v32  ;;  %1424 = vmatmul.mubr.msk.bf16.gmra.mrb[24].mxu1 %vm470_vm0, %v1483_v33 }
  0x4c   : > { %1395 = vmatprep.mubr.msk.bf16.mxu0 %vm470_vm0, %v1484_v34  ;;  %1427 = vmatprep.mubr.msk.bf16.mxu1 %vm470_vm0, %v1485_v35 }
  0x53   : > { %1396 = vmatmul.mubr.msk.bf16.gmra.mrb[28].mxu0 %vm470_vm0, %v1486_v36  ;;  %1428 = vmatmul.mubr.msk.bf16.gmra.mrb[28].mxu1 %vm470_vm0, %v1487_v37 }
  0xee   : > { %v1369_v39 = vpop.f32.mrb[0].mxu0  ;;  %v1401_v40 = vpop.f32.mrb[0].mxu1 }
  0xef   : > { %v614_v41 = vadd.f32 %v1369_v39, %v1622_v38  ;;  %v742_v42 = vadd.f32 %v1401_v40, %v1622_v38  ;;  %v605_v43 = vpop.f32.mrb[1].mxu0  ;;  %v733_v44 = vpop.f32.mrb[1].mxu1 }
  0xf0   : > { %v606_v46 = vadd.f32 %v1622_v38, %v605_v43  ;;  %v734_v47 = vadd.f32 %v1622_v38, %v733_v44  ;;  %v1370_v48 = vpop.f32.mrb[2].mxu0  ;;  %v1402_v49 = vpop.f32.mrb[2].mxu1 }
  0xf1   : > { %v863_v50 = vmax.f32 %v614_v41, 0.0  ;;  %v927_v51 = vmin.f32 %v614_v41, 0.0  ;;  %v895_v52 = vmax.f32 %v742_v42, 0.0  ;;  %v959_v53 = vmin.f32 %v742_v42, 0.0  ;;  %v608_v54 = vpop.f32.mrb[3].mxu0  ;;  %v736_v55 = vpop.f32.mrb[3].mxu1 }
  0xf2   : > { %v861_v56 = vmax.f32 %v606_v46, 0.0  ;;  %v925_v57 = vmin.f32 %v606_v46, 0.0  ;;  %v893_v58 = vmax.f32 %v734_v47, 0.0  ;;  %v957_v59 = vmin.f32 %v734_v47, 0.0 }
  0xf3   : > { %v992_v60 = vmul.f32 %v1627_v45, %v927_v51  ;;  %v1024_v61 = vmul.f32 %v1627_v45, %v959_v53  ;;  %v617_v62 = vadd.f32 %v1370_v48, %v1622_v38  ;;  %v745_v63 = vadd.f32 %v1402_v49, %v1622_v38 }
  0xf4   : > { %v990_v0 = vmul.f32 %v1627_v45, %v925_v57  ;;  %v1022_v1 = vmul.f32 %v1627_v45, %v957_v59  ;;  %v609_v2 = vadd.f32 %v1622_v38, %v608_v54  ;;  %v737_v3 = vadd.f32 %v1622_v38, %v736_v55 }
  0xf5   : > { %v1056_v4 = vadd.f32 %v992_v60, %v863_v50  ;;  %v1088_v5 = vadd.f32 %v1024_v61, %v895_v52  ;;  %v928_v6 = vmin.f32 %v617_v62, 0.0  ;;  %v864_v9 = vmax.f32 %v617_v62, 0.0 }
  0xf6   : > { %v1054_v7 = vadd.f32 %v990_v0, %v861_v56  ;;  %v1086_v8 = vadd.f32 %v1022_v1, %v893_v58  ;;  %v960_v10 = vmin.f32 %v745_v63, 0.0  ;;  %v1373_v11 = vpop.f32.mrb[4].mxu0  ;;  %v1405_v12 = vpop.f32.mrb[4].mxu1  ;;  %v896_v14 = vmax.f32 %v745_v63, 0.0 }
  0xf7   : > { %1121 = vst.msk [vmem:[%s1638_s13 + $0x10] sm:$0xff] %vm1118_vm2, %v1056_v4  ;;  %1153 = vst.msk [vmem:[%s1638_s13 + $0x110] sm:$0xff] %vm1118_vm2, %v1088_v5  ;;  %v993_v13 = vmul.f32 %v1627_v45, %v928_v6  ;;  %v862_v15 = vmax.f32 %v609_v2, 0.0  ;;  %v926_v16 = vmin.f32 %v609_v2, 0.0  ;;  %v621_v17 = vpop.f32.mrb[5].mxu0  ;;  %v749_v18 = vpop.f32.mrb[5].mxu1  ;;  %v630_v21 = vadd.f32 %v1373_v11, %v1622_v38 }
  0xf8   : > { %1119 = vst.msk [vmem:[%s1638_s13] sm:$0xff] %vm1118_vm2, %v1054_v7  ;;  %1151 = vst.msk [vmem:[%s1638_s13 + $0x100] sm:$0xff] %vm1118_vm2, %v1086_v8  ;;  %v1025_v19 = vmul.f32 %v1627_v45, %v960_v10  ;;  %v958_v20 = vmin.f32 %v737_v3, 0.0  ;;  %v758_v22 = vadd.f32 %v1405_v12, %v1622_v38  ;;  %v1374_v23 = vpop.f32.mrb[6].mxu0  ;;  %v1406_v24 = vpop.f32.mrb[6].mxu1  ;;  %v622_v27 = vadd.f32 %v1622_v38, %v621_v17 }
  0xf9   : > { %v1057_v25 = vadd.f32 %v993_v13, %v864_v9  ;;  %v991_v26 = vmul.f32 %v1627_v45, %v926_v16  ;;  %v750_v28 = vadd.f32 %v1622_v38, %v749_v18  ;;  %v624_v29 = vpop.f32.mrb[7].mxu0  ;;  %v752_v30 = vpop.f32.mrb[7].mxu1  ;;  %v894_v32 = vmax.f32 %v737_v3, 0.0 }
  0xfa   : > { %v1089_v31 = vadd.f32 %v1025_v19, %v896_v14  ;;  %v1023_v33 = vmul.f32 %v1627_v45, %v958_v20  ;;  %v931_v34 = vmin.f32 %v630_v21, 0.0  ;;  %v867_v36 = vmax.f32 %v630_v21, 0.0 }
  0xfb   : > { %1122 = vst.msk [vmem:[%s1638_s13 + $0x18] sm:$0xff] %vm1118_vm2, %v1057_v25  ;;  %v1055_v35 = vadd.f32 %v991_v26, %v862_v15  ;;  %v899_v37 = vmax.f32 %v758_v22, 0.0  ;;  %v963_v39 = vmin.f32 %v758_v22, 0.0  ;;  %v865_v42 = vmax.f32 %v622_v27, 0.0 }
  0xfc   : > { %1154 = vst.msk [vmem:[%s1638_s13 + $0x118] sm:$0xff] %vm1118_vm2, %v1089_v31  ;;  %v1087_v40 = vadd.f32 %v1023_v33, %v894_v32  ;;  %v996_v41 = vmul.f32 %v1627_v45, %v931_v34  ;;  %v929_v43 = vmin.f32 %v622_v27, 0.0  ;;  %v961_v46 = vmin.f32 %v750_v28, 0.0 }
  0xfd   : > { %1120 = vst.msk [vmem:[%s1638_s13 + $0x8] sm:$0xff] %vm1118_vm2, %v1055_v35  ;;  %v1028_v44 = vmul.f32 %v1627_v45, %v963_v39  ;;  %v633_v47 = vadd.f32 %v1374_v23, %v1622_v38  ;;  %v761_v48 = vadd.f32 %v1406_v24, %v1622_v38  ;;  %v625_v51 = vadd.f32 %v1622_v38, %v624_v29 }
  0xfe   : > { %1152 = vst.msk [vmem:[%s1638_s13 + $0x108] sm:$0xff] %vm1118_vm2, %v1087_v40  ;;  %v1060_v49 = vadd.f32 %v996_v41, %v867_v36  ;;  %v994_v50 = vmul.f32 %v1627_v45, %v929_v43  ;;  %v753_v52 = vadd.f32 %v1622_v38, %v752_v30  ;;  %v1377_v53 = vpop.f32.mrb[8].mxu0  ;;  %v1409_v54 = vpop.f32.mrb[8].mxu1  ;;  %v897_v56 = vmax.f32 %v750_v28, 0.0 }
  0xff   : > { %v1092_v55 = vadd.f32 %v1028_v44, %v899_v37  ;;  %v1026_v57 = vmul.f32 %v1627_v45, %v961_v46  ;;  %v932_v58 = vmin.f32 %v633_v47, 0.0  ;;  %v637_v59 = vpop.f32.mrb[9].mxu0  ;;  %v765_v60 = vpop.f32.mrb[9].mxu1  ;;  %v868_v62 = vmax.f32 %v633_v47, 0.0 }
 0x100   : > { %1125 = vst.msk [vmem:[%s1638_s13 + $0x30] sm:$0xff] %vm1118_vm2, %v1060_v49  ;;  %v1058_v61 = vadd.f32 %v994_v50, %v865_v42  ;;  %v900_v63 = vmax.f32 %v761_v48, 0.0  ;;  %v964_v0 = vmin.f32 %v761_v48, 0.0  ;;  %v1378_v1 = vpop.f32.mrb[10].mxu0  ;;  %v1410_v2 = vpop.f32.mrb[10].mxu1  ;;  %v866_v5 = vmax.f32 %v625_v51, 0.0 }
 0x101   : > { %1157 = vst.msk [vmem:[%s1638_s13 + $0x130] sm:$0xff] %vm1118_vm2, %v1092_v55  ;;  %v1090_v3 = vadd.f32 %v1026_v57, %v897_v56  ;;  %v997_v4 = vmul.f32 %v1627_v45, %v932_v58  ;;  %v930_v6 = vmin.f32 %v625_v51, 0.0  ;;  %v640_v7 = vpop.f32.mrb[11].mxu0  ;;  %v768_v8 = vpop.f32.mrb[11].mxu1  ;;  %v962_v10 = vmin.f32 %v753_v52, 0.0 }
 0x102   : > { %1123 = vst.msk [vmem:[%s1638_s13 + $0x20] sm:$0xff] %vm1118_vm2, %v1058_v61  ;;  %v1029_v9 = vmul.f32 %v1627_v45, %v964_v0  ;;  %v646_v11 = vadd.f32 %v1377_v53, %v1622_v38  ;;  %v774_v12 = vadd.f32 %v1409_v54, %v1622_v38  ;;  %v638_v15 = vadd.f32 %v1622_v38, %v637_v59 }
 0x103   : > { %1155 = vst.msk [vmem:[%s1638_s13 + $0x120] sm:$0xff] %vm1118_vm2, %v1090_v3  ;;  %v1061_v13 = vadd.f32 %v997_v4, %v868_v62  ;;  %v995_v14 = vmul.f32 %v1627_v45, %v930_v6  ;;  %v766_v16 = vadd.f32 %v1622_v38, %v765_v60  ;;  %v898_v18 = vmax.f32 %v753_v52, 0.0 }
 0x104   : > { %v1093_v17 = vadd.f32 %v1029_v9, %v900_v63  ;;  %v1027_v19 = vmul.f32 %v1627_v45, %v962_v10  ;;  %v935_v20 = vmin.f32 %v646_v11, 0.0  ;;  %v871_v22 = vmax.f32 %v646_v11, 0.0 }
 0x105   : > { %1126 = vst.msk [vmem:[%s1638_s13 + $0x38] sm:$0xff] %vm1118_vm2, %v1061_v13  ;;  %v1059_v21 = vadd.f32 %v995_v14, %v866_v5  ;;  %v903_v23 = vmax.f32 %v774_v12, 0.0  ;;  %v967_v24 = vmin.f32 %v774_v12, 0.0  ;;  %v869_v27 = vmax.f32 %v638_v15, 0.0 }
 0x106   : > { %1158 = vst.msk [vmem:[%s1638_s13 + $0x138] sm:$0xff] %vm1118_vm2, %v1093_v17  ;;  %v1091_v25 = vadd.f32 %v1027_v19, %v898_v18  ;;  %v1000_v26 = vmul.f32 %v1627_v45, %v935_v20  ;;  %v933_v28 = vmin.f32 %v638_v15, 0.0  ;;  %v1381_v29 = vpop.f32.mrb[12].mxu0  ;;  %v1413_v30 = vpop.f32.mrb[12].mxu1  ;;  %v965_v32 = vmin.f32 %v766_v16, 0.0 }
 0x107   : > { %1124 = vst.msk [vmem:[%s1638_s13 + $0x28] sm:$0xff] %vm1118_vm2, %v1059_v21  ;;  %v1032_v31 = vmul.f32 %v1627_v45, %v967_v24  ;;  %v649_v33 = vadd.f32 %v1378_v1, %v1622_v38  ;;  %v777_v34 = vadd.f32 %v1410_v2, %v1622_v38  ;;  %v653_v35 = vpop.f32.mrb[13].mxu0  ;;  %v781_v36 = vpop.f32.mrb[13].mxu1  ;;  %v641_v40 = vadd.f32 %v1622_v38, %v640_v7 }
 0x108   : > { %1156 = vst.msk [vmem:[%s1638_s13 + $0x128] sm:$0xff] %vm1118_vm2, %v1091_v25  ;;  %v1064_v37 = vadd.f32 %v1000_v26, %v871_v22  ;;  %v998_v39 = vmul.f32 %v1627_v45, %v933_v28  ;;  %v769_v41 = vadd.f32 %v1622_v38, %v768_v8  ;;  %v1382_v42 = vpop.f32.mrb[14].mxu0  ;;  %v1414_v43 = vpop.f32.mrb[14].mxu1  ;;  %v901_v46 = vmax.f32 %v766_v16, 0.0 }
 0x109   : > { %v1096_v44 = vadd.f32 %v1032_v31, %v903_v23  ;;  %v1030_v47 = vmul.f32 %v1627_v45, %v965_v32  ;;  %v936_v48 = vmin.f32 %v649_v33, 0.0  ;;  %v656_v49 = vpop.f32.mrb[15].mxu0  ;;  %v784_v50 = vpop.f32.mrb[15].mxu1  ;;  %v872_v52 = vmax.f32 %v649_v33, 0.0 }
 0x10a   : > { %1129 = vst.msk [vmem:[%s1638_s13 + $0x50] sm:$0xff] %vm1118_vm2, %v1064_v37  ;;  %v1062_v51 = vadd.f32 %v998_v39, %v869_v27  ;;  %v904_v53 = vmax.f32 %v777_v34, 0.0  ;;  %v968_v54 = vmin.f32 %v777_v34, 0.0  ;;  %v870_v57 = vmax.f32 %v641_v40, 0.0 }
 0x10b   : > { %1161 = vst.msk [vmem:[%s1638_s13 + $0x150] sm:$0xff] %vm1118_vm2, %v1096_v44  ;;  %v1094_v55 = vadd.f32 %v1030_v47, %v901_v46  ;;  %v1001_v56 = vmul.f32 %v1627_v45, %v936_v48  ;;  %v934_v58 = vmin.f32 %v641_v40, 0.0  ;;  %v966_v60 = vmin.f32 %v769_v41, 0.0 }
 0x10c   : > { %1127 = vst.msk [vmem:[%s1638_s13 + $0x40] sm:$0xff] %vm1118_vm2, %v1062_v51  ;;  %v1033_v59 = vmul.f32 %v1627_v45, %v968_v54  ;;  %v662_v61 = vadd.f32 %v1381_v29, %v1622_v38  ;;  %v790_v62 = vadd.f32 %v1413_v30, %v1622_v38  ;;  %v654_v1 = vadd.f32 %v1622_v38, %v653_v35 }
 0x10d   : > { %1159 = vst.msk [vmem:[%s1638_s13 + $0x140] sm:$0xff] %vm1118_vm2, %v1094_v55  ;;  %v1065_v63 = vadd.f32 %v1001_v56, %v872_v52  ;;  %v999_v0 = vmul.f32 %v1627_v45, %v934_v58  ;;  %v782_v2 = vadd.f32 %v1622_v38, %v781_v36  ;;  %v902_v4 = vmax.f32 %v769_v41, 0.0 }
 0x10e   : > { %v1097_v3 = vadd.f32 %v1033_v59, %v904_v53  ;;  %v1031_v5 = vmul.f32 %v1627_v45, %v966_v60  ;;  %v939_v6 = vmin.f32 %v662_v61, 0.0  ;;  %v1385_v7 = vpop.f32.mrb[16].mxu0  ;;  %v1417_v8 = vpop.f32.mrb[16].mxu1  ;;  %v875_v10 = vmax.f32 %v662_v61, 0.0 }
 0x10f   : > { %1130 = vst.msk [vmem:[%s1638_s13 + $0x58] sm:$0xff] %vm1118_vm2, %v1065_v63  ;;  %v1063_v9 = vadd.f32 %v999_v0, %v870_v57  ;;  %v907_v11 = vmax.f32 %v790_v62, 0.0  ;;  %v971_v12 = vmin.f32 %v790_v62, 0.0  ;;  %v669_v13 = vpop.f32.mrb[17].mxu0  ;;  %v797_v14 = vpop.f32.mrb[17].mxu1  ;;  %v873_v17 = vmax.f32 %v654_v1, 0.0 }
 0x110   : > { %1162 = vst.msk [vmem:[%s1638_s13 + $0x158] sm:$0xff] %vm1118_vm2, %v1097_v3  ;;  %v1095_v15 = vadd.f32 %v1031_v5, %v902_v4  ;;  %v1004_v16 = vmul.f32 %v1627_v45, %v939_v6  ;;  %v937_v18 = vmin.f32 %v654_v1, 0.0  ;;  %v1729_v19 = vpop.f32.mrb[18].mxu0  ;;  %v1731_v20 = vpop.f32.mrb[18].mxu1  ;;  %v969_v22 = vmin.f32 %v782_v2, 0.0 }
 0x111   : > { %1128 = vst.msk [vmem:[%s1638_s13 + $0x48] sm:$0xff] %vm1118_vm2, %v1063_v9  ;;  %v1036_v21 = vmul.f32 %v1627_v45, %v971_v12  ;;  %v665_v23 = vadd.f32 %v1382_v42, %v1622_v38  ;;  %v793_v24 = vadd.f32 %v1414_v43, %v1622_v38  ;;  %v672_v25 = vpop.f32.mrb[19].mxu0  ;;  %v800_v26 = vpop.f32.mrb[19].mxu1  ;;  %v657_v29 = vadd.f32 %v1622_v38, %v656_v49 }
 0x112   : > { %1160 = vst.msk [vmem:[%s1638_s13 + $0x148] sm:$0xff] %vm1118_vm2, %v1095_v15  ;;  %v1068_v27 = vadd.f32 %v1004_v16, %v875_v10  ;;  %v1002_v28 = vmul.f32 %v1627_v45, %v937_v18  ;;  %v785_v30 = vadd.f32 %v1622_v38, %v784_v50  ;;  %v905_v32 = vmax.f32 %v782_v2, 0.0 }
 0x113   : > { %v1100_v31 = vadd.f32 %v1036_v21, %v907_v11  ;;  %v1034_v33 = vmul.f32 %v1627_v45, %v969_v22  ;;  %v940_v34 = vmin.f32 %v665_v23, 0.0  ;;  %v876_v36 = vmax.f32 %v665_v23, 0.0 }
 0x114   : > { %1133 = vst.msk [vmem:[%s1638_s13 + $0x70] sm:$0xff] %vm1118_vm2, %v1068_v27  ;;  %v1066_v35 = vadd.f32 %v1002_v28, %v873_v17  ;;  %v908_v37 = vmax.f32 %v793_v24, 0.0  ;;  %v972_v39 = vmin.f32 %v793_v24, 0.0  ;;  %v874_v42 = vmax.f32 %v657_v29, 0.0 }
 0x115   : > { %1165 = vst.msk [vmem:[%s1638_s13 + $0x170] sm:$0xff] %vm1118_vm2, %v1100_v31  ;;  %v1098_v40 = vadd.f32 %v1034_v33, %v905_v32  ;;  %v1005_v41 = vmul.f32 %v1627_v45, %v940_v34  ;;  %v938_v43 = vmin.f32 %v657_v29, 0.0  ;;  %v970_v46 = vmin.f32 %v785_v30, 0.0 }
 0x116   : > { %1131 = vst.msk [vmem:[%s1638_s13 + $0x60] sm:$0xff] %vm1118_vm2, %v1066_v35  ;;  %v1037_v44 = vmul.f32 %v1627_v45, %v972_v39  ;;  %v678_v47 = vadd.f32 %v1385_v7, %v1622_v38  ;;  %v806_v48 = vadd.f32 %v1417_v8, %v1622_v38  ;;  %v1389_v49 = vpop.f32.mrb[20].mxu0  ;;  %v1421_v50 = vpop.f32.mrb[20].mxu1  ;;  %v670_v53 = vadd.f32 %v1622_v38, %v669_v13 }
 0x117   : > { %1163 = vst.msk [vmem:[%s1638_s13 + $0x160] sm:$0xff] %vm1118_vm2, %v1098_v40  ;;  %v1069_v51 = vadd.f32 %v1005_v41, %v876_v36  ;;  %v1003_v52 = vmul.f32 %v1627_v45, %v938_v43  ;;  %v798_v54 = vadd.f32 %v1622_v38, %v797_v14  ;;  %v685_v55 = vpop.f32.mrb[21].mxu0  ;;  %v813_v56 = vpop.f32.mrb[21].mxu1  ;;  %v906_v58 = vmax.f32 %v785_v30, 0.0 }
 0x118   : > { %v1101_v57 = vadd.f32 %v1037_v44, %v908_v37  ;;  %v1035_v59 = vmul.f32 %v1627_v45, %v970_v46  ;;  %v943_v60 = vmin.f32 %v678_v47, 0.0  ;;  %v1760_v61 = vpop.f32.mrb[22].mxu0  ;;  %v1762_v62 = vpop.f32.mrb[22].mxu1  ;;  %v879_v0 = vmax.f32 %v678_v47, 0.0 }
 0x119   : > { %1134 = vst.msk [vmem:[%s1638_s13 + $0x78] sm:$0xff] %vm1118_vm2, %v1069_v51  ;;  %v1067_v63 = vadd.f32 %v1003_v52, %v874_v42  ;;  %v911_v1 = vmax.f32 %v806_v48, 0.0  ;;  %v975_v2 = vmin.f32 %v806_v48, 0.0  ;;  %v1766_v3 = vpop.f32.mrb[23].mxu0  ;;  %v1768_v4 = vpop.f32.mrb[23].mxu1  ;;  %v877_v7 = vmax.f32 %v670_v53, 0.0 }
 0x11a   : > { %1166 = vst.msk [vmem:[%s1638_s13 + $0x178] sm:$0xff] %vm1118_vm2, %v1101_v57  ;;  %v1099_v5 = vadd.f32 %v1035_v59, %v906_v58  ;;  %v1008_v6 = vmul.f32 %v1627_v45, %v943_v60  ;;  %v941_v8 = vmin.f32 %v670_v53, 0.0  ;;  %v973_v10 = vmin.f32 %v798_v54, 0.0 }
 0x11b   : > { %1132 = vst.msk [vmem:[%s1638_s13 + $0x68] sm:$0xff] %vm1118_vm2, %v1067_v63  ;;  %v1040_v9 = vmul.f32 %v1627_v45, %v975_v2  ;;  %v681_v11 = vadd.f32 %v1729_v19, %v1622_v38  ;;  %v809_v12 = vadd.f32 %v1731_v20, %v1622_v38  ;;  %v673_v15 = vadd.f32 %v1622_v38, %v672_v25 }
 0x11c   : > { %1164 = vst.msk [vmem:[%s1638_s13 + $0x168] sm:$0xff] %vm1118_vm2, %v1099_v5  ;;  %v1072_v13 = vadd.f32 %v1008_v6, %v879_v0  ;;  %v1006_v14 = vmul.f32 %v1627_v45, %v941_v8  ;;  %v801_v16 = vadd.f32 %v1622_v38, %v800_v26  ;;  %v909_v18 = vmax.f32 %v798_v54, 0.0 }
 0x11d   : > { %v1104_v17 = vadd.f32 %v1040_v9, %v911_v1  ;;  %v1038_v21 = vmul.f32 %v1627_v45, %v973_v10  ;;  %v944_v22 = vmin.f32 %v681_v11, 0.0  ;;  %v880_v20 = vmax.f32 %v681_v11, 0.0 }
 0x11e   : > { %1137 = vst.msk [vmem:[%s1638_s13 + $0x90] sm:$0xff] %vm1118_vm2, %v1072_v13  ;;  %v1070_v19 = vadd.f32 %v1006_v14, %v877_v7  ;;  %v912_v23 = vmax.f32 %v809_v12, 0.0  ;;  %v976_v24 = vmin.f32 %v809_v12, 0.0  ;;  %v1788_v27 = vpop.f32.mrb[24].mxu0  ;;  %v1790_v28 = vpop.f32.mrb[24].mxu1  ;;  %v878_v29 = vmax.f32 %v673_v15, 0.0 }
 0x11f   : > { %1169 = vst.msk [vmem:[%s1638_s13 + $0x190] sm:$0xff] %vm1118_vm2, %v1104_v17  ;;  %v1102_v25 = vadd.f32 %v1038_v21, %v909_v18  ;;  %v1009_v26 = vmul.f32 %v1627_v45, %v944_v22  ;;  %v942_v30 = vmin.f32 %v673_v15, 0.0  ;;  %v1795_v31 = vpop.f32.mrb[25].mxu0  ;;  %v1797_v32 = vpop.f32.mrb[25].mxu1  ;;  %v974_v34 = vmin.f32 %v801_v16, 0.0 }
 0x120   : > { %1135 = vst.msk [vmem:[%s1638_s13 + $0x80] sm:$0xff] %vm1118_vm2, %v1070_v19  ;;  %v1041_v33 = vmul.f32 %v1627_v45, %v976_v24  ;;  %v694_v35 = vadd.f32 %v1389_v49, %v1622_v38  ;;  %v822_v36 = vadd.f32 %v1421_v50, %v1622_v38  ;;  %v1804_v37 = vpop.f32.mrb[26].mxu0  ;;  %v1806_v39 = vpop.f32.mrb[26].mxu1  ;;  %v686_v42 = vadd.f32 %v1622_v38, %v685_v55 }
 0x121   : > { %1167 = vst.msk [vmem:[%s1638_s13 + $0x180] sm:$0xff] %vm1118_vm2, %v1102_v25  ;;  %v1073_v40 = vadd.f32 %v1009_v26, %v880_v20  ;;  %v1007_v41 = vmul.f32 %v1627_v45, %v942_v30  ;;  %v814_v43 = vadd.f32 %v1622_v38, %v813_v56  ;;  %v1813_v44 = vpop.f32.mrb[27].mxu0  ;;  %v1815_v46 = vpop.f32.mrb[27].mxu1  ;;  %v910_v48 = vmax.f32 %v801_v16, 0.0 }
 0x122   : > { %v1105_v47 = vadd.f32 %v1041_v33, %v912_v23  ;;  %v1039_v49 = vmul.f32 %v1627_v45, %v974_v34  ;;  %v947_v50 = vmin.f32 %v694_v35, 0.0  ;;  %v883_v52 = vmax.f32 %v694_v35, 0.0 }
 0x123   : > { %1138 = vst.msk [vmem:[%s1638_s13 + $0x98] sm:$0xff] %vm1118_vm2, %v1073_v40  ;;  %v1071_v51 = vadd.f32 %v1007_v41, %v878_v29  ;;  %v915_v53 = vmax.f32 %v822_v36, 0.0  ;;  %v979_v54 = vmin.f32 %v822_v36, 0.0  ;;  %v881_v57 = vmax.f32 %v686_v42, 0.0 }
 0x124   : > { %1170 = vst.msk [vmem:[%s1638_s13 + $0x198] sm:$0xff] %vm1118_vm2, %v1105_v47  ;;  %v1103_v55 = vadd.f32 %v1039_v49, %v910_v48  ;;  %v1012_v56 = vmul.f32 %v1627_v45, %v947_v50  ;;  %v945_v58 = vmin.f32 %v686_v42, 0.0  ;;  %v977_v60 = vmin.f32 %v814_v43, 0.0 }
 0x125   : > { %1136 = vst.msk [vmem:[%s1638_s13 + $0x88] sm:$0xff] %vm1118_vm2, %v1071_v51  ;;  %v1044_v59 = vmul.f32 %v1627_v45, %v979_v54  ;;  %v697_v63 = vadd.f32 %v1760_v61, %v1622_v38  ;;  %v825_v0 = vadd.f32 %v1762_v62, %v1622_v38  ;;  %v689_v5 = vadd.f32 %v1622_v38, %v1766_v3 }
 0x126   : > { %1168 = vst.msk [vmem:[%s1638_s13 + $0x188] sm:$0xff] %vm1118_vm2, %v1103_v55  ;;  %v1076_v1 = vadd.f32 %v1012_v56, %v883_v52  ;;  %v1010_v2 = vmul.f32 %v1627_v45, %v945_v58  ;;  %v817_v6 = vadd.f32 %v1622_v38, %v1768_v4  ;;  %v1837_v7 = vpop.f32.mrb[28].mxu0  ;;  %v1839_v8 = vpop.f32.mrb[28].mxu1  ;;  %v913_v9 = vmax.f32 %v814_v43, 0.0 }
 0x127   : > { %v1108_v61 = vadd.f32 %v1044_v59, %v915_v53  ;;  %v1042_v62 = vmul.f32 %v1627_v45, %v977_v60  ;;  %v948_v10 = vmin.f32 %v697_v63, 0.0  ;;  %v1842_v11 = vpop.f32.mrb[29].mxu0  ;;  %v1844_v12 = vpop.f32.mrb[29].mxu1  ;;  %v884_v13 = vmax.f32 %v697_v63, 0.0 }
 0x128   : > { %1141 = vst.msk [vmem:[%s1638_s13 + $0xb0] sm:$0xff] %vm1118_vm2, %v1076_v1  ;;  %v1074_v3 = vadd.f32 %v1010_v2, %v881_v57  ;;  %v916_v4 = vmax.f32 %v825_v0, 0.0  ;;  %v980_v14 = vmin.f32 %v825_v0, 0.0  ;;  %v1848_v15 = vpop.f32.mrb[30].mxu0  ;;  %v1850_v16 = vpop.f32.mrb[30].mxu1  ;;  %v882_v21 = vmax.f32 %v689_v5, 0.0 }
 0x129   : > { %1173 = vst.msk [vmem:[%s1638_s13 + $0x1b0] sm:$0xff] %vm1118_vm2, %v1108_v61  ;;  %v1106_v17 = vadd.f32 %v1042_v62, %v913_v9  ;;  %v1013_v18 = vmul.f32 %v1627_v45, %v948_v10  ;;  %v946_v22 = vmin.f32 %v689_v5, 0.0  ;;  %v1855_v19 = vpop.f32.mrb[31].mxu0  ;;  %v1857_v20 = vpop.f32.mrb[31].mxu1  ;;  %v978_v24 = vmin.f32 %v817_v6, 0.0 }
 0x12a   : > { %1139 = vst.msk [vmem:[%s1638_s13 + $0xa0] sm:$0xff] %vm1118_vm2, %v1074_v3  ;;  %v1045_v23 = vmul.f32 %v1627_v45, %v980_v14  ;;  %v710_v25 = vadd.f32 %v1788_v27, %v1622_v38  ;;  %v838_v26 = vadd.f32 %v1790_v28, %v1622_v38  ;;  %v702_v33 = vadd.f32 %v1622_v38, %v1795_v31 }
 0x12b   : > { %1171 = vst.msk [vmem:[%s1638_s13 + $0x1a0] sm:$0xff] %vm1118_vm2, %v1106_v17  ;;  %v1077_v29 = vadd.f32 %v1013_v18, %v884_v13  ;;  %v1011_v30 = vmul.f32 %v1627_v45, %v946_v22  ;;  %v830_v34 = vadd.f32 %v1622_v38, %v1797_v32  ;;  %v914_v36 = vmax.f32 %v817_v6, 0.0 }
 0x12c   : > { %v1109_v35 = vadd.f32 %v1045_v23, %v916_v4  ;;  %v1043_v27 = vmul.f32 %v1627_v45, %v978_v24  ;;  %v951_v40 = vmin.f32 %v710_v25, 0.0  ;;  %v887_v41 = vmax.f32 %v710_v25, 0.0 }
 0x12d   : > { %1142 = vst.msk [vmem:[%s1638_s13 + $0xb8] sm:$0xff] %vm1118_vm2, %v1077_v29  ;;  %v1075_v28 = vadd.f32 %v1011_v30, %v882_v21  ;;  %v919_v42 = vmax.f32 %v838_v26, 0.0  ;;  %v983_v43 = vmin.f32 %v838_v26, 0.0  ;;  %v885_v48 = vmax.f32 %v702_v33, 0.0 }
 0x12e   : > { %1174 = vst.msk [vmem:[%s1638_s13 + $0x1b8] sm:$0xff] %vm1118_vm2, %v1109_v35  ;;  %v1107_v47 = vadd.f32 %v1043_v27, %v914_v36  ;;  %v1016_v31 = vmul.f32 %v1627_v45, %v951_v40  ;;  %v949_v32 = vmin.f32 %v702_v33, 0.0  ;;  %v981_v50 = vmin.f32 %v830_v34, 0.0 }
 0x12f   : > { %1140 = vst.msk [vmem:[%s1638_s13 + $0xa8] sm:$0xff] %vm1118_vm2, %v1075_v28  ;;  %v1048_v49 = vmul.f32 %v1627_v45, %v983_v43  ;;  %v713_v51 = vadd.f32 %v1804_v37, %v1622_v38  ;;  %v841_v52 = vadd.f32 %v1806_v39, %v1622_v38  ;;  %v705_v55 = vadd.f32 %v1622_v38, %v1813_v44 }
 0x130   : > { %1172 = vst.msk [vmem:[%s1638_s13 + $0x1a8] sm:$0xff] %vm1118_vm2, %v1107_v47  ;;  %v1080_v53 = vadd.f32 %v1016_v31, %v887_v41  ;;  %v1014_v54 = vmul.f32 %v1627_v45, %v949_v32  ;;  %v833_v56 = vadd.f32 %v1622_v38, %v1815_v46  ;;  %v917_v58 = vmax.f32 %v830_v34, 0.0 }
 0x131   : > { %v1112_v57 = vadd.f32 %v1048_v49, %v919_v42  ;;  %v1046_v37 = vmul.f32 %v1627_v45, %v981_v50  ;;  %v952_v59 = vmin.f32 %v713_v51, 0.0  ;;  %v888_v60 = vmax.f32 %v713_v51, 0.0 }
 0x132   : > { %1145 = vst.msk [vmem:[%s1638_s13 + $0xd0] sm:$0xff] %vm1118_vm2, %v1080_v53  ;;  %v1078_v39 = vadd.f32 %v1014_v54, %v885_v48  ;;  %v920_v63 = vmax.f32 %v841_v52, 0.0  ;;  %v984_v0 = vmin.f32 %v841_v52, 0.0  ;;  %v886_v2 = vmax.f32 %v705_v55, 0.0 }
 0x133   : > { %1177 = vst.msk [vmem:[%s1638_s13 + $0x1d0] sm:$0xff] %vm1118_vm2, %v1112_v57  ;;  %v1110_v1 = vadd.f32 %v1046_v37, %v917_v58  ;;  %v1017_v44 = vmul.f32 %v1627_v45, %v952_v59  ;;  %v950_v46 = vmin.f32 %v705_v55, 0.0  ;;  %v982_v6 = vmin.f32 %v833_v56, 0.0 }
 0x134   : > { %1143 = vst.msk [vmem:[%s1638_s13 + $0xc0] sm:$0xff] %vm1118_vm2, %v1078_v39  ;;  %v1049_v5 = vmul.f32 %v1627_v45, %v984_v0  ;;  %v726_v61 = vadd.f32 %v1837_v7, %v1622_v38  ;;  %v854_v9 = vadd.f32 %v1839_v8, %v1622_v38  ;;  %v718_v3 = vadd.f32 %v1622_v38, %v1842_v11 }
 0x135   : > { %1175 = vst.msk [vmem:[%s1638_s13 + $0x1c0] sm:$0xff] %vm1118_vm2, %v1110_v1  ;;  %v1081_v62 = vadd.f32 %v1017_v44, %v888_v60  ;;  %v1015_v10 = vmul.f32 %v1627_v45, %v950_v46  ;;  %v846_v13 = vadd.f32 %v1622_v38, %v1844_v12  ;;  %v918_v14 = vmax.f32 %v833_v56, 0.0 }
 0x136   : > { %v1113_v4 = vadd.f32 %v1049_v5, %v920_v63  ;;  %v1047_v7 = vmul.f32 %v1627_v45, %v982_v6  ;;  %v955_v17 = vmin.f32 %v726_v61, 0.0  ;;  %v891_v18 = vmax.f32 %v726_v61, 0.0 }
 0x137   : > { %1146 = vst.msk [vmem:[%s1638_s13 + $0xd8] sm:$0xff] %vm1118_vm2, %v1081_v62  ;;  %v1079_v8 = vadd.f32 %v1015_v10, %v886_v2  ;;  %v923_v21 = vmax.f32 %v854_v9, 0.0  ;;  %v987_v22 = vmin.f32 %v854_v9, 0.0  ;;  %v889_v24 = vmax.f32 %v718_v3, 0.0 }
 0x138   : > { %1178 = vst.msk [vmem:[%s1638_s13 + $0x1d8] sm:$0xff] %vm1118_vm2, %v1113_v4  ;;  %v1111_v23 = vadd.f32 %v1047_v7, %v918_v14  ;;  %v1020_v11 = vmul.f32 %v1627_v45, %v955_v17  ;;  %v953_v12 = vmin.f32 %v718_v3, 0.0  ;;  %v985_v26 = vmin.f32 %v846_v13, 0.0 }
 0x139   : > { %1144 = vst.msk [vmem:[%s1638_s13 + $0xc8] sm:$0xff] %vm1118_vm2, %v1079_v8  ;;  %v1052_v25 = vmul.f32 %v1627_v45, %v987_v22  ;;  %v729_v29 = vadd.f32 %v1848_v15, %v1622_v38  ;;  %v857_v30 = vadd.f32 %v1850_v16, %v1622_v38  ;;  %v721_v35 = vadd.f32 %v1622_v38, %v1855_v19 }
 0x13a   : > { %1176 = vst.msk [vmem:[%s1638_s13 + $0x1c8] sm:$0xff] %vm1118_vm2, %v1111_v23  ;;  %v1084_v33 = vadd.f32 %v1020_v11, %v891_v18  ;;  %v1018_v34 = vmul.f32 %v1627_v45, %v953_v12  ;;  %v849_v36 = vadd.f32 %v1622_v38, %v1857_v20  ;;  %v921_v40 = vmax.f32 %v846_v13, 0.0 }
 0x13b   : > { %v1116_v27 = vadd.f32 %v1052_v25, %v923_v21  ;;  %v1050_v15 = vmul.f32 %v1627_v45, %v985_v26  ;;  %v956_v28 = vmin.f32 %v729_v29, 0.0  ;;  %v988_v41 = vmin.f32 %v857_v30, 0.0 }
 0x13c   : > { %1149 = vst.msk [vmem:[%s1638_s13 + $0xf0] sm:$0xff] %vm1118_vm2, %v1084_v33  ;;  %v1082_v16 = vadd.f32 %v1018_v34, %v889_v24  ;;  %v892_v43 = vmax.f32 %v729_v29, 0.0  ;;  %v954_v47 = vmin.f32 %v721_v35, 0.0  ;;  %v924_v38 = vmax.f32 %v857_v30, 0.0 }
 0x13d   : > { %1181 = vst.msk [vmem:[%s1638_s13 + $0x1f0] sm:$0xff] %vm1118_vm2, %v1116_v27  ;;  %v1114_v42 = vadd.f32 %v1050_v15, %v921_v40  ;;  %v1021_v19 = vmul.f32 %v1627_v45, %v956_v28  ;;  %v1053_v20 = vmul.f32 %v1627_v45, %v988_v41  ;;  %v986_v31 = vmin.f32 %v849_v36, 0.0 }
 0x13e   : > { %1147 = vst.msk [vmem:[%s1638_s13 + $0xe0] sm:$0xff] %vm1118_vm2, %v1082_v16  ;;  %v890_v32 = vmax.f32 %v721_v35, 0.0  ;;  %v1019_v49 = vmul.f32 %v1627_v45, %v954_v47  ;;  %v922_v51 = vmax.f32 %v849_v36, 0.0 }
 0x13f   : > { %1179 = vst.msk [vmem:[%s1638_s13 + $0x1e0] sm:$0xff] %vm1118_vm2, %v1114_v42  ;;  %v1085_v48 = vadd.f32 %v1021_v19, %v892_v43  ;;  %v1117_v50 = vadd.f32 %v1053_v20, %v924_v38  ;;  %v1051_v52 = vmul.f32 %v1627_v45, %v986_v31 }
 0x140   : > { %v1083_v53 = vadd.f32 %v1019_v49, %v890_v32 }
 0x141   : > { %1150 = vst.msk [vmem:[%s1638_s13 + $0xf8] sm:$0xff] %vm1118_vm2, %v1085_v48  ;;  %1182 = vst.msk [vmem:[%s1638_s13 + $0x1f8] sm:$0xff] %vm1118_vm2, %v1117_v50  ;;  %v1115_v54 = vadd.f32 %v1051_v52, %v922_v51 }
 0x142   : > { %1148 = vst.msk [vmem:[%s1638_s13 + $0xe8] sm:$0xff] %vm1118_vm2, %v1083_v53 }
 0x143   : > { %1180 = vst.msk [vmem:[%s1638_s13 + $0x1e8] sm:$0xff] %vm1118_vm2, %v1115_v54 }
 0x144 PF: > { %s15_s17 = sadd.s32 1, %s1494_s17  }
 0x145   : > { %p12_p4 = scmp.ge.s32.totalorder %s15_s17, 6  }
 0x147   :  { %14 = sbr.rel (!%p12_p4) target bundleno = 2 (0x2), region = 66 }

// kernel: _lambda_.7
= control target key start
LH: loop header
LB: loop body
LE: loop exit
PB: predicated region body
PF: predicated region fallthrough
CT: control target
= control target key end

     0   :  { %s1490_s15 = smov 0   ;;  %s1860_s0 = inlined_call_operand.vmem [shape: bf16[2048,72], index: 0, kind: input, shape index: {}]   ;;  %s1861_s1 = inlined_call_operand.vmem [shape: bf16[72,8], index: 1, kind: input, shape index: {}]   ;;  %s1862_s2 = inlined_call_operand.vmem [shape: f32[1,8], index: 2, kind: input, shape index: {}]   ;;  %s1863_s3 = inlined_call_operand.vmem [shape: f32[2048,8], index: 3, kind: input, shape index: {}]   ;;  %s1864_s4 = inlined_call_operand.vmem [shape: f32[2048,8], index: 4, kind: output, shape index: {}]  }
   0x1 LB: > { %s1206_s16 = sadd.s32 4294967295, %s1463_s15   ;;  %p1210_p0 = scmp.ge.s32.totalorder %s1463_s15, 1  ;;  %s1463_s15 = sphi %s1490_s15, %s14_s15  }
   0x2   : > { %p174_p1 = scmp.lt.s32.totalorder %s1463_s15, 5 }
   0x4   : > { %p175_p2 = pnand %p1210_p0, %p174_p1 }
   0x5   : > { %v1420_v0 = vld [vmem:[%s1861_s1] sm:$0xff] (!%p175_p2)   ;;  %v1421_v1 = vld [vmem:[%s1861_s1 + $0x8] sm:$0xff] (!%p175_p2)   ;;  %s1211_s21 = sshll.u32 (!%p175_p2), %s1206_s16, 6  ;;  %v1422_v2 = vld [vmem:[%s1861_s1 + $0x10] sm:$0xff] (!%p175_p2)   ;;  %vm491_vm0 = vcmask (!%p175_p2), 588800   ;;  %vm588_vm1 = vcmask (!%p175_p2), 1043456  }
   0x6   : > { %178 = sbr.rel (%p175_p2) target bundleno = 302 (0x12e), region = 36  ;;  %1326 = vmatprep.subr.bf16.mxu0 (!%p175_p2), %v1420_v0  ;;  %1400 = vmatprep.subr.bf16.mxu1 (!%p175_p2), %v1420_v0  ;;  %p206_p3 = scmp.lt.s32.totalorder (!%p175_p2), %s1211_s21, 255  ;;  %v1423_v3 = vld [vmem:[%s1861_s1 + $0x18] sm:$0xff] (!%p175_p2)   ;;  %v1424_v6 = vld [vmem:[%s1861_s1 + $0x20] ss:$0 sps:$4 sm:$0xff] (!%p175_p2)   ;;  %vm1073_vm2 = vcmask (!%p175_p2), 64512  }
   0x7   : > { %1327 = vmatpush3.bf16.msra.mxu0 (!%p175_p2), %v1420_v0  ;;  %1405 = vmatpush3.bf16.msra.mxu1 (!%p175_p2), %v1420_v0  ;;  %v590_v7 = vsel (!%p175_p2), %vm588_vm1, %v1424_v6, 0  ;;  %v1598_v42 = vld [vmem:[%s1862_s2] ss:$0 sm:$0xff] (!%p175_p2) }
   0x8   : > { %1328 = vmatprep.subr.bf16.mxu0 (!%p175_p2), %v1421_v1  ;;  %1401 = vmatprep.subr.bf16.mxu1 (!%p175_p2), %v1421_v1 }
   0xb   : > { %1329 = vmatpush3.bf16.msra.mxu0 (!%p175_p2), %v1421_v1  ;;  %1406 = vmatpush3.bf16.msra.mxu1 (!%p175_p2), %v1421_v1 }
   0xc   : > { %1330 = vmatprep.subr.bf16.mxu0 (!%p175_p2), %v1422_v2  ;;  %1402 = vmatprep.subr.bf16.mxu1 (!%p175_p2), %v1422_v2 }
   0xd   : > { %s1866_s21 = smov (!%p206_p3, %s1211_s21), 255 }
   0xe   : > { %s1212_s24 = sshll.u32 %s1866_s21, 2  ;;  %s1214_s6 = sshll.u32 %s1866_s21, 3 }
   0xf   : > { %s1516_s29 = scalar_lea.vmem %s1860_s0, %s1212_s24  ;;  %1331 = vmatpush3.bf16.msra.mxu0 %v1422_v2  ;;  %1407 = vmatpush3.bf16.msra.mxu1 %v1422_v2  ;;  %s1589_s9 = scalar_lea.vmem %s1863_s3, %s1214_s6 }
  0x10   : > { %v1425_v4 = vld [vmem:[%s1516_s29] sm:$0xff]   ;;  %1332 = vmatprep.subr.bf16.mxu0 %v1423_v3  ;;  %1403 = vmatprep.subr.bf16.mxu1 %v1423_v3  ;;  %v1427_v8 = vld [vmem:[%s1516_s29 + $0x8] sm:$0xff]   ;;  %v1429_v10 = vld [vmem:[%s1516_s29 + $0x10] sm:$0xff]   ;;  %s1609_s14 = scalar_lea.vmem %s1864_s4, %s1214_s6 }
  0x11   : > { %v1426_v5 = vld [vmem:[%s1516_s29 + $0x80] sm:$0xff]   ;;  %1336 = vmatprep.mubr.msk.bf16.mxu0 %vm491_vm0, %v1425_v4  ;;  %v1428_v9 = vld [vmem:[%s1516_s29 + $0x88] sm:$0xff]   ;;  %v1430_v11 = vld [vmem:[%s1516_s29 + $0x90] sm:$0xff]  }
  0x12   : > { %1368 = vmatprep.mubr.msk.bf16.mxu1 %vm491_vm0, %v1426_v5  ;;  %v1431_v12 = vld [vmem:[%s1516_s29 + $0x18] sm:$0xff]   ;;  %v1433_v14 = vld [vmem:[%s1516_s29 + $0x20] sm:$0xff]   ;;  %v1435_v16 = vld [vmem:[%s1516_s29 + $0x28] sm:$0xff]  }
  0x13   : > { %1333 = vmatpush3.bf16.msra.mxu0 %v1423_v3  ;;  %1408 = vmatpush3.bf16.msra.mxu1 %v1423_v3  ;;  %v1432_v13 = vld [vmem:[%s1516_s29 + $0x98] sm:$0xff]   ;;  %v1434_v15 = vld [vmem:[%s1516_s29 + $0xa0] sm:$0xff]   ;;  %v1436_v17 = vld [vmem:[%s1516_s29 + $0xa8] sm:$0xff]  }
  0x14   : > { %1410 = vmatprep.subr.msk.bf16.mxu0 %vm588_vm1, %v1424_v6  ;;  %1411 = vmatprep.subr.msk.bf16.mxu1 %vm588_vm1, %v1424_v6  ;;  %v1437_v18 = vld [vmem:[%s1516_s29 + $0x30] sm:$0xff]   ;;  %v1439_v20 = vld [vmem:[%s1516_s29 + $0x38] sm:$0xff]   ;;  %v1441_v22 = vld [vmem:[%s1516_s29 + $0x40] sm:$0xff]  }
  0x15   : > { %v1438_v19 = vld [vmem:[%s1516_s29 + $0xb0] sm:$0xff]   ;;  %v1440_v21 = vld [vmem:[%s1516_s29 + $0xb8] sm:$0xff]   ;;  %v1442_v23 = vld [vmem:[%s1516_s29 + $0xc0] sm:$0xff]  }
  0x16   : > { %v1443_v24 = vld [vmem:[%s1516_s29 + $0x48] sm:$0xff]   ;;  %v1445_v26 = vld [vmem:[%s1516_s29 + $0x50] sm:$0xff]   ;;  %v1447_v28 = vld [vmem:[%s1516_s29 + $0x58] sm:$0xff]  }
  0x17   : > { %1335 = vmatpush3.bf16.msra.mxu0 %v590_v7  ;;  %1409 = vmatpush3.bf16.msra.mxu1 %v590_v7  ;;  %v1444_v25 = vld [vmem:[%s1516_s29 + $0xc8] sm:$0xff]   ;;  %v1446_v27 = vld [vmem:[%s1516_s29 + $0xd0] sm:$0xff]   ;;  %v1448_v29 = vld [vmem:[%s1516_s29 + $0xd8] sm:$0xff]  }
  0x18   : > { %v1449_v30 = vld [vmem:[%s1516_s29 + $0x60] sm:$0xff]   ;;  %v1451_v32 = vld [vmem:[%s1516_s29 + $0x68] sm:$0xff]   ;;  %v1453_v34 = vld [vmem:[%s1516_s29 + $0x70] sm:$0xff]  }
  0x19   : > { %v1450_v31 = vld [vmem:[%s1516_s29 + $0xe0] sm:$0xff]   ;;  %v1452_v33 = vld [vmem:[%s1516_s29 + $0xe8] sm:$0xff]   ;;  %v1454_v35 = vld [vmem:[%s1516_s29 + $0xf0] sm:$0xff]  }
  0x1a   : > { %1337 = vmatmul.mubr.msk.bf16.vlgmr.msra.gmra.mrb[0].mxu0 %vm491_vm0, %v1427_v8  ;;  %1369 = vmatmul.mubr.msk.bf16.vlgmr.msra.gmra.mrb[0].mxu1 %vm491_vm0, %v1428_v9  ;;  %v1455_v36 = vld [vmem:[%s1516_s29 + $0x78] sm:$0xff]   ;;  %v883_v38 = vld [vmem:[%s1589_s9 + $0x10] sm:$0xff]  ;;  %v881_v40 = vld [vmem:[%s1589_s9] sm:$0xff] }
  0x1b   : > { %1340 = vmatprep.mubr.msk.bf16.mxu0 %vm491_vm0, %v1429_v10  ;;  %1372 = vmatprep.mubr.msk.bf16.mxu1 %vm491_vm0, %v1430_v11  ;;  %v1456_v37 = vld [vmem:[%s1516_s29 + $0xf8] sm:$0xff]   ;;  %v915_v39 = vld [vmem:[%s1589_s9 + $0x110] sm:$0xff]  ;;  %v913_v41 = vld [vmem:[%s1589_s9 + $0x100] sm:$0xff]  ;;  %v947_v45 = vmul.f32 2.0, %v883_v38  ;;  %v945_v51 = vmul.f32 2.0, %v881_v40 }
  0x1c   : > { %v884_v43 = vld [vmem:[%s1589_s9 + $0x18] sm:$0xff]  ;;  %v979_v46 = vmul.f32 2.0, %v915_v39  ;;  %v882_v47 = vld [vmem:[%s1589_s9 + $0x8] sm:$0xff]  ;;  %v977_v52 = vmul.f32 2.0, %v913_v41  ;;  %v887_v11 = vld [vmem:[%s1589_s9 + $0x30] sm:$0xff] }
  0x1d   : > { %v916_v44 = vld [vmem:[%s1589_s9 + $0x118] sm:$0xff]  ;;  %v914_v48 = vld [vmem:[%s1589_s9 + $0x108] sm:$0xff]  ;;  %v948_v57 = vmul.f32 2.0, %v884_v43  ;;  %v946_v63 = vmul.f32 2.0, %v882_v47 }
  0x1e   : > { %v980_v58 = vmul.f32 2.0, %v916_v44  ;;  %v978_v0 = vmul.f32 2.0, %v914_v48 }
  0x22   : > { %1341 = vmatmul.mubr.msk.bf16.gmra.mrb[4].mxu0 %vm491_vm0, %v1431_v12  ;;  %1373 = vmatmul.mubr.msk.bf16.gmra.mrb[4].mxu1 %vm491_vm0, %v1432_v13  ;;  %v919_v12 = vld [vmem:[%s1589_s9 + $0x130] sm:$0xff] }
  0x23   : > { %1344 = vmatprep.mubr.msk.bf16.mxu0 %vm491_vm0, %v1433_v14  ;;  %1376 = vmatprep.mubr.msk.bf16.mxu1 %vm491_vm0, %v1434_v15  ;;  %v885_v15 = vld [vmem:[%s1589_s9 + $0x20] sm:$0xff] }
  0x2a   : > { %1345 = vmatmul.mubr.msk.bf16.gmra.mrb[8].mxu0 %vm491_vm0, %v1435_v16  ;;  %1377 = vmatmul.mubr.msk.bf16.gmra.mrb[8].mxu1 %vm491_vm0, %v1436_v17  ;;  %v917_v16 = vld [vmem:[%s1589_s9 + $0x120] sm:$0xff] }
  0x2b   : > { %1348 = vmatprep.mubr.msk.bf16.mxu0 %vm491_vm0, %v1437_v18  ;;  %1380 = vmatprep.mubr.msk.bf16.mxu1 %vm491_vm0, %v1438_v19  ;;  %v888_v19 = vld [vmem:[%s1589_s9 + $0x38] sm:$0xff] }
  0x32   : > { %1349 = vmatmul.mubr.msk.bf16.gmra.mrb[12].mxu0 %vm491_vm0, %v1439_v20  ;;  %1381 = vmatmul.mubr.msk.bf16.gmra.mrb[12].mxu1 %vm491_vm0, %v1440_v21  ;;  %v920_v20 = vld [vmem:[%s1589_s9 + $0x138] sm:$0xff]  ;;  %v951_v21 = vmul.f32 2.0, %v887_v11 }
  0x33   : > { %1352 = vmatprep.mubr.msk.bf16.mxu0 %vm491_vm0, %v1441_v22  ;;  %1384 = vmatprep.mubr.msk.bf16.mxu1 %vm491_vm0, %v1442_v23  ;;  %v983_v22 = vmul.f32 2.0, %v919_v12  ;;  %v886_v23 = vld [vmem:[%s1589_s9 + $0x28] sm:$0xff] }
  0x34   : > { %v950_v39 = vmul.f32 2.0, %v886_v23 }
  0x3a   : > { %1353 = vmatmul.mubr.msk.bf16.gmra.mrb[16].mxu0 %vm491_vm0, %v1443_v24  ;;  %1385 = vmatmul.mubr.msk.bf16.gmra.mrb[16].mxu1 %vm491_vm0, %v1444_v25  ;;  %v918_v24 = vld [vmem:[%s1589_s9 + $0x128] sm:$0xff] }
  0x3b   : > { %1356 = vmatprep.mubr.msk.bf16.mxu0 %vm491_vm0, %v1445_v26  ;;  %1388 = vmatprep.mubr.msk.bf16.mxu1 %vm491_vm0, %v1446_v27  ;;  %v949_v27 = vmul.f32 2.0, %v885_v15  ;;  %v982_v40 = vmul.f32 2.0, %v918_v24 }
  0x42   : > { %1357 = vmatmul.mubr.msk.bf16.gmra.mrb[20].mxu0 %vm491_vm0, %v1447_v28  ;;  %1389 = vmatmul.mubr.msk.bf16.gmra.mrb[20].mxu1 %vm491_vm0, %v1448_v29  ;;  %v981_v28 = vmul.f32 2.0, %v917_v16 }
  0x43   : > { %1360 = vmatprep.mubr.msk.bf16.mxu0 %vm491_vm0, %v1449_v30  ;;  %1392 = vmatprep.mubr.msk.bf16.mxu1 %vm491_vm0, %v1450_v31 }
  0x4a   : > { %1361 = vmatmul.mubr.msk.bf16.gmra.mrb[24].mxu0 %vm491_vm0, %v1451_v32  ;;  %1393 = vmatmul.mubr.msk.bf16.gmra.mrb[24].mxu1 %vm491_vm0, %v1452_v33  ;;  %v952_v33 = vmul.f32 2.0, %v888_v19 }
  0x4b   : > { %1364 = vmatprep.mubr.msk.bf16.mxu0 %vm491_vm0, %v1453_v34  ;;  %1396 = vmatprep.mubr.msk.bf16.mxu1 %vm491_vm0, %v1454_v35  ;;  %v984_v34 = vmul.f32 2.0, %v920_v20 }
  0x52   : > { %1365 = vmatmul.mubr.msk.bf16.gmra.mrb[28].mxu0 %vm491_vm0, %v1455_v36  ;;  %1397 = vmatmul.mubr.msk.bf16.gmra.mrb[28].mxu1 %vm491_vm0, %v1456_v37 }
  0xed   : > { %v1338_v49 = vpop.f32.mrb[0].mxu0  ;;  %v1370_v50 = vpop.f32.mrb[0].mxu1 }
  0xee   : > { %v635_v53 = vadd.f32 %v1338_v49, %v1598_v42  ;;  %v763_v54 = vadd.f32 %v1370_v50, %v1598_v42  ;;  %v626_v55 = vpop.f32.mrb[1].mxu0  ;;  %v754_v56 = vpop.f32.mrb[1].mxu1 }
  0xef   : > { %v627_v59 = vadd.f32 %v1598_v42, %v626_v55  ;;  %v755_v60 = vadd.f32 %v1598_v42, %v754_v56  ;;  %v1339_v61 = vpop.f32.mrb[2].mxu0  ;;  %v1371_v62 = vpop.f32.mrb[2].mxu1  ;;  %v889_v56 = vld [vmem:[%s1589_s9 + $0x40] sm:$0xff] }
  0xf0   : > { %v1011_v1 = vadd.f32 %v947_v45, %v635_v53  ;;  %v1043_v2 = vadd.f32 %v979_v46, %v763_v54  ;;  %v638_v3 = vadd.f32 %v1339_v61, %v1598_v42  ;;  %v766_v4 = vadd.f32 %v1371_v62, %v1598_v42  ;;  %v629_v5 = vpop.f32.mrb[3].mxu0  ;;  %v757_v6 = vpop.f32.mrb[3].mxu1  ;;  %v923_v53 = vld [vmem:[%s1589_s9 + $0x150] sm:$0xff]  ;;  %v924_v61 = vld [vmem:[%s1589_s9 + $0x158] sm:$0xff] }
  0xf1   : > { %v1009_v7 = vadd.f32 %v945_v51, %v627_v59  ;;  %v1041_v8 = vadd.f32 %v977_v52, %v755_v60  ;;  %v630_v9 = vadd.f32 %v1598_v42, %v629_v5  ;;  %v758_v10 = vadd.f32 %v1598_v42, %v757_v6  ;;  %v891_v52 = vld [vmem:[%s1589_s9 + $0x50] sm:$0xff]  ;;  %v892_v60 = vld [vmem:[%s1589_s9 + $0x58] sm:$0xff] }
  0xf2   : > { %1076 = vst.msk [vmem:[%s1609_s14 + $0x10] sm:$0xff] %vm1073_vm2, %v1011_v1  ;;  %1108 = vst.msk [vmem:[%s1609_s14 + $0x110] sm:$0xff] %vm1073_vm2, %v1043_v2  ;;  %v1012_v13 = vadd.f32 %v948_v57, %v638_v3  ;;  %v1044_v14 = vadd.f32 %v980_v58, %v766_v4  ;;  %v921_v57 = vld [vmem:[%s1589_s9 + $0x140] sm:$0xff]  ;;  %v955_v62 = vmul.f32 2.0, %v891_v52  ;;  %v922_v1 = vld [vmem:[%s1589_s9 + $0x148] sm:$0xff]  ;;  %v953_v4 = vmul.f32 2.0, %v889_v56 }
  0xf3   : > { %1074 = vst.msk [vmem:[%s1609_s14] sm:$0xff] %vm1073_vm2, %v1009_v7  ;;  %1106 = vst.msk [vmem:[%s1609_s14 + $0x100] sm:$0xff] %vm1073_vm2, %v1041_v8  ;;  %v1010_v17 = vadd.f32 %v946_v63, %v630_v9  ;;  %v1042_v18 = vadd.f32 %v978_v0, %v758_v10  ;;  %v987_v63 = vmul.f32 2.0, %v923_v53  ;;  %v890_v0 = vld [vmem:[%s1589_s9 + $0x48] sm:$0xff]  ;;  %v985_v5 = vmul.f32 2.0, %v921_v57 }
  0xf4   : > { %1077 = vst.msk [vmem:[%s1609_s14 + $0x18] sm:$0xff] %vm1073_vm2, %v1012_v13  ;;  %1109 = vst.msk [vmem:[%s1609_s14 + $0x118] sm:$0xff] %vm1073_vm2, %v1044_v14  ;;  %v956_v10 = vmul.f32 2.0, %v892_v60  ;;  %v988_v11 = vmul.f32 2.0, %v924_v61  ;;  %v954_v16 = vmul.f32 2.0, %v890_v0 }
  0xf5   : > { %1075 = vst.msk [vmem:[%s1609_s14 + $0x8] sm:$0xff] %vm1073_vm2, %v1010_v17  ;;  %1107 = vst.msk [vmem:[%s1609_s14 + $0x108] sm:$0xff] %vm1073_vm2, %v1042_v18  ;;  %v1342_v25 = vpop.f32.mrb[4].mxu0  ;;  %v1374_v26 = vpop.f32.mrb[4].mxu1  ;;  %v986_v17 = vmul.f32 2.0, %v922_v1 }
  0xf6   : > { %v651_v29 = vadd.f32 %v1342_v25, %v1598_v42  ;;  %v779_v30 = vadd.f32 %v1374_v26, %v1598_v42  ;;  %v642_v31 = vpop.f32.mrb[5].mxu0  ;;  %v770_v32 = vpop.f32.mrb[5].mxu1 }
  0xf7   : > { %v643_v35 = vadd.f32 %v1598_v42, %v642_v31  ;;  %v771_v36 = vadd.f32 %v1598_v42, %v770_v32  ;;  %v1343_v37 = vpop.f32.mrb[6].mxu0  ;;  %v1375_v38 = vpop.f32.mrb[6].mxu1  ;;  %v893_v32 = vld [vmem:[%s1589_s9 + $0x60] sm:$0xff] }
  0xf8   : > { %v1015_v41 = vadd.f32 %v951_v21, %v651_v29  ;;  %v1047_v43 = vadd.f32 %v983_v22, %v779_v30  ;;  %v654_v44 = vadd.f32 %v1343_v37, %v1598_v42  ;;  %v782_v45 = vadd.f32 %v1375_v38, %v1598_v42  ;;  %v645_v46 = vpop.f32.mrb[7].mxu0  ;;  %v773_v47 = vpop.f32.mrb[7].mxu1  ;;  %v927_v29 = vld [vmem:[%s1589_s9 + $0x170] sm:$0xff]  ;;  %v928_v37 = vld [vmem:[%s1589_s9 + $0x178] sm:$0xff] }
  0xf9   : > { %v1013_v48 = vadd.f32 %v949_v27, %v643_v35  ;;  %v1045_v49 = vadd.f32 %v981_v28, %v771_v36  ;;  %v646_v50 = vadd.f32 %v1598_v42, %v645_v46  ;;  %v774_v51 = vadd.f32 %v1598_v42, %v773_v47  ;;  %v895_v28 = vld [vmem:[%s1589_s9 + $0x70] sm:$0xff]  ;;  %v896_v36 = vld [vmem:[%s1589_s9 + $0x78] sm:$0xff] }
  0xfa   : > { %1080 = vst.msk [vmem:[%s1609_s14 + $0x30] sm:$0xff] %vm1073_vm2, %v1015_v41  ;;  %1112 = vst.msk [vmem:[%s1609_s14 + $0x130] sm:$0xff] %vm1073_vm2, %v1047_v43  ;;  %v1016_v54 = vadd.f32 %v952_v33, %v654_v44  ;;  %v1048_v55 = vadd.f32 %v984_v34, %v782_v45  ;;  %v925_v33 = vld [vmem:[%s1589_s9 + $0x160] sm:$0xff]  ;;  %v959_v38 = vmul.f32 2.0, %v895_v28  ;;  %v926_v41 = vld [vmem:[%s1589_s9 + $0x168] sm:$0xff]  ;;  %v957_v45 = vmul.f32 2.0, %v893_v32 }
  0xfb   : > { %1078 = vst.msk [vmem:[%s1609_s14 + $0x20] sm:$0xff] %vm1073_vm2, %v1013_v48  ;;  %1110 = vst.msk [vmem:[%s1609_s14 + $0x120] sm:$0xff] %vm1073_vm2, %v1045_v49  ;;  %v1014_v58 = vadd.f32 %v950_v39, %v646_v50  ;;  %v1046_v59 = vadd.f32 %v982_v40, %v774_v51  ;;  %v991_v39 = vmul.f32 2.0, %v927_v29  ;;  %v894_v40 = vld [vmem:[%s1589_s9 + $0x68] sm:$0xff]  ;;  %v989_v46 = vmul.f32 2.0, %v925_v33 }
  0xfc   : > { %1081 = vst.msk [vmem:[%s1609_s14 + $0x38] sm:$0xff] %vm1073_vm2, %v1016_v54  ;;  %1113 = vst.msk [vmem:[%s1609_s14 + $0x138] sm:$0xff] %vm1073_vm2, %v1048_v55  ;;  %v960_v51 = vmul.f32 2.0, %v896_v36  ;;  %v992_v52 = vmul.f32 2.0, %v928_v37  ;;  %v958_v57 = vmul.f32 2.0, %v894_v40 }
  0xfd   : > { %1079 = vst.msk [vmem:[%s1609_s14 + $0x28] sm:$0xff] %vm1073_vm2, %v1014_v58  ;;  %1111 = vst.msk [vmem:[%s1609_s14 + $0x128] sm:$0xff] %vm1073_vm2, %v1046_v59  ;;  %v1346_v2 = vpop.f32.mrb[8].mxu0  ;;  %v1378_v3 = vpop.f32.mrb[8].mxu1  ;;  %v990_v58 = vmul.f32 2.0, %v926_v41 }
  0xfe   : > { %v667_v6 = vadd.f32 %v1346_v2, %v1598_v42  ;;  %v795_v7 = vadd.f32 %v1378_v3, %v1598_v42  ;;  %v658_v8 = vpop.f32.mrb[9].mxu0  ;;  %v786_v9 = vpop.f32.mrb[9].mxu1 }
  0xff   : > { %v659_v12 = vadd.f32 %v1598_v42, %v658_v8  ;;  %v787_v13 = vadd.f32 %v1598_v42, %v786_v9  ;;  %v1347_v14 = vpop.f32.mrb[10].mxu0  ;;  %v1379_v15 = vpop.f32.mrb[10].mxu1  ;;  %v897_v9 = vld [vmem:[%s1589_s9 + $0x80] sm:$0xff] }
 0x100   : > { %v1019_v18 = vadd.f32 %v955_v62, %v667_v6  ;;  %v1051_v19 = vadd.f32 %v987_v63, %v795_v7  ;;  %v670_v20 = vadd.f32 %v1347_v14, %v1598_v42  ;;  %v798_v21 = vadd.f32 %v1379_v15, %v1598_v42  ;;  %v661_v22 = vpop.f32.mrb[11].mxu0  ;;  %v789_v23 = vpop.f32.mrb[11].mxu1  ;;  %v931_v6 = vld [vmem:[%s1589_s9 + $0x190] sm:$0xff]  ;;  %v932_v14 = vld [vmem:[%s1589_s9 + $0x198] sm:$0xff] }
 0x101   : > { %v1017_v24 = vadd.f32 %v953_v4, %v659_v12  ;;  %v1049_v25 = vadd.f32 %v985_v5, %v787_v13  ;;  %v662_v26 = vadd.f32 %v1598_v42, %v661_v22  ;;  %v790_v27 = vadd.f32 %v1598_v42, %v789_v23  ;;  %v899_v5 = vld [vmem:[%s1589_s9 + $0x90] sm:$0xff]  ;;  %v900_v13 = vld [vmem:[%s1589_s9 + $0x98] sm:$0xff] }
 0x102   : > { %1084 = vst.msk [vmem:[%s1609_s14 + $0x50] sm:$0xff] %vm1073_vm2, %v1019_v18  ;;  %1116 = vst.msk [vmem:[%s1609_s14 + $0x150] sm:$0xff] %vm1073_vm2, %v1051_v19  ;;  %v1020_v30 = vadd.f32 %v956_v10, %v670_v20  ;;  %v1052_v31 = vadd.f32 %v988_v11, %v798_v21  ;;  %v929_v10 = vld [vmem:[%s1589_s9 + $0x180] sm:$0xff]  ;;  %v963_v15 = vmul.f32 2.0, %v899_v5  ;;  %v930_v18 = vld [vmem:[%s1589_s9 + $0x188] sm:$0xff]  ;;  %v961_v21 = vmul.f32 2.0, %v897_v9 }
 0x103   : > { %1082 = vst.msk [vmem:[%s1609_s14 + $0x40] sm:$0xff] %vm1073_vm2, %v1017_v24  ;;  %1114 = vst.msk [vmem:[%s1609_s14 + $0x140] sm:$0xff] %vm1073_vm2, %v1049_v25  ;;  %v1018_v34 = vadd.f32 %v954_v16, %v662_v26  ;;  %v1050_v35 = vadd.f32 %v986_v17, %v790_v27  ;;  %v995_v16 = vmul.f32 2.0, %v931_v6  ;;  %v898_v17 = vld [vmem:[%s1589_s9 + $0x88] sm:$0xff]  ;;  %v993_v22 = vmul.f32 2.0, %v929_v10 }
 0x104   : > { %1085 = vst.msk [vmem:[%s1609_s14 + $0x58] sm:$0xff] %vm1073_vm2, %v1020_v30  ;;  %1117 = vst.msk [vmem:[%s1609_s14 + $0x158] sm:$0xff] %vm1073_vm2, %v1052_v31  ;;  %v964_v27 = vmul.f32 2.0, %v900_v13  ;;  %v996_v28 = vmul.f32 2.0, %v932_v14  ;;  %v962_v33 = vmul.f32 2.0, %v898_v17 }
 0x105   : > { %1083 = vst.msk [vmem:[%s1609_s14 + $0x48] sm:$0xff] %vm1073_vm2, %v1018_v34  ;;  %1115 = vst.msk [vmem:[%s1609_s14 + $0x148] sm:$0xff] %vm1073_vm2, %v1050_v35  ;;  %v1350_v43 = vpop.f32.mrb[12].mxu0  ;;  %v1382_v44 = vpop.f32.mrb[12].mxu1  ;;  %v994_v34 = vmul.f32 2.0, %v930_v18 }
 0x106   : > { %v683_v47 = vadd.f32 %v1350_v43, %v1598_v42  ;;  %v811_v48 = vadd.f32 %v1382_v44, %v1598_v42  ;;  %v674_v49 = vpop.f32.mrb[13].mxu0  ;;  %v802_v50 = vpop.f32.mrb[13].mxu1 }
 0x107   : > { %v675_v53 = vadd.f32 %v1598_v42, %v674_v49  ;;  %v803_v54 = vadd.f32 %v1598_v42, %v802_v50  ;;  %v1351_v55 = vpop.f32.mrb[14].mxu0  ;;  %v1383_v56 = vpop.f32.mrb[14].mxu1  ;;  %v901_v50 = vld [vmem:[%s1589_s9 + $0xa0] sm:$0xff] }
 0x108   : > { %v1023_v59 = vadd.f32 %v959_v38, %v683_v47  ;;  %v1055_v60 = vadd.f32 %v991_v39, %v811_v48  ;;  %v686_v61 = vadd.f32 %v1351_v55, %v1598_v42  ;;  %v814_v62 = vadd.f32 %v1383_v56, %v1598_v42  ;;  %v677_v63 = vpop.f32.mrb[15].mxu0  ;;  %v805_v0 = vpop.f32.mrb[15].mxu1  ;;  %v935_v47 = vld [vmem:[%s1589_s9 + $0x1b0] sm:$0xff]  ;;  %v936_v55 = vld [vmem:[%s1589_s9 + $0x1b8] sm:$0xff] }
 0x109   : > { %v1021_v1 = vadd.f32 %v957_v45, %v675_v53  ;;  %v1053_v2 = vadd.f32 %v989_v46, %v803_v54  ;;  %v678_v3 = vadd.f32 %v1598_v42, %v677_v63  ;;  %v806_v4 = vadd.f32 %v1598_v42, %v805_v0  ;;  %v903_v46 = vld [vmem:[%s1589_s9 + $0xb0] sm:$0xff]  ;;  %v904_v54 = vld [vmem:[%s1589_s9 + $0xb8] sm:$0xff] }
 0x10a   : > { %1088 = vst.msk [vmem:[%s1609_s14 + $0x70] sm:$0xff] %vm1073_vm2, %v1023_v59  ;;  %1120 = vst.msk [vmem:[%s1609_s14 + $0x170] sm:$0xff] %vm1073_vm2, %v1055_v60  ;;  %v1024_v7 = vadd.f32 %v960_v51, %v686_v61  ;;  %v1056_v8 = vadd.f32 %v992_v52, %v814_v62  ;;  %v933_v51 = vld [vmem:[%s1589_s9 + $0x1a0] sm:$0xff]  ;;  %v967_v56 = vmul.f32 2.0, %v903_v46  ;;  %v934_v59 = vld [vmem:[%s1589_s9 + $0x1a8] sm:$0xff]  ;;  %v965_v62 = vmul.f32 2.0, %v901_v50 }
 0x10b   : > { %1086 = vst.msk [vmem:[%s1609_s14 + $0x60] sm:$0xff] %vm1073_vm2, %v1021_v1  ;;  %1118 = vst.msk [vmem:[%s1609_s14 + $0x160] sm:$0xff] %vm1073_vm2, %v1053_v2  ;;  %v1022_v11 = vadd.f32 %v958_v57, %v678_v3  ;;  %v1054_v12 = vadd.f32 %v990_v58, %v806_v4  ;;  %v999_v57 = vmul.f32 2.0, %v935_v47  ;;  %v902_v58 = vld [vmem:[%s1589_s9 + $0xa8] sm:$0xff]  ;;  %v997_v63 = vmul.f32 2.0, %v933_v51 }
 0x10c   : > { %1089 = vst.msk [vmem:[%s1609_s14 + $0x78] sm:$0xff] %vm1073_vm2, %v1024_v7  ;;  %1121 = vst.msk [vmem:[%s1609_s14 + $0x178] sm:$0xff] %vm1073_vm2, %v1056_v8  ;;  %v968_v4 = vmul.f32 2.0, %v904_v54  ;;  %v1000_v5 = vmul.f32 2.0, %v936_v55  ;;  %v966_v10 = vmul.f32 2.0, %v902_v58 }
 0x10d   : > { %1087 = vst.msk [vmem:[%s1609_s14 + $0x68] sm:$0xff] %vm1073_vm2, %v1022_v11  ;;  %1119 = vst.msk [vmem:[%s1609_s14 + $0x168] sm:$0xff] %vm1073_vm2, %v1054_v12  ;;  %v1354_v19 = vpop.f32.mrb[16].mxu0  ;;  %v1386_v20 = vpop.f32.mrb[16].mxu1  ;;  %v998_v11 = vmul.f32 2.0, %v934_v59 }
 0x10e   : > { %v699_v23 = vadd.f32 %v1354_v19, %v1598_v42  ;;  %v827_v24 = vadd.f32 %v1386_v20, %v1598_v42  ;;  %v690_v25 = vpop.f32.mrb[17].mxu0  ;;  %v818_v26 = vpop.f32.mrb[17].mxu1 }
 0x10f   : > { %v691_v29 = vadd.f32 %v1598_v42, %v690_v25  ;;  %v819_v30 = vadd.f32 %v1598_v42, %v818_v26  ;;  %v1355_v31 = vpop.f32.mrb[18].mxu0  ;;  %v1387_v32 = vpop.f32.mrb[18].mxu1  ;;  %v905_v26 = vld [vmem:[%s1589_s9 + $0xc0] sm:$0xff] }
 0x110   : > { %v1027_v35 = vadd.f32 %v963_v15, %v699_v23  ;;  %v1059_v36 = vadd.f32 %v995_v16, %v827_v24  ;;  %v702_v37 = vadd.f32 %v1355_v31, %v1598_v42  ;;  %v830_v38 = vadd.f32 %v1387_v32, %v1598_v42  ;;  %v693_v39 = vpop.f32.mrb[19].mxu0  ;;  %v821_v40 = vpop.f32.mrb[19].mxu1  ;;  %v939_v23 = vld [vmem:[%s1589_s9 + $0x1d0] sm:$0xff]  ;;  %v940_v31 = vld [vmem:[%s1589_s9 + $0x1d8] sm:$0xff] }
 0x111   : > { %v1025_v41 = vadd.f32 %v961_v21, %v691_v29  ;;  %v1057_v43 = vadd.f32 %v993_v22, %v819_v30  ;;  %v694_v44 = vadd.f32 %v1598_v42, %v693_v39  ;;  %v822_v45 = vadd.f32 %v1598_v42, %v821_v40  ;;  %v907_v22 = vld [vmem:[%s1589_s9 + $0xd0] sm:$0xff]  ;;  %v908_v30 = vld [vmem:[%s1589_s9 + $0xd8] sm:$0xff] }
 0x112   : > { %1092 = vst.msk [vmem:[%s1609_s14 + $0x90] sm:$0xff] %vm1073_vm2, %v1027_v35  ;;  %1124 = vst.msk [vmem:[%s1609_s14 + $0x190] sm:$0xff] %vm1073_vm2, %v1059_v36  ;;  %v1028_v48 = vadd.f32 %v964_v27, %v702_v37  ;;  %v1060_v49 = vadd.f32 %v996_v28, %v830_v38  ;;  %v937_v27 = vld [vmem:[%s1589_s9 + $0x1c0] sm:$0xff]  ;;  %v971_v32 = vmul.f32 2.0, %v907_v22  ;;  %v938_v35 = vld [vmem:[%s1589_s9 + $0x1c8] sm:$0xff]  ;;  %v969_v38 = vmul.f32 2.0, %v905_v26 }
 0x113   : > { %1090 = vst.msk [vmem:[%s1609_s14 + $0x80] sm:$0xff] %vm1073_vm2, %v1025_v41  ;;  %1122 = vst.msk [vmem:[%s1609_s14 + $0x180] sm:$0xff] %vm1073_vm2, %v1057_v43  ;;  %v1026_v52 = vadd.f32 %v962_v33, %v694_v44  ;;  %v1058_v53 = vadd.f32 %v994_v34, %v822_v45  ;;  %v1003_v33 = vmul.f32 2.0, %v939_v23  ;;  %v906_v34 = vld [vmem:[%s1589_s9 + $0xc8] sm:$0xff]  ;;  %v1001_v39 = vmul.f32 2.0, %v937_v27 }
 0x114   : > { %1093 = vst.msk [vmem:[%s1609_s14 + $0x98] sm:$0xff] %vm1073_vm2, %v1028_v48  ;;  %1125 = vst.msk [vmem:[%s1609_s14 + $0x198] sm:$0xff] %vm1073_vm2, %v1060_v49  ;;  %v972_v45 = vmul.f32 2.0, %v908_v30  ;;  %v1004_v46 = vmul.f32 2.0, %v940_v31  ;;  %v970_v51 = vmul.f32 2.0, %v906_v34 }
 0x115   : > { %1091 = vst.msk [vmem:[%s1609_s14 + $0x88] sm:$0xff] %vm1073_vm2, %v1026_v52  ;;  %1123 = vst.msk [vmem:[%s1609_s14 + $0x188] sm:$0xff] %vm1073_vm2, %v1058_v53  ;;  %v1358_v60 = vpop.f32.mrb[20].mxu0  ;;  %v1390_v61 = vpop.f32.mrb[20].mxu1  ;;  %v1002_v52 = vmul.f32 2.0, %v938_v35 }
 0x116   : > { %v715_v0 = vadd.f32 %v1358_v60, %v1598_v42  ;;  %v843_v1 = vadd.f32 %v1390_v61, %v1598_v42  ;;  %v706_v2 = vpop.f32.mrb[21].mxu0  ;;  %v834_v3 = vpop.f32.mrb[21].mxu1 }
 0x117   : > { %v707_v6 = vadd.f32 %v1598_v42, %v706_v2  ;;  %v835_v7 = vadd.f32 %v1598_v42, %v834_v3  ;;  %v1359_v8 = vpop.f32.mrb[22].mxu0  ;;  %v1391_v9 = vpop.f32.mrb[22].mxu1  ;;  %v909_v3 = vld [vmem:[%s1589_s9 + $0xe0] sm:$0xff] }
 0x118   : > { %v1031_v12 = vadd.f32 %v967_v56, %v715_v0  ;;  %v1063_v13 = vadd.f32 %v999_v57, %v843_v1  ;;  %v718_v14 = vadd.f32 %v1359_v8, %v1598_v42  ;;  %v846_v15 = vadd.f32 %v1391_v9, %v1598_v42  ;;  %v709_v16 = vpop.f32.mrb[23].mxu0  ;;  %v837_v17 = vpop.f32.mrb[23].mxu1  ;;  %v943_v0 = vld [vmem:[%s1589_s9 + $0x1f0] sm:$0xff]  ;;  %v944_v8 = vld [vmem:[%s1589_s9 + $0x1f8] sm:$0xff] }
 0x119   : > { %v1029_v18 = vadd.f32 %v965_v62, %v707_v6  ;;  %v1061_v19 = vadd.f32 %v997_v63, %v835_v7  ;;  %v710_v20 = vadd.f32 %v1598_v42, %v709_v16  ;;  %v838_v21 = vadd.f32 %v1598_v42, %v837_v17  ;;  %v911_v63 = vld [vmem:[%s1589_s9 + $0xf0] sm:$0xff]  ;;  %v912_v7 = vld [vmem:[%s1589_s9 + $0xf8] sm:$0xff] }
 0x11a   : > { %1096 = vst.msk [vmem:[%s1609_s14 + $0xb0] sm:$0xff] %vm1073_vm2, %v1031_v12  ;;  %1128 = vst.msk [vmem:[%s1609_s14 + $0x1b0] sm:$0xff] %vm1073_vm2, %v1063_v13  ;;  %v1032_v24 = vadd.f32 %v968_v4, %v718_v14  ;;  %v1064_v25 = vadd.f32 %v1000_v5, %v846_v15  ;;  %v941_v4 = vld [vmem:[%s1589_s9 + $0x1e0] sm:$0xff]  ;;  %v975_v9 = vmul.f32 2.0, %v911_v63  ;;  %v942_v12 = vld [vmem:[%s1589_s9 + $0x1e8] sm:$0xff]  ;;  %v973_v15 = vmul.f32 2.0, %v909_v3 }
 0x11b   : > { %1094 = vst.msk [vmem:[%s1609_s14 + $0xa0] sm:$0xff] %vm1073_vm2, %v1029_v18  ;;  %1126 = vst.msk [vmem:[%s1609_s14 + $0x1a0] sm:$0xff] %vm1073_vm2, %v1061_v19  ;;  %v1030_v28 = vadd.f32 %v966_v10, %v710_v20  ;;  %v1062_v29 = vadd.f32 %v998_v11, %v838_v21  ;;  %v1007_v10 = vmul.f32 2.0, %v943_v0  ;;  %v910_v11 = vld [vmem:[%s1589_s9 + $0xe8] sm:$0xff]  ;;  %v1005_v16 = vmul.f32 2.0, %v941_v4 }
 0x11c   : > { %1097 = vst.msk [vmem:[%s1609_s14 + $0xb8] sm:$0xff] %vm1073_vm2, %v1032_v24  ;;  %1129 = vst.msk [vmem:[%s1609_s14 + $0x1b8] sm:$0xff] %vm1073_vm2, %v1064_v25  ;;  %v976_v21 = vmul.f32 2.0, %v912_v7  ;;  %v1008_v22 = vmul.f32 2.0, %v944_v8  ;;  %v974_v27 = vmul.f32 2.0, %v910_v11 }
 0x11d   : > { %1095 = vst.msk [vmem:[%s1609_s14 + $0xa8] sm:$0xff] %vm1073_vm2, %v1030_v28  ;;  %1127 = vst.msk [vmem:[%s1609_s14 + $0x1a8] sm:$0xff] %vm1073_vm2, %v1062_v29  ;;  %v1362_v36 = vpop.f32.mrb[24].mxu0  ;;  %v1394_v37 = vpop.f32.mrb[24].mxu1  ;;  %v1006_v28 = vmul.f32 2.0, %v942_v12 }
 0x11e   : > { %v731_v40 = vadd.f32 %v1362_v36, %v1598_v42  ;;  %v859_v41 = vadd.f32 %v1394_v37, %v1598_v42  ;;  %v722_v43 = vpop.f32.mrb[25].mxu0  ;;  %v850_v44 = vpop.f32.mrb[25].mxu1 }
 0x11f   : > { %v723_v47 = vadd.f32 %v1598_v42, %v722_v43  ;;  %v851_v48 = vadd.f32 %v1598_v42, %v850_v44  ;;  %v1363_v49 = vpop.f32.mrb[26].mxu0  ;;  %v1395_v50 = vpop.f32.mrb[26].mxu1 }
 0x120   : > { %v1035_v53 = vadd.f32 %v971_v32, %v731_v40  ;;  %v1067_v54 = vadd.f32 %v1003_v33, %v859_v41  ;;  %v734_v55 = vadd.f32 %v1363_v49, %v1598_v42  ;;  %v862_v56 = vadd.f32 %v1395_v50, %v1598_v42  ;;  %v725_v57 = vpop.f32.mrb[27].mxu0  ;;  %v853_v58 = vpop.f32.mrb[27].mxu1 }
 0x121   : > { %v1033_v59 = vadd.f32 %v969_v38, %v723_v47  ;;  %v1065_v60 = vadd.f32 %v1001_v39, %v851_v48  ;;  %v726_v61 = vadd.f32 %v1598_v42, %v725_v57  ;;  %v854_v62 = vadd.f32 %v1598_v42, %v853_v58 }
 0x122   : > { %1100 = vst.msk [vmem:[%s1609_s14 + $0xd0] sm:$0xff] %vm1073_vm2, %v1035_v53  ;;  %1132 = vst.msk [vmem:[%s1609_s14 + $0x1d0] sm:$0xff] %vm1073_vm2, %v1067_v54  ;;  %v1036_v1 = vadd.f32 %v972_v45, %v734_v55  ;;  %v1068_v2 = vadd.f32 %v1004_v46, %v862_v56 }
 0x123   : > { %1098 = vst.msk [vmem:[%s1609_s14 + $0xc0] sm:$0xff] %vm1073_vm2, %v1033_v59  ;;  %1130 = vst.msk [vmem:[%s1609_s14 + $0x1c0] sm:$0xff] %vm1073_vm2, %v1065_v60  ;;  %v1034_v5 = vadd.f32 %v970_v51, %v726_v61  ;;  %v1066_v6 = vadd.f32 %v1002_v52, %v854_v62 }
 0x124   : > { %1101 = vst.msk [vmem:[%s1609_s14 + $0xd8] sm:$0xff] %vm1073_vm2, %v1036_v1  ;;  %1133 = vst.msk [vmem:[%s1609_s14 + $0x1d8] sm:$0xff] %vm1073_vm2, %v1068_v2 }
 0x125   : > { %1099 = vst.msk [vmem:[%s1609_s14 + $0xc8] sm:$0xff] %vm1073_vm2, %v1034_v5  ;;  %1131 = vst.msk [vmem:[%s1609_s14 + $0x1c8] sm:$0xff] %vm1073_vm2, %v1066_v6  ;;  %v1366_v13 = vpop.f32.mrb[28].mxu0  ;;  %v1398_v14 = vpop.f32.mrb[28].mxu1 }
 0x126   : > { %v747_v17 = vadd.f32 %v1366_v13, %v1598_v42  ;;  %v875_v18 = vadd.f32 %v1398_v14, %v1598_v42  ;;  %v738_v19 = vpop.f32.mrb[29].mxu0  ;;  %v866_v20 = vpop.f32.mrb[29].mxu1 }
 0x127   : > { %v739_v23 = vadd.f32 %v1598_v42, %v738_v19  ;;  %v867_v24 = vadd.f32 %v1598_v42, %v866_v20  ;;  %v1367_v25 = vpop.f32.mrb[30].mxu0  ;;  %v1399_v26 = vpop.f32.mrb[30].mxu1 }
 0x128   : > { %v1039_v29 = vadd.f32 %v975_v9, %v747_v17  ;;  %v1071_v30 = vadd.f32 %v1007_v10, %v875_v18  ;;  %v750_v31 = vadd.f32 %v1367_v25, %v1598_v42  ;;  %v878_v32 = vadd.f32 %v1399_v26, %v1598_v42  ;;  %v741_v33 = vpop.f32.mrb[31].mxu0  ;;  %v869_v34 = vpop.f32.mrb[31].mxu1 }
 0x129   : > { %v1037_v35 = vadd.f32 %v973_v15, %v739_v23  ;;  %v1069_v36 = vadd.f32 %v1005_v16, %v867_v24  ;;  %v742_v37 = vadd.f32 %v1598_v42, %v741_v33  ;;  %v870_v38 = vadd.f32 %v1598_v42, %v869_v34 }
 0x12a   : > { %1104 = vst.msk [vmem:[%s1609_s14 + $0xf0] sm:$0xff] %vm1073_vm2, %v1039_v29  ;;  %1136 = vst.msk [vmem:[%s1609_s14 + $0x1f0] sm:$0xff] %vm1073_vm2, %v1071_v30  ;;  %v1040_v39 = vadd.f32 %v976_v21, %v750_v31  ;;  %v1072_v40 = vadd.f32 %v1008_v22, %v878_v32 }
 0x12b   : > { %1102 = vst.msk [vmem:[%s1609_s14 + $0xe0] sm:$0xff] %vm1073_vm2, %v1037_v35  ;;  %1134 = vst.msk [vmem:[%s1609_s14 + $0x1e0] sm:$0xff] %vm1073_vm2, %v1069_v36  ;;  %v1038_v41 = vadd.f32 %v974_v27, %v742_v37  ;;  %v1070_v43 = vadd.f32 %v1006_v28, %v870_v38 }
 0x12c   : > { %1105 = vst.msk [vmem:[%s1609_s14 + $0xf8] sm:$0xff] %vm1073_vm2, %v1040_v39  ;;  %1137 = vst.msk [vmem:[%s1609_s14 + $0x1f8] sm:$0xff] %vm1073_vm2, %v1072_v40 }
 0x12d   : > { %1103 = vst.msk [vmem:[%s1609_s14 + $0xe8] sm:$0xff] %vm1073_vm2, %v1038_v41  ;;  %1135 = vst.msk [vmem:[%s1609_s14 + $0x1e8] sm:$0xff] %vm1073_vm2, %v1070_v43 }
 0x12e PF: > { %s14_s15 = sadd.s32 1, %s1463_s15  }
 0x12f   : > { %p11_p4 = scmp.ge.s32.totalorder %s14_s15, 6  }
 0x131   :  { %13 = sbr.rel (!%p11_p4) target bundleno = 1 (0x1), region = 69 }

</bundles_post_ra>
